<compile_context>
chip_gen: v7x
topology: tpu7x:2x2x1
jax: 0.10.0
libtpu: 0.0.40
codegen_flags: <defaults>
</compile_context>

<pallas_src>
import jax
import jax.numpy as jnp
from jax import lax
from jax.experimental import pallas as pl
from jax.experimental.pallas import tpu as pltpu


# --------------------------- warp-coordinate kernel ---------------------------

def _warp_coords_kernel(params_ref, depth_ref, u_ref, v_ref):
    # params_ref: SMEM [B*Vm, 12] = row-major 3x3 matrix M followed by 3-vector b.
    # Projection of ref pixel (x, y) with depth d:  p = d * (M @ [x, y, 1]) + b
    b = pl.program_id(0)
    v = pl.program_id(1)
    row = b * pl.num_programs(1) + v

    d = depth_ref[...]                                    # (h, w)
    h, w = d.shape
    x = lax.broadcasted_iota(jnp.int32, (h, w), 1).astype(jnp.float32)
    y = lax.broadcasted_iota(jnp.int32, (h, w), 0).astype(jnp.float32)

    p = [params_ref[row, k] for k in range(12)]
    nx = d * (p[0] * x + p[1] * y + p[2]) + p[9]
    ny = d * (p[3] * x + p[4] * y + p[5]) + p[10]
    dz = d * (p[6] * x + p[7] * y + p[8]) + p[11]

    valid = dz > 1e-6
    inv = pl.reciprocal(jnp.where(valid, dz, 1.0))        # exact; one EUP op
    # Invalid projections get a sentinel far outside the image so the bilinear
    # sampler's in-range test masks them -- no separate `valid` plane stored.
    u_ref[...] = jnp.where(valid, nx * inv, -2.0)
    v_ref[...] = jnp.where(valid, ny * inv, -2.0)


def warp_coords(depth, params, B, Vm):
    _, h, w = depth.shape
    out_spec = pl.BlockSpec((None, h, w), lambda b, v: (b * Vm + v, 0, 0))
    return pl.pallas_call(
        _warp_coords_kernel,
        grid=(B, Vm),
        in_specs=[
            pl.BlockSpec(memory_space=pltpu.MemorySpace.SMEM),      # params
            pl.BlockSpec((None, h, w), lambda b, v: (b, 0, 0)),     # depth: per-b
        ],
        out_specs=(out_spec, out_spec),
        out_shape=(jax.ShapeDtypeStruct((B * Vm, h, w), jnp.float32),
                   jax.ShapeDtypeStruct((B * Vm, h, w), jnp.float32)),
        compiler_params=pltpu.CompilerParams(
            dimension_semantics=("parallel", "parallel")),
    )(params, depth)


# ----------------------------- fused loss kernel ------------------------------

def _make_fused_loss_kernel(B, Vm, C, h, w):
    inv_c = 1.0 / float(C)
    inv_pix = 1.0 / float(B * h * w)
    inv_ssim = 1.0 / float(B * C * (h - 2) * (w - 2))     # AvgPool2d(3,1) valid
    inv_sx = 1.0 / float(B * h * (w - 1))
    inv_sy = 1.0 / float(B * (h - 1) * w)
    c1 = 0.01 ** 2
    c2 = 0.03 ** 2
    ninth = 1.0 / 9.0

    def shift_left(q):   # result[., j] = q[., j + 1]   (wraps at j == w-1; masked out)
        return pltpu.roll(q, w - 1, 1)

    def shift_up(q):     # result[i, .] = q[i + 1, .]   (wraps at i == h-1; masked out)
        return pltpu.roll(q, h - 1, 0)

    def pool3_sum(q):
        # 3x3 neighbourhood sum via XLU rotations (no scratch stores). Wrapped
        # border values are only ever read at non-interior pixels, which the
        # valid-pool interior mask excludes.
        r = pltpu.roll(q, 1, 0) + q + shift_up(q)
        return pltpu.roll(r, 1, 1) + r + shift_left(r)

    def kernel(warped_ref, mask_ref, ref_ref, depth_ref, out_ref,
               m1_ref, m2_ref, m3_ref, refp_ref, ref2p_ref, acc_ref):
        v = pl.program_id(1)

        row_i = lax.broadcasted_iota(jnp.int32, (h, w), 0)
        col_i = lax.broadcasted_iota(jnp.int32, (h, w), 1)
        colmask = (col_i < (w - 1)).astype(jnp.float32)
        rowmask = (row_i < (h - 1)).astype(jnp.float32)
        interior = ((row_i >= 1) & (row_i < (h - 1)) &
                    (col_i >= 1) & (col_i < (w - 1))).astype(jnp.float32)

        warped = warped_ref[...].astype(jnp.float32)       # (C, h, w), already masked
        mask = mask_ref[...].astype(jnp.float32)           # (h, w)
        ref = ref_ref[...]                                 # (C, h, w)

        # ---- per-batch-item init (scratch + cached ref SSIM pools) ----
        @pl.when(v == 0)
        def _init():
            big = jnp.full((h, w), 1e20, dtype=jnp.float32)
            m1_ref[...] = big
            m2_ref[...] = big
            m3_ref[...] = big
            acc_ref[0] = jnp.float32(0.0)                  # ssim partial sum
            acc_ref[1] = jnp.float32(0.0)                  # smooth partial sum
            for c in range(C):
                rc = ref[c]
                refp_ref[c] = pool3_sum(rc)                # view-independent stats
                ref2p_ref[c] = pool3_sum(rc * rc)

        # ---- reconstruction loss map (photometric + gradient) + invalid penalty ----
        photo = None
        gx = None
        gy = None
        for c in range(C):
            ec = (warped[c] - ref[c]) * mask
            a = jnp.abs(ec)
            dx = jnp.abs(shift_left(ec) - ec)
            dy = jnp.abs(shift_up(ec) - ec)
            photo = a if photo is None else photo + a
            gx = dx if gx is None else gx + dx
            gy = dy if gy is None else gy + dy
        loss_map = ((0.5 * inv_c) * photo
                    + (0.5 * inv_c) * (gx * colmask + gy * rowmask)
                    + 1e4 * (1.0 - mask))

        # ---- streaming per-pixel smallest-3 insertion across the view axis ----
        x = loss_map
        m1 = m1_ref[...]
        m2 = m2_ref[...]
        m3 = m3_ref[...]
        n1 = jnp.minimum(m1, x)
        x = jnp.maximum(m1, x)
        n2 = jnp.minimum(m2, x)
        x = jnp.maximum(m2, x)
        n3 = jnp.minimum(m3, x)
        m1_ref[...] = n1
        m2_ref[...] = n2
        m3_ref[...] = n3

        # ---- masked SSIM; reference gate `view < 3` == source views 1,2 == v < 2 ----
        @pl.when(v < 2)
        def _ssim():
            smask = pool3_sum(mask) * ninth
            wgt = smask * interior                         # valid-pool interior only
            ssim_sum = None
            for c in range(C):
                rc = ref[c]
                wc = warped[c]
                mu_x = refp_ref[c] * ninth                 # cached at v==0
                ex2 = ref2p_ref[c] * ninth
                mu_y = pool3_sum(wc) * ninth
                ey2 = pool3_sum(wc * wc) * ninth
                exy = pool3_sum(rc * wc) * ninth
                sig_x = ex2 - mu_x * mu_x
                sig_y = ey2 - mu_y * mu_y
                sig_xy = exy - mu_x * mu_y
                num = (2.0 * mu_x * mu_y + c1) * (2.0 * sig_xy + c2)
                den = (mu_x * mu_x + mu_y * mu_y + c1) * (sig_x + sig_y + c2)
                smap = jnp.clip((1.0 - num / den) * 0.5, 0.0, 1.0)
                t = jnp.sum(wgt * smap)
                ssim_sum = t if ssim_sum is None else ssim_sum + t
            acc_ref[0] += ssim_sum * inv_ssim

        # ---- image-aware depth smoothness (view independent -> once per b) ----
        @pl.when(v == 0)
        def _smooth():
            d = depth_ref[...]
            ddx = d - shift_left(d)
            ddy = d - shift_up(d)
            ix = None
            iy = None
            for c in range(C):
                rc = ref[c]
                ax = jnp.abs(rc - shift_left(rc))
                ay = jnp.abs(rc - shift_up(rc))
                ix = ax if ix is None else ix + ax
                iy = ay if iy is None else iy + ay
            wx = jnp.exp(-(ix * inv_c))
            wy = jnp.exp(-(iy * inv_c))
            acc_ref[1] += (jnp.sum(jnp.abs(ddx) * wx * colmask) * inv_sx +
                           jnp.sum(jnp.abs(ddy) * wy * rowmask) * inv_sy)

        # ---- finish this batch item: top-3 sum, emit per-b partial losses ----
        @pl.when(v == Vm - 1)
        def _finish():
            t1 = m1_ref[...]
            t2 = m2_ref[...]
            t3 = m3_ref[...]
            top3 = (jnp.where(t1 < 1e4, t1, 0.0) +
                    jnp.where(t2 < 1e4, t2, 0.0) +
                    jnp.where(t3 < 1e4, t3, 0.0))
            recon_b = jnp.sum(top3) * inv_pix
            lane3 = lax.broadcasted_iota(jnp.int32, (1, 128), 1)
            out_ref[...] = (jnp.where(lane3 == 0, recon_b, 0.0) +
                            jnp.where(lane3 == 1, acc_ref[0], 0.0) +
                            jnp.where(lane3 == 2, acc_ref[1], 0.0))

    return kernel


def fused_unsup_loss(warped, mask, ref_img, depth):
    BV, C, h, w = warped.shape
    B = ref_img.shape[0]
    Vm = BV // B
    kernel = _make_fused_loss_kernel(B, Vm, C, h, w)
    # TODO(synk): for production MVS resolutions, add a row-tile grid axis
    # (blocks (C, TH, W) with a 1-row halo) so VMEM residency stays O(TH*W).
    return pl.pallas_call(
        kernel,
        grid=(B, Vm),
        in_specs=[
            pl.BlockSpec((None, C, h, w), lambda b, v: (b * Vm + v, 0, 0, 0)),  # warped
            pl.BlockSpec((None, h, w), lambda b, v: (b * Vm + v, 0, 0)),        # mask
            pl.BlockSpec((None, C, h, w), lambda b, v: (b, 0, 0, 0)),   # ref: per-b resident
            pl.BlockSpec((None, h, w), lambda b, v: (b, 0, 0)),         # depth: per-b resident
        ],
        out_specs=pl.BlockSpec((None, 1, 128), lambda b, v: (b, 0, 0)),
        out_shape=jax.ShapeDtypeStruct((B, 1, 128), jnp.float32),
        scratch_shapes=[
            pltpu.VMEM((h, w), jnp.float32),            # m1 (running smallest)
            pltpu.VMEM((h, w), jnp.float32),            # m2
            pltpu.VMEM((h, w), jnp.float32),            # m3
            pltpu.VMEM((C, h, w), jnp.float32),         # cached pool3(ref)
            pltpu.VMEM((C, h, w), jnp.float32),         # cached pool3(ref*ref)
            pltpu.SMEM((2,), jnp.float32),              # [ssim, smooth] partial sums
        ],
        compiler_params=pltpu.CompilerParams(
            dimension_semantics=("parallel", "arbitrary"),
            vmem_limit_bytes=64 * 1024 * 1024),
    )(warped, mask, ref_img, depth)


# ------------------------------ JAX glue --------------------------------------

def _bilinear_sample(view_imgs, u, v):
    # TODO(synk): the data-dependent bilinear gather (grid_sample) has no clean
    # Pallas/TPU expression; fusing it into the loss kernel (per-tile DMA of source
    # rows driven by scalar-prefetched bounds) would remove the HBM round trip of
    # `warped`/`mask`, but the gather itself stays in plain JAX here.
    VB, C, h, w = view_imgs.shape
    x0 = jnp.floor(u)
    y0 = jnp.floor(v)
    inside = (u >= 0.0) & (u <= w - 1.0) & (v >= 0.0) & (v <= h - 1.0)
    x0c = jnp.clip(x0, 0, w - 1).astype(jnp.int32)
    x1c = jnp.clip(x0 + 1.0, 0, w - 1).astype(jnp.int32)
    y0c = jnp.clip(y0, 0, h - 1).astype(jnp.int32)
    y1c = jnp.clip(y0 + 1.0, 0, h - 1).astype(jnp.int32)
    wx = (u - x0)[:, None]
    wy = (v - y0)[:, None]
    flat = view_imgs.reshape(VB, C, h * w)

    def gather(yy, xx):
        idx = (yy * w + xx).reshape(VB, 1, h * w)
        g = jnp.take_along_axis(flat, jnp.broadcast_to(idx, (VB, C, h * w)), axis=2)
        return g.reshape(VB, C, h, w)

    Ia = gather(y0c, x0c)
    Ib = gather(y0c, x1c)
    Ic = gather(y1c, x0c)
    Id = gather(y1c, x1c)
    warped = (Ia * (1 - wx) * (1 - wy) + Ib * wx * (1 - wy) +
              Ic * (1 - wx) * wy + Id * wx * wy)
    mask = inside.astype(jnp.float32)
    return warped * mask[:, None], mask


def unsup_loss_forward(imgs, cams, depth, *, stream_bf16=False):
    # imgs: [B, V, C, H, W], cams: [B, V, 2, 4, 4] (slot 0 extrinsic, slot 1 intrinsic),
    # depth: [B, H, W].  Returns the scalar unsup_loss.
    imgs = imgs.astype(jnp.float32)
    cams = cams.astype(jnp.float32)
    depth = depth.astype(jnp.float32)
    B, V, C, H, W = imgs.shape
    Vm = V - 1
    assert Vm >= 3, "need at least 3 source views (top-3 selection)"

    ref_img = imgs[:, 0]                                    # [B, C, H, W]
    view_imgs = imgs[:, 1:].reshape(B * Vm, C, H, W)        # row = b*Vm + v

    # camera algebra (tiny 3x3 matrices -> plain JAX)
    K_ref = cams[:, 0, 1, :3, :3]
    R_ref = cams[:, 0, 0, :3, :3]
    t_ref = cams[:, 0, 0, :3, 3]
    K_v = cams[:, 1:, 1, :3, :3]
    R_v = cams[:, 1:, 0, :3, :3]
    t_v = cams[:, 1:, 0, :3, 3]
    K_ref_inv = jnp.linalg.inv(K_ref)
    R_rel = jnp.einsum('bvij,bkj->bvik', R_v, R_ref)        # R_v @ R_ref^T
    t_rel = t_v - jnp.einsum('bvij,bj->bvi', R_rel, t_ref)
    M = jnp.einsum('bvij,bvjk,bkl->bvil', K_v, R_rel, K_ref_inv)
    bvec = jnp.einsum('bvij,bvj->bvi', K_v, t_rel)
    params = jnp.concatenate([M.reshape(B, Vm, 9), bvec], axis=-1).reshape(B * Vm, 12)

    u, vg = warp_coords(depth, params, B, Vm)               # each [B*Vm, H, W]
    warped, mask = _bilinear_sample(view_imgs, u, vg)

    if stream_bf16:
        # Halves the fused kernel's HBM read traffic (largest tensor); math stays f32.
        warped = warped.astype(jnp.bfloat16)
        mask = mask.astype(jnp.bfloat16)

    parts = fused_unsup_loss(warped, mask, ref_img, depth)  # [B, 1, 128] per-b partials
    sums = jnp.sum(parts[:, 0, :3], axis=0)
    reconstr_loss, ssim_loss, smooth_loss = sums[0], sums[1], sums[2]
    return 12.0 * reconstr_loss + 6.0 * ssim_loss + 0.05 * smooth_loss


# ------------------------------ test harness -----------------------------------

def make_cams(B, V, H, W):
    f = float(max(H, W))
    K = jnp.array([[f, 0, W / 2.0, 0],
                   [0, f, H / 2.0, 0],
                   [0, 0, 1, 0],
                   [0, 0, 0, 1]], jnp.float32)
    cams = []
    for v in range(V):
        E = jnp.eye(4, dtype=jnp.float32)
        E = E.at[:3, 3].set(jnp.array([0.3 * v, 0.15 * v, 0.0], jnp.float32))
        cams.append(jnp.stack([E, K], axis=0))
    cams = jnp.stack(cams, axis=0)                          # [V, 2, 4, 4]
    return jnp.broadcast_to(cams[None], (B, V, 2, 4, 4))


if __name__ == "__main__":
    key = jax.random.PRNGKey(0)
    k_img, k_depth = jax.random.split(key)

    # Small but lane-dense test shape (W multiple of 128 keeps every store unmasked).
    B, V, C, H, W = 2, 5, 3, 16, 128
    imgs = jax.random.uniform(k_img, (B, V, C, H, W), dtype=jnp.float32)
    depth = 2.0 + 2.0 * jax.random.uniform(k_depth, (B, H, W), dtype=jnp.float32)
    cams = make_cams(B, V, H, W)

    loss = jax.jit(unsup_loss_forward)(imgs, cams, depth)
    jax.block_until_ready(loss)
    print("KERNEL_OK")
</pallas_src>

<mosaic_0001>
module attributes {stable_mosaic.version = 11 : i64} {
  func.func private @main(%arg0: i32) attributes {dimension_semantics = [#tpu.dimension_semantics<core_parallel>], iteration_bounds = array<i64: 2>, tpu.core_type = #tpu.core_type<sc_scalar_subcore>, window_params = []} {
    return
  }
}

module attributes {stable_mosaic.version = 11 : i64} {
  func.func private @main(%arg0: i32) attributes {dimension_semantics = [#tpu.dimension_semantics<core_parallel>], iteration_bounds = array<i64: 2>, tpu.core_type = #tpu.core_type<sc_scalar_subcore>, window_params = []} {
    return
  }
}

module attributes {stable_mosaic.version = 11 : i64} {
  func.func @_warp_coords_kernel(%arg0: i32, %arg1: i32, %arg2: memref<8x12xf32, #tpu.memory_space<smem>>, %arg3: memref<1x16x128xf32, #tpu.memory_space<vmem>>, %arg4: memref<1x16x128xf32, #tpu.memory_space<vmem>>, %arg5: memref<1x16x128xf32, #tpu.memory_space<vmem>>) attributes {dimension_semantics = [#tpu.dimension_semantics<parallel>, #tpu.dimension_semantics<parallel>], iteration_bounds = array<i64: 2, 4>, scalar_prefetch = 0 : i64, scratch_operands = 0 : i64, tpu.core_type = #tpu.core_type<tc>, window_params = [{transform_indices = @transform_0, window_bounds = array<i64: 8, 12>}, {transform_indices = @transform_1, window_bounds = array<i64: 1, 16, 128>}, {transform_indices = @transform_2, window_bounds = array<i64: 1, 16, 128>}, {transform_indices = @transform_3, window_bounds = array<i64: 1, 16, 128>}]} {
    %c4_i32 = arith.constant 4 : i32
    %0 = arith.muli %arg0, %c4_i32 : i32
    %1 = arith.addi %0, %arg1 : i32
    %c0 = arith.constant 0 : index
    %c0_0 = arith.constant 0 : index
    %c0_1 = arith.constant 0 : index
    %2 = vector.load %arg3[%c0, %c0_0, %c0_1] : memref<1x16x128xf32, #tpu.memory_space<vmem>>, vector<1x16x128xf32>
    %3 = vector.shape_cast %2 : vector<1x16x128xf32> to vector<16x128xf32>
    %4 = tpu.iota {dimensions = array<i32: 1>} : vector<16x128xi32>
    %5 = arith.sitofp %4 : vector<16x128xi32> to vector<16x128xf32>
    %6 = tpu.iota {dimensions = array<i32: 0>} : vector<16x128xi32>
    %7 = arith.sitofp %6 : vector<16x128xi32> to vector<16x128xf32>
    %8 = arith.index_cast %1 : i32 to index
    %c0_2 = arith.constant 0 : index
    %9 = memref.load %arg2[%8, %c0_2] : memref<8x12xf32, #tpu.memory_space<smem>>
    %10 = arith.index_cast %1 : i32 to index
    %c1 = arith.constant 1 : index
    %11 = memref.load %arg2[%10, %c1] : memref<8x12xf32, #tpu.memory_space<smem>>
    %12 = arith.index_cast %1 : i32 to index
    %c2 = arith.constant 2 : index
    %13 = memref.load %arg2[%12, %c2] : memref<8x12xf32, #tpu.memory_space<smem>>
    %14 = arith.index_cast %1 : i32 to index
    %c3 = arith.constant 3 : index
    %15 = memref.load %arg2[%14, %c3] : memref<8x12xf32, #tpu.memory_space<smem>>
    %16 = arith.index_cast %1 : i32 to index
    %c4 = arith.constant 4 : index
    %17 = memref.load %arg2[%16, %c4] : memref<8x12xf32, #tpu.memory_space<smem>>
    %18 = arith.index_cast %1 : i32 to index
    %c5 = arith.constant 5 : index
    %19 = memref.load %arg2[%18, %c5] : memref<8x12xf32, #tpu.memory_space<smem>>
    %20 = arith.index_cast %1 : i32 to index
    %c6 = arith.constant 6 : index
    %21 = memref.load %arg2[%20, %c6] : memref<8x12xf32, #tpu.memory_space<smem>>
    %22 = arith.index_cast %1 : i32 to index
    %c7 = arith.constant 7 : index
    %23 = memref.load %arg2[%22, %c7] : memref<8x12xf32, #tpu.memory_space<smem>>
    %24 = arith.index_cast %1 : i32 to index
    %c8 = arith.constant 8 : index
    %25 = memref.load %arg2[%24, %c8] : memref<8x12xf32, #tpu.memory_space<smem>>
    %26 = arith.index_cast %1 : i32 to index
    %c9 = arith.constant 9 : index
    %27 = memref.load %arg2[%26, %c9] : memref<8x12xf32, #tpu.memory_space<smem>>
    %28 = arith.index_cast %1 : i32 to index
    %c10 = arith.constant 10 : index
    %29 = memref.load %arg2[%28, %c10] : memref<8x12xf32, #tpu.memory_space<smem>>
    %30 = arith.index_cast %1 : i32 to index
    %c11 = arith.constant 11 : index
    %31 = memref.load %arg2[%30, %c11] : memref<8x12xf32, #tpu.memory_space<smem>>
    %32 = vector.broadcast %9 : f32 to vector<16x128xf32>
    %33 = arith.mulf %32, %5 : vector<16x128xf32>
    %34 = vector.broadcast %11 : f32 to vector<16x128xf32>
    %35 = arith.mulf %34, %7 : vector<16x128xf32>
    %36 = arith.addf %33, %35 : vector<16x128xf32>
    %37 = vector.broadcast %13 : f32 to vector<16x128xf32>
    %38 = arith.addf %36, %37 : vector<16x128xf32>
    %39 = arith.mulf %3, %38 : vector<16x128xf32>
    %40 = vector.broadcast %27 : f32 to vector<16x128xf32>
    %41 = arith.addf %39, %40 : vector<16x128xf32>
    %42 = vector.broadcast %15 : f32 to vector<16x128xf32>
    %43 = arith.mulf %42, %5 : vector<16x128xf32>
    %44 = vector.broadcast %17 : f32 to vector<16x128xf32>
    %45 = arith.mulf %44, %7 : vector<16x128xf32>
    %46 = arith.addf %43, %45 : vector<16x128xf32>
    %47 = vector.broadcast %19 : f32 to vector<16x128xf32>
    %48 = arith.addf %46, %47 : vector<16x128xf32>
    %49 = arith.mulf %3, %48 : vector<16x128xf32>
    %50 = vector.broadcast %29 : f32 to vector<16x128xf32>
    %51 = arith.addf %49, %50 : vector<16x128xf32>
    %52 = vector.broadcast %21 : f32 to vector<16x128xf32>
    %53 = arith.mulf %52, %5 : vector<16x128xf32>
    %54 = vector.broadcast %23 : f32 to vector<16x128xf32>
    %55 = arith.mulf %54, %7 : vector<16x128xf32>
    %56 = arith.addf %53, %55 : vector<16x128xf32>
    %57 = vector.broadcast %25 : f32 to vector<16x128xf32>
    %58 = arith.addf %56, %57 : vector<16x128xf32>
    %59 = arith.mulf %3, %58 : vector<16x128xf32>
    %60 = vector.broadcast %31 : f32 to vector<16x128xf32>
    %61 = arith.addf %59, %60 : vector<16x128xf32>
    %cst = arith.constant 9.99999997E-7 : f32
    %62 = vector.broadcast %cst : f32 to vector<16x128xf32>
    %63 = arith.cmpf ogt, %61, %62 : vector<16x128xf32>
    %cst_3 = arith.constant 1.000000e+00 : f32
    %64 = vector.broadcast %cst_3 : f32 to vector<16x128xf32>
    %65 = arith.select %63, %61, %64 : vector<16x128xi1>, vector<16x128xf32>
    %66 = tpu.reciprocal %65 : vector<16x128xf32> -> vector<16x128xf32>
    %67 = arith.mulf %41, %66 : vector<16x128xf32>
    %cst_4 = arith.constant -2.000000e+00 : f32
    %68 = vector.broadcast %cst_4 : f32 to vector<16x128xf32>
    %69 = arith.select %63, %67, %68 : vector<16x128xi1>, vector<16x128xf32>
    %c0_5 = arith.constant 0 : index
    %c0_6 = arith.constant 0 : index
    %c0_7 = arith.constant 0 : index
    %70 = vector.load %arg4[%c0_5, %c0_6, %c0_7] : memref<1x16x128xf32, #tpu.memory_space<vmem>>, vector<1x16x128xf32>
    %71 = vector.shape_cast %70 : vector<1x16x128xf32> to vector<16x128xf32>
    %72 = vector.shape_cast %69 : vector<16x128xf32> to vector<1x16x128xf32>
    tpu.vector_store %arg4[%c0_5, %c0_6, %c0_7], %72 {strides = array<i32>} : memref<1x16x128xf32, #tpu.memory_space<vmem>>, vector<1x16x128xf32>,
    %73 = arith.mulf %51, %66 : vector<16x128xf32>
    %cst_8 = arith.constant -2.000000e+00 : f32
    %74 = vector.broadcast %cst_8 : f32 to vector<16x128xf32>
    %75 = arith.select %63, %73, %74 : vector<16x128xi1>, vector<16x128xf32>
    %c0_9 = arith.constant 0 : index
    %c0_10 = arith.constant 0 : index
    %c0_11 = arith.constant 0 : index
    %76 = vector.load %arg5[%c0_9, %c0_10, %c0_11] : memref<1x16x128xf32, #tpu.memory_space<vmem>>, vector<1x16x128xf32>
    %77 = vector.shape_cast %76 : vector<1x16x128xf32> to vector<16x128xf32>
    %78 = vector.shape_cast %75 : vector<16x128xf32> to vector<1x16x128xf32>
    tpu.vector_store %arg5[%c0_9, %c0_10, %c0_11], %78 {strides = array<i32>} : memref<1x16x128xf32, #tpu.memory_space<vmem>>, vector<1x16x128xf32>,
    return
  }
  func.func @transform_0(%arg0: i32, %arg1: i32) -> (i32, i32) {
    %c0_i32 = arith.constant 0 : i32
    %c0_i32_0 = arith.constant 0 : i32
    %c0_i32_1 = arith.constant 0 : i32
    return %c0_i32, %c0_i32_0 : i32, i32
  }
  func.func @transform_1(%arg0: i32, %arg1: i32) -> (i32, i32, i32) {
    %c0_i32 = arith.constant 0 : i32
    %c0_i32_0 = arith.constant 0 : i32
    %c0_i32_1 = arith.constant 0 : i32
    return %arg0, %c0_i32, %c0_i32_0 : i32, i32, i32
  }
  func.func @transform_2(%arg0: i32, %arg1: i32) -> (i32, i32, i32) {
    %c4_i32 = arith.constant 4 : i32
    %0 = arith.muli %arg0, %c4_i32 : i32
    %1 = arith.addi %0, %arg1 : i32
    %c0_i32 = arith.constant 0 : i32
    %c0_i32_0 = arith.constant 0 : i32
    %c0_i32_1 = arith.constant 0 : i32
    return %1, %c0_i32, %c0_i32_0 : i32, i32, i32
  }
  func.func @transform_3(%arg0: i32, %arg1: i32) -> (i32, i32, i32) {
    %c4_i32 = arith.constant 4 : i32
    %0 = arith.muli %arg0, %c4_i32 : i32
    %1 = arith.addi %0, %arg1 : i32
    %c0_i32 = arith.constant 0 : i32
    %c0_i32_0 = arith.constant 0 : i32
    %c0_i32_1 = arith.constant 0 : i32
    return %1, %c0_i32, %c0_i32_0 : i32, i32, i32
  }
}

module attributes {stable_mosaic.version = 11 : i64} {
  func.func @kernel(%arg0: i32, %arg1: i32, %arg2: memref<1x3x16x128xf32, #tpu.memory_space<vmem>>, %arg3: memref<1x16x128xf32, #tpu.memory_space<vmem>>, %arg4: memref<1x3x16x128xf32, #tpu.memory_space<vmem>>, %arg5: memref<1x16x128xf32, #tpu.memory_space<vmem>>, %arg6: memref<1x1x128xf32, #tpu.memory_space<vmem>>, %arg7: memref<16x128xf32, #tpu.memory_space<vmem>>, %arg8: memref<16x128xf32, #tpu.memory_space<vmem>>, %arg9: memref<16x128xf32, #tpu.memory_space<vmem>>, %arg10: memref<3x16x128xf32, #tpu.memory_space<vmem>>, %arg11: memref<3x16x128xf32, #tpu.memory_space<vmem>>, %arg12: memref<2xf32, #tpu.memory_space<smem>>) attributes {dimension_semantics = [#tpu.dimension_semantics<parallel>, #tpu.dimension_semantics<arbitrary>], iteration_bounds = array<i64: 2, 4>, scalar_prefetch = 0 : i64, scratch_operands = 6 : i64, tpu.core_type = #tpu.core_type<tc>, window_params = [{transform_indices = @transform_0, window_bounds = array<i64: 1, 3, 16, 128>}, {transform_indices = @transform_1, window_bounds = array<i64: 1, 16, 128>}, {transform_indices = @transform_2, window_bounds = array<i64: 1, 3, 16, 128>}, {transform_indices = @transform_3, window_bounds = array<i64: 1, 16, 128>}, {transform_indices = @transform_4, window_bounds = array<i64: 1, 1, 128>}]} {
    %0 = tpu.iota {dimensions = array<i32: 0>} : vector<16x128xi32>
    %1 = tpu.iota {dimensions = array<i32: 1>} : vector<16x128xi32>
    %c127_i32 = arith.constant 127 : i32
    %2 = vector.broadcast %c127_i32 : i32 to vector<16x128xi32>
    %3 = arith.cmpi slt, %1, %2 : vector<16x128xi32>
    %4 = arith.extui %3 : vector<16x128xi1> to vector<16x128xi32>
    %5 = arith.sitofp %4 : vector<16x128xi32> to vector<16x128xf32>
    %c15_i32 = arith.constant 15 : i32
    %6 = vector.broadcast %c15_i32 : i32 to vector<16x128xi32>
    %7 = arith.cmpi slt, %0, %6 : vector<16x128xi32>
    %8 = arith.extui %7 : vector<16x128xi1> to vector<16x128xi32>
    %9 = arith.sitofp %8 : vector<16x128xi32> to vector<16x128xf32>
    %c1_i32 = arith.constant 1 : i32
    %10 = vector.broadcast %c1_i32 : i32 to vector<16x128xi32>
    %11 = arith.cmpi sge, %0, %10 : vector<16x128xi32>
    %c15_i32_0 = arith.constant 15 : i32
    %12 = vector.broadcast %c15_i32_0 : i32 to vector<16x128xi32>
    %13 = arith.cmpi slt, %0, %12 : vector<16x128xi32>
    %14 = arith.andi %11, %13 : vector<16x128xi1>
    %c1_i32_1 = arith.constant 1 : i32
    %15 = vector.broadcast %c1_i32_1 : i32 to vector<16x128xi32>
    %16 = arith.cmpi sge, %1, %15 : vector<16x128xi32>
    %17 = arith.andi %14, %16 : vector<16x128xi1>
    %c127_i32_2 = arith.constant 127 : i32
    %18 = vector.broadcast %c127_i32_2 : i32 to vector<16x128xi32>
    %19 = arith.cmpi slt, %1, %18 : vector<16x128xi32>
    %20 = arith.andi %17, %19 : vector<16x128xi1>
    %21 = arith.extui %20 : vector<16x128xi1> to vector<16x128xi32>
    %22 = arith.sitofp %21 : vector<16x128xi32> to vector<16x128xf32>
    %c0 = arith.constant 0 : index
    %c0_3 = arith.constant 0 : index
    %c0_4 = arith.constant 0 : index
    %c0_5 = arith.constant 0 : index
    %23 = vector.load %arg2[%c0, %c0_3, %c0_4, %c0_5] : memref<1x3x16x128xf32, #tpu.memory_space<vmem>>, vector<1x3x16x128xf32>
    %24 = vector.shape_cast %23 : vector<1x3x16x128xf32> to vector<3x16x128xf32>
    %c0_6 = arith.constant 0 : index
    %c0_7 = arith.constant 0 : index
    %c0_8 = arith.constant 0 : index
    %25 = vector.load %arg3[%c0_6, %c0_7, %c0_8] : memref<1x16x128xf32, #tpu.memory_space<vmem>>, vector<1x16x128xf32>
    %26 = vector.shape_cast %25 : vector<1x16x128xf32> to vector<16x128xf32>
    %c0_9 = arith.constant 0 : index
    %c0_10 = arith.constant 0 : index
    %c0_11 = arith.constant 0 : index
    %c0_12 = arith.constant 0 : index
    %27 = vector.load %arg4[%c0_9, %c0_10, %c0_11, %c0_12] : memref<1x3x16x128xf32, #tpu.memory_space<vmem>>, vector<1x3x16x128xf32>
    %28 = vector.shape_cast %27 : vector<1x3x16x128xf32> to vector<3x16x128xf32>
    %c0_i32 = arith.constant 0 : i32
    %29 = arith.cmpi eq, %arg1, %c0_i32 : i32
    %30 = arith.extui %29 : i1 to i32
    %c0_i32_13 = arith.constant 0 : i32
    %31 = arith.cmpi ne, %30, %c0_i32_13 : i32
    scf.if %31 {
      %cst_39 = arith.constant 1.000000e+20 : f32
      %110 = vector.broadcast %cst_39 : f32 to vector<16x128xf32>
      %c0_40 = arith.constant 0 : index
      %c0_41 = arith.constant 0 : index
      %111 = vector.load %arg7[%c0_40, %c0_41] : memref<16x128xf32, #tpu.memory_space<vmem>>, vector<16x128xf32>
      tpu.vector_store %arg7[%c0_40, %c0_41], %110 {strides = array<i32>} : memref<16x128xf32, #tpu.memory_space<vmem>>, vector<16x128xf32>,
      %c0_42 = arith.constant 0 : index
      %c0_43 = arith.constant 0 : index
      %112 = vector.load %arg8[%c0_42, %c0_43] : memref<16x128xf32, #tpu.memory_space<vmem>>, vector<16x128xf32>
      tpu.vector_store %arg8[%c0_42, %c0_43], %110 {strides = array<i32>} : memref<16x128xf32, #tpu.memory_space<vmem>>, vector<16x128xf32>,
      %c0_44 = arith.constant 0 : index
      %c0_45 = arith.constant 0 : index
      %113 = vector.load %arg9[%c0_44, %c0_45] : memref<16x128xf32, #tpu.memory_space<vmem>>, vector<16x128xf32>
      tpu.vector_store %arg9[%c0_44, %c0_45], %110 {strides = array<i32>} : memref<16x128xf32, #tpu.memory_space<vmem>>, vector<16x128xf32>,
      %cst_46 = arith.constant 0.000000e+00 : f32
      %c0_47 = arith.constant 0 : index
      %114 = memref.load %arg12[%c0_47] : memref<2xf32, #tpu.memory_space<smem>>
      memref.store %cst_46, %arg12[%c0_47] : memref<2xf32, #tpu.memory_space<smem>>
      %cst_48 = arith.constant 0.000000e+00 : f32
      %c1 = arith.constant 1 : index
      %115 = memref.load %arg12[%c1] : memref<2xf32, #tpu.memory_space<smem>>
      memref.store %cst_48, %arg12[%c1] : memref<2xf32, #tpu.memory_space<smem>>
      %116 = vector.extract_strided_slice %28 {offsets = [0, 0, 0], sizes = [1, 16, 128], strides = [1, 1, 1]} : vector<3x16x128xf32> to vector<1x16x128xf32>
      %117 = vector.shape_cast %116 : vector<1x16x128xf32> to vector<16x128xf32>
      %c1_i32_49 = arith.constant 1 : i32
      %118 = tpu.dynamic_rotate %117 by %c1_i32_49 dim 0 : vector<16x128xf32>, i32 -> vector<16x128xf32>
      %119 = arith.addf %118, %117 : vector<16x128xf32>
      %c15_i32_50 = arith.constant 15 : i32
      %120 = tpu.dynamic_rotate %117 by %c15_i32_50 dim 0 : vector<16x128xf32>, i32 -> vector<16x128xf32>
      %121 = arith.addf %119, %120 : vector<16x128xf32>
      %c1_i32_51 = arith.constant 1 : i32
      %122 = tpu.dynamic_rotate %121 by %c1_i32_51 dim 1 : vector<16x128xf32>, i32 -> vector<16x128xf32>
      %123 = arith.addf %122, %121 : vector<16x128xf32>
      %c127_i32_52 = arith.constant 127 : i32
      %124 = tpu.dynamic_rotate %121 by %c127_i32_52 dim 1 : vector<16x128xf32>, i32 -> vector<16x128xf32>
      %125 = arith.addf %123, %124 : vector<16x128xf32>
      %c0_53 = arith.constant 0 : index
      %c0_54 = arith.constant 0 : index
      %c0_55 = arith.constant 0 : index
      %126 = vector.load %arg10[%c0_53, %c0_54, %c0_55] : memref<3x16x128xf32, #tpu.memory_space<vmem>>, vector<1x16x128xf32>
      %127 = vector.shape_cast %126 : vector<1x16x128xf32> to vector<16x128xf32>
      %128 = vector.shape_cast %125 : vector<16x128xf32> to vector<1x16x128xf32>
      tpu.vector_store %arg10[%c0_53, %c0_54, %c0_55], %128 {strides = array<i32>} : memref<3x16x128xf32, #tpu.memory_space<vmem>>, vector<1x16x128xf32>,
      %129 = arith.mulf %117, %117 : vector<16x128xf32>
      %c1_i32_56 = arith.constant 1 : i32
      %130 = tpu.dynamic_rotate %129 by %c1_i32_56 dim 0 : vector<16x128xf32>, i32 -> vector<16x128xf32>
      %131 = arith.addf %130, %129 : vector<16x128xf32>
      %c15_i32_57 = arith.constant 15 : i32
      %132 = tpu.dynamic_rotate %129 by %c15_i32_57 dim 0 : vector<16x128xf32>, i32 -> vector<16x128xf32>
      %133 = arith.addf %131, %132 : vector<16x128xf32>
      %c1_i32_58 = arith.constant 1 : i32
      %134 = tpu.dynamic_rotate %133 by %c1_i32_58 dim 1 : vector<16x128xf32>, i32 -> vector<16x128xf32>
      %135 = arith.addf %134, %133 : vector<16x128xf32>
      %c127_i32_59 = arith.constant 127 : i32
      %136 = tpu.dynamic_rotate %133 by %c127_i32_59 dim 1 : vector<16x128xf32>, i32 -> vector<16x128xf32>
      %137 = arith.addf %135, %136 : vector<16x128xf32>
      %c0_60 = arith.constant 0 : index
      %c0_61 = arith.constant 0 : index
      %c0_62 = arith.constant 0 : index
      %138 = vector.load %arg11[%c0_60, %c0_61, %c0_62] : memref<3x16x128xf32, #tpu.memory_space<vmem>>, vector<1x16x128xf32>
      %139 = vector.shape_cast %138 : vector<1x16x128xf32> to vector<16x128xf32>
      %140 = vector.shape_cast %137 : vector<16x128xf32> to vector<1x16x128xf32>
      tpu.vector_store %arg11[%c0_60, %c0_61, %c0_62], %140 {strides = array<i32>} : memref<3x16x128xf32, #tpu.memory_space<vmem>>, vector<1x16x128xf32>,
      %141 = vector.extract_strided_slice %28 {offsets = [1, 0, 0], sizes = [1, 16, 128], strides = [1, 1, 1]} : vector<3x16x128xf32> to vector<1x16x128xf32>
      %142 = vector.shape_cast %141 : vector<1x16x128xf32> to vector<16x128xf32>
      %c1_i32_63 = arith.constant 1 : i32
      %143 = tpu.dynamic_rotate %142 by %c1_i32_63 dim 0 : vector<16x128xf32>, i32 -> vector<16x128xf32>
      %144 = arith.addf %143, %142 : vector<16x128xf32>
      %c15_i32_64 = arith.constant 15 : i32
      %145 = tpu.dynamic_rotate %142 by %c15_i32_64 dim 0 : vector<16x128xf32>, i32 -> vector<16x128xf32>
      %146 = arith.addf %144, %145 : vector<16x128xf32>
      %c1_i32_65 = arith.constant 1 : i32
      %147 = tpu.dynamic_rotate %146 by %c1_i32_65 dim 1 : vector<16x128xf32>, i32 -> vector<16x128xf32>
      %148 = arith.addf %147, %146 : vector<16x128xf32>
      %c127_i32_66 = arith.constant 127 : i32
      %149 = tpu.dynamic_rotate %146 by %c127_i32_66 dim 1 : vector<16x128xf32>, i32 -> vector<16x128xf32>
      %150 = arith.addf %148, %149 : vector<16x128xf32>
      %c1_67 = arith.constant 1 : index
      %c0_68 = arith.constant 0 : index
      %c0_69 = arith.constant 0 : index
      %151 = vector.load %arg10[%c1_67, %c0_68, %c0_69] : memref<3x16x128xf32, #tpu.memory_space<vmem>>, vector<1x16x128xf32>
      %152 = vector.shape_cast %151 : vector<1x16x128xf32> to vector<16x128xf32>
      %153 = vector.shape_cast %150 : vector<16x128xf32> to vector<1x16x128xf32>
      tpu.vector_store %arg10[%c1_67, %c0_68, %c0_69], %153 {strides = array<i32>} : memref<3x16x128xf32, #tpu.memory_space<vmem>>, vector<1x16x128xf32>,
      %154 = arith.mulf %142, %142 : vector<16x128xf32>
      %c1_i32_70 = arith.constant 1 : i32
      %155 = tpu.dynamic_rotate %154 by %c1_i32_70 dim 0 : vector<16x128xf32>, i32 -> vector<16x128xf32>
      %156 = arith.addf %155, %154 : vector<16x128xf32>
      %c15_i32_71 = arith.constant 15 : i32
      %157 = tpu.dynamic_rotate %154 by %c15_i32_71 dim 0 : vector<16x128xf32>, i32 -> vector<16x128xf32>
      %158 = arith.addf %156, %157 : vector<16x128xf32>
      %c1_i32_72 = arith.constant 1 : i32
      %159 = tpu.dynamic_rotate %158 by %c1_i32_72 dim 1 : vector<16x128xf32>, i32 -> vector<16x128xf32>
      %160 = arith.addf %159, %158 : vector<16x128xf32>
      %c127_i32_73 = arith.constant 127 : i32
      %161 = tpu.dynamic_rotate %158 by %c127_i32_73 dim 1 : vector<16x128xf32>, i32 -> vector<16x128xf32>
      %162 = arith.addf %160, %161 : vector<16x128xf32>
      %c1_74 = arith.constant 1 : index
      %c0_75 = arith.constant 0 : index
      %c0_76 = arith.constant 0 : index
      %163 = vector.load %arg11[%c1_74, %c0_75, %c0_76] : memref<3x16x128xf32, #tpu.memory_space<vmem>>, vector<1x16x128xf32>
      %164 = vector.shape_cast %163 : vector<1x16x128xf32> to vector<16x128xf32>
      %165 = vector.shape_cast %162 : vector<16x128xf32> to vector<1x16x128xf32>
      tpu.vector_store %arg11[%c1_74, %c0_75, %c0_76], %165 {strides = array<i32>} : memref<3x16x128xf32, #tpu.memory_space<vmem>>, vector<1x16x128xf32>,
      %166 = vector.extract_strided_slice %28 {offsets = [2, 0, 0], sizes = [1, 16, 128], strides = [1, 1, 1]} : vector<3x16x128xf32> to vector<1x16x128xf32>
      %167 = vector.shape_cast %166 : vector<1x16x128xf32> to vector<16x128xf32>
      %c1_i32_77 = arith.constant 1 : i32
      %168 = tpu.dynamic_rotate %167 by %c1_i32_77 dim 0 : vector<16x128xf32>, i32 -> vector<16x128xf32>
      %169 = arith.addf %168, %167 : vector<16x128xf32>
      %c15_i32_78 = arith.constant 15 : i32
      %170 = tpu.dynamic_rotate %167 by %c15_i32_78 dim 0 : vector<16x128xf32>, i32 -> vector<16x128xf32>
      %171 = arith.addf %169, %170 : vector<16x128xf32>
      %c1_i32_79 = arith.constant 1 : i32
      %172 = tpu.dynamic_rotate %171 by %c1_i32_79 dim 1 : vector<16x128xf32>, i32 -> vector<16x128xf32>
      %173 = arith.addf %172, %171 : vector<16x128xf32>
      %c127_i32_80 = arith.constant 127 : i32
      %174 = tpu.dynamic_rotate %171 by %c127_i32_80 dim 1 : vector<16x128xf32>, i32 -> vector<16x128xf32>
      %175 = arith.addf %173, %174 : vector<16x128xf32>
      %c2 = arith.constant 2 : index
      %c0_81 = arith.constant 0 : index
      %c0_82 = arith.constant 0 : index
      %176 = vector.load %arg10[%c2, %c0_81, %c0_82] : memref<3x16x128xf32, #tpu.memory_space<vmem>>, vector<1x16x128xf32>
      %177 = vector.shape_cast %176 : vector<1x16x128xf32> to vector<16x128xf32>
      %178 = vector.shape_cast %175 : vector<16x128xf32> to vector<1x16x128xf32>
      tpu.vector_store %arg10[%c2, %c0_81, %c0_82], %178 {strides = array<i32>} : memref<3x16x128xf32, #tpu.memory_space<vmem>>, vector<1x16x128xf32>,
      %179 = arith.mulf %167, %167 : vector<16x128xf32>
      %c1_i32_83 = arith.constant 1 : i32
      %180 = tpu.dynamic_rotate %179 by %c1_i32_83 dim 0 : vector<16x128xf32>, i32 -> vector<16x128xf32>
      %181 = arith.addf %180, %179 : vector<16x128xf32>
      %c15_i32_84 = arith.constant 15 : i32
      %182 = tpu.dynamic_rotate %179 by %c15_i32_84 dim 0 : vector<16x128xf32>, i32 -> vector<16x128xf32>
      %183 = arith.addf %181, %182 : vector<16x128xf32>
      %c1_i32_85 = arith.constant 1 : i32
      %184 = tpu.dynamic_rotate %183 by %c1_i32_85 dim 1 : vector<16x128xf32>, i32 -> vector<16x128xf32>
      %185 = arith.addf %184, %183 : vector<16x128xf32>
      %c127_i32_86 = arith.constant 127 : i32
      %186 = tpu.dynamic_rotate %183 by %c127_i32_86 dim 1 : vector<16x128xf32>, i32 -> vector<16x128xf32>
      %187 = arith.addf %185, %186 : vector<16x128xf32>
      %c2_87 = arith.constant 2 : index
      %c0_88 = arith.constant 0 : index
      %c0_89 = arith.constant 0 : index
      %188 = vector.load %arg11[%c2_87, %c0_88, %c0_89] : memref<3x16x128xf32, #tpu.memory_space<vmem>>, vector<1x16x128xf32>
      %189 = vector.shape_cast %188 : vector<1x16x128xf32> to vector<16x128xf32>
      %190 = vector.shape_cast %187 : vector<16x128xf32> to vector<1x16x128xf32>
      tpu.vector_store %arg11[%c2_87, %c0_88, %c0_89], %190 {strides = array<i32>} : memref<3x16x128xf32, #tpu.memory_space<vmem>>, vector<1x16x128xf32>,
    } else {
    }
    %32 = vector.extract_strided_slice %24 {offsets = [0, 0, 0], sizes = [1, 16, 128], strides = [1, 1, 1]} : vector<3x16x128xf32> to vector<1x16x128xf32>
    %33 = vector.shape_cast %32 : vector<1x16x128xf32> to vector<16x128xf32>
    %34 = vector.extract_strided_slice %28 {offsets = [0, 0, 0], sizes = [1, 16, 128], strides = [1, 1, 1]} : vector<3x16x128xf32> to vector<1x16x128xf32>
    %35 = vector.shape_cast %34 : vector<1x16x128xf32> to vector<16x128xf32>
    %36 = arith.subf %33, %35 : vector<16x128xf32>
    %37 = arith.mulf %36, %26 : vector<16x128xf32>
    %38 = math.absf %37 : vector<16x128xf32>
    %c127_i32_14 = arith.constant 127 : i32
    %39 = tpu.dynamic_rotate %37 by %c127_i32_14 dim 1 : vector<16x128xf32>, i32 -> vector<16x128xf32>
    %40 = arith.subf %39, %37 : vector<16x128xf32>
    %41 = math.absf %40 : vector<16x128xf32>
    %c15_i32_15 = arith.constant 15 : i32
    %42 = tpu.dynamic_rotate %37 by %c15_i32_15 dim 0 : vector<16x128xf32>, i32 -> vector<16x128xf32>
    %43 = arith.subf %42, %37 : vector<16x128xf32>
    %44 = math.absf %43 : vector<16x128xf32>
    %45 = vector.extract_strided_slice %24 {offsets = [1, 0, 0], sizes = [1, 16, 128], strides = [1, 1, 1]} : vector<3x16x128xf32> to vector<1x16x128xf32>
    %46 = vector.shape_cast %45 : vector<1x16x128xf32> to vector<16x128xf32>
    %47 = vector.extract_strided_slice %28 {offsets = [1, 0, 0], sizes = [1, 16, 128], strides = [1, 1, 1]} : vector<3x16x128xf32> to vector<1x16x128xf32>
    %48 = vector.shape_cast %47 : vector<1x16x128xf32> to vector<16x128xf32>
    %49 = arith.subf %46, %48 : vector<16x128xf32>
    %50 = arith.mulf %49, %26 : vector<16x128xf32>
    %51 = math.absf %50 : vector<16x128xf32>
    %c127_i32_16 = arith.constant 127 : i32
    %52 = tpu.dynamic_rotate %50 by %c127_i32_16 dim 1 : vector<16x128xf32>, i32 -> vector<16x128xf32>
    %53 = arith.subf %52, %50 : vector<16x128xf32>
    %54 = math.absf %53 : vector<16x128xf32>
    %c15_i32_17 = arith.constant 15 : i32
    %55 = tpu.dynamic_rotate %50 by %c15_i32_17 dim 0 : vector<16x128xf32>, i32 -> vector<16x128xf32>
    %56 = arith.subf %55, %50 : vector<16x128xf32>
    %57 = math.absf %56 : vector<16x128xf32>
    %58 = arith.addf %38, %51 : vector<16x128xf32>
    %59 = arith.addf %41, %54 : vector<16x128xf32>
    %60 = arith.addf %44, %57 : vector<16x128xf32>
    %61 = vector.extract_strided_slice %24 {offsets = [2, 0, 0], sizes = [1, 16, 128], strides = [1, 1, 1]} : vector<3x16x128xf32> to vector<1x16x128xf32>
    %62 = vector.shape_cast %61 : vector<1x16x128xf32> to vector<16x128xf32>
    %63 = vector.extract_strided_slice %28 {offsets = [2, 0, 0], sizes = [1, 16, 128], strides = [1, 1, 1]} : vector<3x16x128xf32> to vector<1x16x128xf32>
    %64 = vector.shape_cast %63 : vector<1x16x128xf32> to vector<16x128xf32>
    %65 = arith.subf %62, %64 : vector<16x128xf32>
    %66 = arith.mulf %65, %26 : vector<16x128xf32>
    %67 = math.absf %66 : vector<16x128xf32>
    %c127_i32_18 = arith.constant 127 : i32
    %68 = tpu.dynamic_rotate %66 by %c127_i32_18 dim 1 : vector<16x128xf32>, i32 -> vector<16x128xf32>
    %69 = arith.subf %68, %66 : vector<16x128xf32>
    %70 = math.absf %69 : vector<16x128xf32>
    %c15_i32_19 = arith.constant 15 : i32
    %71 = tpu.dynamic_rotate %66 by %c15_i32_19 dim 0 : vector<16x128xf32>, i32 -> vector<16x128xf32>
    %72 = arith.subf %71, %66 : vector<16x128xf32>
    %73 = math.absf %72 : vector<16x128xf32>
    %74 = arith.addf %58, %67 : vector<16x128xf32>
    %75 = arith.addf %59, %70 : vector<16x128xf32>
    %76 = arith.addf %60, %73 : vector<16x128xf32>
    %cst = arith.constant 0.166666672 : f32
    %77 = vector.broadcast %cst : f32 to vector<16x128xf32>
    %78 = arith.mulf %77, %74 : vector<16x128xf32>
    %79 = arith.mulf %75, %5 : vector<16x128xf32>
    %80 = arith.mulf %76, %9 : vector<16x128xf32>
    %81 = arith.addf %79, %80 : vector<16x128xf32>
    %cst_20 = arith.constant 0.166666672 : f32
    %82 = vector.broadcast %cst_20 : f32 to vector<16x128xf32>
    %83 = arith.mulf %82, %81 : vector<16x128xf32>
    %84 = arith.addf %78, %83 : vector<16x128xf32>
    %cst_21 = arith.constant 1.000000e+00 : f32
    %85 = vector.broadcast %cst_21 : f32 to vector<16x128xf32>
    %86 = arith.subf %85, %26 : vector<16x128xf32>
    %cst_22 = arith.constant 1.000000e+04 : f32
    %87 = vector.broadcast %cst_22 : f32 to vector<16x128xf32>
    %88 = arith.mulf %87, %86 : vector<16x128xf32>
    %89 = arith.addf %84, %88 : vector<16x128xf32>
    %c0_23 = arith.constant 0 : index
    %c0_24 = arith.constant 0 : index
    %90 = vector.load %arg7[%c0_23, %c0_24] : memref<16x128xf32, #tpu.memory_space<vmem>>, vector<16x128xf32>
    %c0_25 = arith.constant 0 : index
    %c0_26 = arith.constant 0 : index
    %91 = vector.load %arg8[%c0_25, %c0_26] : memref<16x128xf32, #tpu.memory_space<vmem>>, vector<16x128xf32>
    %c0_27 = arith.constant 0 : index
    %c0_28 = arith.constant 0 : index
    %92 = vector.load %arg9[%c0_27, %c0_28] : memref<16x128xf32, #tpu.memory_space<vmem>>, vector<16x128xf32>
    %93 = arith.minimumf %90, %89 : vector<16x128xf32>
    %94 = arith.maximumf %90, %89 : vector<16x128xf32>
    %95 = arith.minimumf %91, %94 : vector<16x128xf32>
    %96 = arith.maximumf %91, %94 : vector<16x128xf32>
    %97 = arith.minimumf %92, %96 : vector<16x128xf32>
    %c0_29 = arith.constant 0 : index
    %c0_30 = arith.constant 0 : index
    %98 = vector.load %arg7[%c0_29, %c0_30] : memref<16x128xf32, #tpu.memory_space<vmem>>, vector<16x128xf32>
    tpu.vector_store %arg7[%c0_29, %c0_30], %93 {strides = array<i32>} : memref<16x128xf32, #tpu.memory_space<vmem>>, vector<16x128xf32>,
    %c0_31 = arith.constant 0 : index
    %c0_32 = arith.constant 0 : index
    %99 = vector.load %arg8[%c0_31, %c0_32] : memref<16x128xf32, #tpu.memory_space<vmem>>, vector<16x128xf32>
    tpu.vector_store %arg8[%c0_31, %c0_32], %95 {strides = array<i32>} : memref<16x128xf32, #tpu.memory_space<vmem>>, vector<16x128xf32>,
    %c0_33 = arith.constant 0 : index
    %c0_34 = arith.constant 0 : index
    %100 = vector.load %arg9[%c0_33, %c0_34] : memref<16x128xf32, #tpu.memory_space<vmem>>, vector<16x128xf32>
    tpu.vector_store %arg9[%c0_33, %c0_34], %97 {strides = array<i32>} : memref<16x128xf32, #tpu.memory_space<vmem>>, vector<16x128xf32>,
    %c2_i32 = arith.constant 2 : i32
    %101 = arith.cmpi slt, %arg1, %c2_i32 : i32
    %102 = arith.extui %101 : i1 to i32
    %c0_i32_35 = arith.constant 0 : i32
    %103 = arith.cmpi ne, %102, %c0_i32_35 : i32
    scf.if %103 {
      %c1_i32_39 = arith.constant 1 : i32
      %110 = tpu.dynamic_rotate %26 by %c1_i32_39 dim 0 : vector<16x128xf32>, i32 -> vector<16x128xf32>
      %111 = arith.addf %110, %26 : vector<16x128xf32>
      %c15_i32_40 = arith.constant 15 : i32
      %112 = tpu.dynamic_rotate %26 by %c15_i32_40 dim 0 : vector<16x128xf32>, i32 -> vector<16x128xf32>
      %113 = arith.addf %111, %112 : vector<16x128xf32>
      %c1_i32_41 = arith.constant 1 : i32
      %114 = tpu.dynamic_rotate %113 by %c1_i32_41 dim 1 : vector<16x128xf32>, i32 -> vector<16x128xf32>
      %115 = arith.addf %114, %113 : vector<16x128xf32>
      %c127_i32_42 = arith.constant 127 : i32
      %116 = tpu.dynamic_rotate %113 by %c127_i32_42 dim 1 : vector<16x128xf32>, i32 -> vector<16x128xf32>
      %117 = arith.addf %115, %116 : vector<16x128xf32>
      %cst_43 = arith.constant 0.111111112 : f32
      %118 = vector.broadcast %cst_43 : f32 to vector<16x128xf32>
      %119 = arith.mulf %117, %118 : vector<16x128xf32>
      %120 = arith.mulf %119, %22 : vector<16x128xf32>
      %121 = vector.extract_strided_slice %28 {offsets = [0, 0, 0], sizes = [1, 16, 128], strides = [1, 1, 1]} : vector<3x16x128xf32> to vector<1x16x128xf32>
      %122 = vector.shape_cast %121 : vector<1x16x128xf32> to vector<16x128xf32>
      %123 = vector.extract_strided_slice %24 {offsets = [0, 0, 0], sizes = [1, 16, 128], strides = [1, 1, 1]} : vector<3x16x128xf32> to vector<1x16x128xf32>
      %124 = vector.shape_cast %123 : vector<1x16x128xf32> to vector<16x128xf32>
      %c0_44 = arith.constant 0 : index
      %c0_45 = arith.constant 0 : index
      %c0_46 = arith.constant 0 : index
      %125 = vector.load %arg10[%c0_44, %c0_45, %c0_46] : memref<3x16x128xf32, #tpu.memory_space<vmem>>, vector<1x16x128xf32>
      %126 = vector.shape_cast %125 : vector<1x16x128xf32> to vector<16x128xf32>
      %cst_47 = arith.constant 0.111111112 : f32
      %127 = vector.broadcast %cst_47 : f32 to vector<16x128xf32>
      %128 = arith.mulf %126, %127 : vector<16x128xf32>
      %c0_48 = arith.constant 0 : index
      %c0_49 = arith.constant 0 : index
      %c0_50 = arith.constant 0 : index
      %129 = vector.load %arg11[%c0_48, %c0_49, %c0_50] : memref<3x16x128xf32, #tpu.memory_space<vmem>>, vector<1x16x128xf32>
      %130 = vector.shape_cast %129 : vector<1x16x128xf32> to vector<16x128xf32>
      %cst_51 = arith.constant 0.111111112 : f32
      %131 = vector.broadcast %cst_51 : f32 to vector<16x128xf32>
      %132 = arith.mulf %130, %131 : vector<16x128xf32>
      %c1_i32_52 = arith.constant 1 : i32
      %133 = tpu.dynamic_rotate %124 by %c1_i32_52 dim 0 : vector<16x128xf32>, i32 -> vector<16x128xf32>
      %134 = arith.addf %133, %124 : vector<16x128xf32>
      %c15_i32_53 = arith.constant 15 : i32
      %135 = tpu.dynamic_rotate %124 by %c15_i32_53 dim 0 : vector<16x128xf32>, i32 -> vector<16x128xf32>
      %136 = arith.addf %134, %135 : vector<16x128xf32>
      %c1_i32_54 = arith.constant 1 : i32
      %137 = tpu.dynamic_rotate %136 by %c1_i32_54 dim 1 : vector<16x128xf32>, i32 -> vector<16x128xf32>
      %138 = arith.addf %137, %136 : vector<16x128xf32>
      %c127_i32_55 = arith.constant 127 : i32
      %139 = tpu.dynamic_rotate %136 by %c127_i32_55 dim 1 : vector<16x128xf32>, i32 -> vector<16x128xf32>
      %140 = arith.addf %138, %139 : vector<16x128xf32>
      %cst_56 = arith.constant 0.111111112 : f32
      %141 = vector.broadcast %cst_56 : f32 to vector<16x128xf32>
      %142 = arith.mulf %140, %141 : vector<16x128xf32>
      %143 = arith.mulf %124, %124 : vector<16x128xf32>
      %c1_i32_57 = arith.constant 1 : i32
      %144 = tpu.dynamic_rotate %143 by %c1_i32_57 dim 0 : vector<16x128xf32>, i32 -> vector<16x128xf32>
      %145 = arith.addf %144, %143 : vector<16x128xf32>
      %c15_i32_58 = arith.constant 15 : i32
      %146 = tpu.dynamic_rotate %143 by %c15_i32_58 dim 0 : vector<16x128xf32>, i32 -> vector<16x128xf32>
      %147 = arith.addf %145, %146 : vector<16x128xf32>
      %c1_i32_59 = arith.constant 1 : i32
      %148 = tpu.dynamic_rotate %147 by %c1_i32_59 dim 1 : vector<16x128xf32>, i32 -> vector<16x128xf32>
      %149 = arith.addf %148, %147 : vector<16x128xf32>
      %c127_i32_60 = arith.constant 127 : i32
      %150 = tpu.dynamic_rotate %147 by %c127_i32_60 dim 1 : vector<16x128xf32>, i32 -> vector<16x128xf32>
      %151 = arith.addf %149, %150 : vector<16x128xf32>
      %cst_61 = arith.constant 0.111111112 : f32
      %152 = vector.broadcast %cst_61 : f32 to vector<16x128xf32>
      %153 = arith.mulf %151, %152 : vector<16x128xf32>
      %154 = arith.mulf %122, %124 : vector<16x128xf32>
      %c1_i32_62 = arith.constant 1 : i32
      %155 = tpu.dynamic_rotate %154 by %c1_i32_62 dim 0 : vector<16x128xf32>, i32 -> vector<16x128xf32>
      %156 = arith.addf %155, %154 : vector<16x128xf32>
      %c15_i32_63 = arith.constant 15 : i32
      %157 = tpu.dynamic_rotate %154 by %c15_i32_63 dim 0 : vector<16x128xf32>, i32 -> vector<16x128xf32>
      %158 = arith.addf %156, %157 : vector<16x128xf32>
      %c1_i32_64 = arith.constant 1 : i32
      %159 = tpu.dynamic_rotate %158 by %c1_i32_64 dim 1 : vector<16x128xf32>, i32 -> vector<16x128xf32>
      %160 = arith.addf %159, %158 : vector<16x128xf32>
      %c127_i32_65 = arith.constant 127 : i32
      %161 = tpu.dynamic_rotate %158 by %c127_i32_65 dim 1 : vector<16x128xf32>, i32 -> vector<16x128xf32>
      %162 = arith.addf %160, %161 : vector<16x128xf32>
      %cst_66 = arith.constant 0.111111112 : f32
      %163 = vector.broadcast %cst_66 : f32 to vector<16x128xf32>
      %164 = arith.mulf %162, %163 : vector<16x128xf32>
      %165 = arith.mulf %128, %128 : vector<16x128xf32>
      %166 = arith.subf %132, %165 : vector<16x128xf32>
      %167 = arith.mulf %142, %142 : vector<16x128xf32>
      %168 = arith.subf %153, %167 : vector<16x128xf32>
      %169 = arith.mulf %128, %142 : vector<16x128xf32>
      %170 = arith.subf %164, %169 : vector<16x128xf32>
      %cst_67 = arith.constant 2.000000e+00 : f32
      %171 = vector.broadcast %cst_67 : f32 to vector<16x128xf32>
      %172 = arith.mulf %171, %128 : vector<16x128xf32>
      %173 = arith.mulf %172, %142 : vector<16x128xf32>
      %cst_68 = arith.constant 9.99999974E-5 : f32
      %174 = vector.broadcast %cst_68 : f32 to vector<16x128xf32>
      %175 = arith.addf %173, %174 : vector<16x128xf32>
      %cst_69 = arith.constant 2.000000e+00 : f32
      %176 = vector.broadcast %cst_69 : f32 to vector<16x128xf32>
      %177 = arith.mulf %176, %170 : vector<16x128xf32>
      %cst_70 = arith.constant 8.99999984E-4 : f32
      %178 = vector.broadcast %cst_70 : f32 to vector<16x128xf32>
      %179 = arith.addf %177, %178 : vector<16x128xf32>
      %180 = arith.mulf %175, %179 : vector<16x128xf32>
      %181 = arith.mulf %128, %128 : vector<16x128xf32>
      %182 = arith.mulf %142, %142 : vector<16x128xf32>
      %183 = arith.addf %181, %182 : vector<16x128xf32>
      %cst_71 = arith.constant 9.99999974E-5 : f32
      %184 = vector.broadcast %cst_71 : f32 to vector<16x128xf32>
      %185 = arith.addf %183, %184 : vector<16x128xf32>
      %186 = arith.addf %166, %168 : vector<16x128xf32>
      %cst_72 = arith.constant 8.99999984E-4 : f32
      %187 = vector.broadcast %cst_72 : f32 to vector<16x128xf32>
      %188 = arith.addf %186, %187 : vector<16x128xf32>
      %189 = arith.mulf %185, %188 : vector<16x128xf32>
      %190 = arith.divf %180, %189 : vector<16x128xf32>
      %cst_73 = arith.constant 1.000000e+00 : f32
      %191 = vector.broadcast %cst_73 : f32 to vector<16x128xf32>
      %192 = arith.subf %191, %190 : vector<16x128xf32>
      %cst_74 = arith.constant 5.000000e-01 : f32
      %193 = vector.broadcast %cst_74 : f32 to vector<16x128xf32>
      %194 = arith.mulf %192, %193 : vector<16x128xf32>
      %cst_75 = arith.constant 0.000000e+00 : f32
      %cst_76 = arith.constant 1.000000e+00 : f32
      %195 = vector.broadcast %cst_75 : f32 to vector<16x128xf32>
      %196 = arith.maximumf %195, %194 : vector<16x128xf32>
      %197 = vector.broadcast %cst_76 : f32 to vector<16x128xf32>
      %198 = arith.minimumf %197, %196 : vector<16x128xf32>
      %199 = arith.mulf %120, %198 : vector<16x128xf32>
      %200 = vector.shape_cast %199 : vector<16x128xf32> to vector<1x16x128xf32>
      %cst_77 = arith.constant dense<0.000000e+00> : vector<1xf32>
      %201 = vector.multi_reduction <add>, %200, %cst_77 [1, 2] : vector<1x16x128xf32> to vector<1xf32>
      %202 = vector.shape_cast %201 : vector<1xf32> to vector<1x1x1xf32>
      %203 = vector.extract %202[0, 0, 0] : f32 from vector<1x1x1xf32>
      %204 = vector.extract_strided_slice %28 {offsets = [1, 0, 0], sizes = [1, 16, 128], strides = [1, 1, 1]} : vector<3x16x128xf32> to vector<1x16x128xf32>
      %205 = vector.shape_cast %204 : vector<1x16x128xf32> to vector<16x128xf32>
      %206 = vector.extract_strided_slice %24 {offsets = [1, 0, 0], sizes = [1, 16, 128], strides = [1, 1, 1]} : vector<3x16x128xf32> to vector<1x16x128xf32>
      %207 = vector.shape_cast %206 : vector<1x16x128xf32> to vector<16x128xf32>
      %c1 = arith.constant 1 : index
      %c0_78 = arith.constant 0 : index
      %c0_79 = arith.constant 0 : index
      %208 = vector.load %arg10[%c1, %c0_78, %c0_79] : memref<3x16x128xf32, #tpu.memory_space<vmem>>, vector<1x16x128xf32>
      %209 = vector.shape_cast %208 : vector<1x16x128xf32> to vector<16x128xf32>
      %cst_80 = arith.constant 0.111111112 : f32
      %210 = vector.broadcast %cst_80 : f32 to vector<16x128xf32>
      %211 = arith.mulf %209, %210 : vector<16x128xf32>
      %c1_81 = arith.constant 1 : index
      %c0_82 = arith.constant 0 : index
      %c0_83 = arith.constant 0 : index
      %212 = vector.load %arg11[%c1_81, %c0_82, %c0_83] : memref<3x16x128xf32, #tpu.memory_space<vmem>>, vector<1x16x128xf32>
      %213 = vector.shape_cast %212 : vector<1x16x128xf32> to vector<16x128xf32>
      %cst_84 = arith.constant 0.111111112 : f32
      %214 = vector.broadcast %cst_84 : f32 to vector<16x128xf32>
      %215 = arith.mulf %213, %214 : vector<16x128xf32>
      %c1_i32_85 = arith.constant 1 : i32
      %216 = tpu.dynamic_rotate %207 by %c1_i32_85 dim 0 : vector<16x128xf32>, i32 -> vector<16x128xf32>
      %217 = arith.addf %216, %207 : vector<16x128xf32>
      %c15_i32_86 = arith.constant 15 : i32
      %218 = tpu.dynamic_rotate %207 by %c15_i32_86 dim 0 : vector<16x128xf32>, i32 -> vector<16x128xf32>
      %219 = arith.addf %217, %218 : vector<16x128xf32>
      %c1_i32_87 = arith.constant 1 : i32
      %220 = tpu.dynamic_rotate %219 by %c1_i32_87 dim 1 : vector<16x128xf32>, i32 -> vector<16x128xf32>
      %221 = arith.addf %220, %219 : vector<16x128xf32>
      %c127_i32_88 = arith.constant 127 : i32
      %222 = tpu.dynamic_rotate %219 by %c127_i32_88 dim 1 : vector<16x128xf32>, i32 -> vector<16x128xf32>
      %223 = arith.addf %221, %222 : vector<16x128xf32>
      %cst_89 = arith.constant 0.111111112 : f32
      %224 = vector.broadcast %cst_89 : f32 to vector<16x128xf32>
      %225 = arith.mulf %223, %224 : vector<16x128xf32>
      %226 = arith.mulf %207, %207 : vector<16x128xf32>
      %c1_i32_90 = arith.constant 1 : i32
      %227 = tpu.dynamic_rotate %226 by %c1_i32_90 dim 0 : vector<16x128xf32>, i32 -> vector<16x128xf32>
      %228 = arith.addf %227, %226 : vector<16x128xf32>
      %c15_i32_91 = arith.constant 15 : i32
      %229 = tpu.dynamic_rotate %226 by %c15_i32_91 dim 0 : vector<16x128xf32>, i32 -> vector<16x128xf32>
      %230 = arith.addf %228, %229 : vector<16x128xf32>
      %c1_i32_92 = arith.constant 1 : i32
      %231 = tpu.dynamic_rotate %230 by %c1_i32_92 dim 1 : vector<16x128xf32>, i32 -> vector<16x128xf32>
      %232 = arith.addf %231, %230 : vector<16x128xf32>
      %c127_i32_93 = arith.constant 127 : i32
      %233 = tpu.dynamic_rotate %230 by %c127_i32_93 dim 1 : vector<16x128xf32>, i32 -> vector<16x128xf32>
      %234 = arith.addf %232, %233 : vector<16x128xf32>
      %cst_94 = arith.constant 0.111111112 : f32
      %235 = vector.broadcast %cst_94 : f32 to vector<16x128xf32>
      %236 = arith.mulf %234, %235 : vector<16x128xf32>
      %237 = arith.mulf %205, %207 : vector<16x128xf32>
      %c1_i32_95 = arith.constant 1 : i32
      %238 = tpu.dynamic_rotate %237 by %c1_i32_95 dim 0 : vector<16x128xf32>, i32 -> vector<16x128xf32>
      %239 = arith.addf %238, %237 : vector<16x128xf32>
      %c15_i32_96 = arith.constant 15 : i32
      %240 = tpu.dynamic_rotate %237 by %c15_i32_96 dim 0 : vector<16x128xf32>, i32 -> vector<16x128xf32>
      %241 = arith.addf %239, %240 : vector<16x128xf32>
      %c1_i32_97 = arith.constant 1 : i32
      %242 = tpu.dynamic_rotate %241 by %c1_i32_97 dim 1 : vector<16x128xf32>, i32 -> vector<16x128xf32>
      %243 = arith.addf %242, %241 : vector<16x128xf32>
      %c127_i32_98 = arith.constant 127 : i32
      %244 = tpu.dynamic_rotate %241 by %c127_i32_98 dim 1 : vector<16x128xf32>, i32 -> vector<16x128xf32>
      %245 = arith.addf %243, %244 : vector<16x128xf32>
      %cst_99 = arith.constant 0.111111112 : f32
      %246 = vector.broadcast %cst_99 : f32 to vector<16x128xf32>
      %247 = arith.mulf %245, %246 : vector<16x128xf32>
      %248 = arith.mulf %211, %211 : vector<16x128xf32>
      %249 = arith.subf %215, %248 : vector<16x128xf32>
      %250 = arith.mulf %225, %225 : vector<16x128xf32>
      %251 = arith.subf %236, %250 : vector<16x128xf32>
      %252 = arith.mulf %211, %225 : vector<16x128xf32>
      %253 = arith.subf %247, %252 : vector<16x128xf32>
      %cst_100 = arith.constant 2.000000e+00 : f32
      %254 = vector.broadcast %cst_100 : f32 to vector<16x128xf32>
      %255 = arith.mulf %254, %211 : vector<16x128xf32>
      %256 = arith.mulf %255, %225 : vector<16x128xf32>
      %cst_101 = arith.constant 9.99999974E-5 : f32
      %257 = vector.broadcast %cst_101 : f32 to vector<16x128xf32>
      %258 = arith.addf %256, %257 : vector<16x128xf32>
      %cst_102 = arith.constant 2.000000e+00 : f32
      %259 = vector.broadcast %cst_102 : f32 to vector<16x128xf32>
      %260 = arith.mulf %259, %253 : vector<16x128xf32>
      %cst_103 = arith.constant 8.99999984E-4 : f32
      %261 = vector.broadcast %cst_103 : f32 to vector<16x128xf32>
      %262 = arith.addf %260, %261 : vector<16x128xf32>
      %263 = arith.mulf %258, %262 : vector<16x128xf32>
      %264 = arith.mulf %211, %211 : vector<16x128xf32>
      %265 = arith.mulf %225, %225 : vector<16x128xf32>
      %266 = arith.addf %264, %265 : vector<16x128xf32>
      %cst_104 = arith.constant 9.99999974E-5 : f32
      %267 = vector.broadcast %cst_104 : f32 to vector<16x128xf32>
      %268 = arith.addf %266, %267 : vector<16x128xf32>
      %269 = arith.addf %249, %251 : vector<16x128xf32>
      %cst_105 = arith.constant 8.99999984E-4 : f32
      %270 = vector.broadcast %cst_105 : f32 to vector<16x128xf32>
      %271 = arith.addf %269, %270 : vector<16x128xf32>
      %272 = arith.mulf %268, %271 : vector<16x128xf32>
      %273 = arith.divf %263, %272 : vector<16x128xf32>
      %cst_106 = arith.constant 1.000000e+00 : f32
      %274 = vector.broadcast %cst_106 : f32 to vector<16x128xf32>
      %275 = arith.subf %274, %273 : vector<16x128xf32>
      %cst_107 = arith.constant 5.000000e-01 : f32
      %276 = vector.broadcast %cst_107 : f32 to vector<16x128xf32>
      %277 = arith.mulf %275, %276 : vector<16x128xf32>
      %cst_108 = arith.constant 0.000000e+00 : f32
      %cst_109 = arith.constant 1.000000e+00 : f32
      %278 = vector.broadcast %cst_108 : f32 to vector<16x128xf32>
      %279 = arith.maximumf %278, %277 : vector<16x128xf32>
      %280 = vector.broadcast %cst_109 : f32 to vector<16x128xf32>
      %281 = arith.minimumf %280, %279 : vector<16x128xf32>
      %282 = arith.mulf %120, %281 : vector<16x128xf32>
      %283 = vector.shape_cast %282 : vector<16x128xf32> to vector<1x16x128xf32>
      %cst_110 = arith.constant dense<0.000000e+00> : vector<1xf32>
      %284 = vector.multi_reduction <add>, %283, %cst_110 [1, 2] : vector<1x16x128xf32> to vector<1xf32>
      %285 = vector.shape_cast %284 : vector<1xf32> to vector<1x1x1xf32>
      %286 = vector.extract %285[0, 0, 0] : f32 from vector<1x1x1xf32>
      %287 = arith.addf %203, %286 : f32
      %288 = vector.extract_strided_slice %28 {offsets = [2, 0, 0], sizes = [1, 16, 128], strides = [1, 1, 1]} : vector<3x16x128xf32> to vector<1x16x128xf32>
      %289 = vector.shape_cast %288 : vector<1x16x128xf32> to vector<16x128xf32>
      %290 = vector.extract_strided_slice %24 {offsets = [2, 0, 0], sizes = [1, 16, 128], strides = [1, 1, 1]} : vector<3x16x128xf32> to vector<1x16x128xf32>
      %291 = vector.shape_cast %290 : vector<1x16x128xf32> to vector<16x128xf32>
      %c2 = arith.constant 2 : index
      %c0_111 = arith.constant 0 : index
      %c0_112 = arith.constant 0 : index
      %292 = vector.load %arg10[%c2, %c0_111, %c0_112] : memref<3x16x128xf32, #tpu.memory_space<vmem>>, vector<1x16x128xf32>
      %293 = vector.shape_cast %292 : vector<1x16x128xf32> to vector<16x128xf32>
      %cst_113 = arith.constant 0.111111112 : f32
      %294 = vector.broadcast %cst_113 : f32 to vector<16x128xf32>
      %295 = arith.mulf %293, %294 : vector<16x128xf32>
      %c2_114 = arith.constant 2 : index
      %c0_115 = arith.constant 0 : index
      %c0_116 = arith.constant 0 : index
      %296 = vector.load %arg11[%c2_114, %c0_115, %c0_116] : memref<3x16x128xf32, #tpu.memory_space<vmem>>, vector<1x16x128xf32>
      %297 = vector.shape_cast %296 : vector<1x16x128xf32> to vector<16x128xf32>
      %cst_117 = arith.constant 0.111111112 : f32
      %298 = vector.broadcast %cst_117 : f32 to vector<16x128xf32>
      %299 = arith.mulf %297, %298 : vector<16x128xf32>
      %c1_i32_118 = arith.constant 1 : i32
      %300 = tpu.dynamic_rotate %291 by %c1_i32_118 dim 0 : vector<16x128xf32>, i32 -> vector<16x128xf32>
      %301 = arith.addf %300, %291 : vector<16x128xf32>
      %c15_i32_119 = arith.constant 15 : i32
      %302 = tpu.dynamic_rotate %291 by %c15_i32_119 dim 0 : vector<16x128xf32>, i32 -> vector<16x128xf32>
      %303 = arith.addf %301, %302 : vector<16x128xf32>
      %c1_i32_120 = arith.constant 1 : i32
      %304 = tpu.dynamic_rotate %303 by %c1_i32_120 dim 1 : vector<16x128xf32>, i32 -> vector<16x128xf32>
      %305 = arith.addf %304, %303 : vector<16x128xf32>
      %c127_i32_121 = arith.constant 127 : i32
      %306 = tpu.dynamic_rotate %303 by %c127_i32_121 dim 1 : vector<16x128xf32>, i32 -> vector<16x128xf32>
      %307 = arith.addf %305, %306 : vector<16x128xf32>
      %cst_122 = arith.constant 0.111111112 : f32
      %308 = vector.broadcast %cst_122 : f32 to vector<16x128xf32>
      %309 = arith.mulf %307, %308 : vector<16x128xf32>
      %310 = arith.mulf %291, %291 : vector<16x128xf32>
      %c1_i32_123 = arith.constant 1 : i32
      %311 = tpu.dynamic_rotate %310 by %c1_i32_123 dim 0 : vector<16x128xf32>, i32 -> vector<16x128xf32>
      %312 = arith.addf %311, %310 : vector<16x128xf32>
      %c15_i32_124 = arith.constant 15 : i32
      %313 = tpu.dynamic_rotate %310 by %c15_i32_124 dim 0 : vector<16x128xf32>, i32 -> vector<16x128xf32>
      %314 = arith.addf %312, %313 : vector<16x128xf32>
      %c1_i32_125 = arith.constant 1 : i32
      %315 = tpu.dynamic_rotate %314 by %c1_i32_125 dim 1 : vector<16x128xf32>, i32 -> vector<16x128xf32>
      %316 = arith.addf %315, %314 : vector<16x128xf32>
      %c127_i32_126 = arith.constant 127 : i32
      %317 = tpu.dynamic_rotate %314 by %c127_i32_126 dim 1 : vector<16x128xf32>, i32 -> vector<16x128xf32>
      %318 = arith.addf %316, %317 : vector<16x128xf32>
      %cst_127 = arith.constant 0.111111112 : f32
      %319 = vector.broadcast %cst_127 : f32 to vector<16x128xf32>
      %320 = arith.mulf %318, %319 : vector<16x128xf32>
      %321 = arith.mulf %289, %291 : vector<16x128xf32>
      %c1_i32_128 = arith.constant 1 : i32
      %322 = tpu.dynamic_rotate %321 by %c1_i32_128 dim 0 : vector<16x128xf32>, i32 -> vector<16x128xf32>
      %323 = arith.addf %322, %321 : vector<16x128xf32>
      %c15_i32_129 = arith.constant 15 : i32
      %324 = tpu.dynamic_rotate %321 by %c15_i32_129 dim 0 : vector<16x128xf32>, i32 -> vector<16x128xf32>
      %325 = arith.addf %323, %324 : vector<16x128xf32>
      %c1_i32_130 = arith.constant 1 : i32
      %326 = tpu.dynamic_rotate %325 by %c1_i32_130 dim 1 : vector<16x128xf32>, i32 -> vector<16x128xf32>
      %327 = arith.addf %326, %325 : vector<16x128xf32>
      %c127_i32_131 = arith.constant 127 : i32
      %328 = tpu.dynamic_rotate %325 by %c127_i32_131 dim 1 : vector<16x128xf32>, i32 -> vector<16x128xf32>
      %329 = arith.addf %327, %328 : vector<16x128xf32>
      %cst_132 = arith.constant 0.111111112 : f32
      %330 = vector.broadcast %cst_132 : f32 to vector<16x128xf32>
      %331 = arith.mulf %329, %330 : vector<16x128xf32>
      %332 = arith.mulf %295, %295 : vector<16x128xf32>
      %333 = arith.subf %299, %332 : vector<16x128xf32>
      %334 = arith.mulf %309, %309 : vector<16x128xf32>
      %335 = arith.subf %320, %334 : vector<16x128xf32>
      %336 = arith.mulf %295, %309 : vector<16x128xf32>
      %337 = arith.subf %331, %336 : vector<16x128xf32>
      %cst_133 = arith.constant 2.000000e+00 : f32
      %338 = vector.broadcast %cst_133 : f32 to vector<16x128xf32>
      %339 = arith.mulf %338, %295 : vector<16x128xf32>
      %340 = arith.mulf %339, %309 : vector<16x128xf32>
      %cst_134 = arith.constant 9.99999974E-5 : f32
      %341 = vector.broadcast %cst_134 : f32 to vector<16x128xf32>
      %342 = arith.addf %340, %341 : vector<16x128xf32>
      %cst_135 = arith.constant 2.000000e+00 : f32
      %343 = vector.broadcast %cst_135 : f32 to vector<16x128xf32>
      %344 = arith.mulf %343, %337 : vector<16x128xf32>
      %cst_136 = arith.constant 8.99999984E-4 : f32
      %345 = vector.broadcast %cst_136 : f32 to vector<16x128xf32>
      %346 = arith.addf %344, %345 : vector<16x128xf32>
      %347 = arith.mulf %342, %346 : vector<16x128xf32>
      %348 = arith.mulf %295, %295 : vector<16x128xf32>
      %349 = arith.mulf %309, %309 : vector<16x128xf32>
      %350 = arith.addf %348, %349 : vector<16x128xf32>
      %cst_137 = arith.constant 9.99999974E-5 : f32
      %351 = vector.broadcast %cst_137 : f32 to vector<16x128xf32>
      %352 = arith.addf %350, %351 : vector<16x128xf32>
      %353 = arith.addf %333, %335 : vector<16x128xf32>
      %cst_138 = arith.constant 8.99999984E-4 : f32
      %354 = vector.broadcast %cst_138 : f32 to vector<16x128xf32>
      %355 = arith.addf %353, %354 : vector<16x128xf32>
      %356 = arith.mulf %352, %355 : vector<16x128xf32>
      %357 = arith.divf %347, %356 : vector<16x128xf32>
      %cst_139 = arith.constant 1.000000e+00 : f32
      %358 = vector.broadcast %cst_139 : f32 to vector<16x128xf32>
      %359 = arith.subf %358, %357 : vector<16x128xf32>
      %cst_140 = arith.constant 5.000000e-01 : f32
      %360 = vector.broadcast %cst_140 : f32 to vector<16x128xf32>
      %361 = arith.mulf %359, %360 : vector<16x128xf32>
      %cst_141 = arith.constant 0.000000e+00 : f32
      %cst_142 = arith.constant 1.000000e+00 : f32
      %362 = vector.broadcast %cst_141 : f32 to vector<16x128xf32>
      %363 = arith.maximumf %362, %361 : vector<16x128xf32>
      %364 = vector.broadcast %cst_142 : f32 to vector<16x128xf32>
      %365 = arith.minimumf %364, %363 : vector<16x128xf32>
      %366 = arith.mulf %120, %365 : vector<16x128xf32>
      %367 = vector.shape_cast %366 : vector<16x128xf32> to vector<1x16x128xf32>
      %cst_143 = arith.constant dense<0.000000e+00> : vector<1xf32>
      %368 = vector.multi_reduction <add>, %367, %cst_143 [1, 2] : vector<1x16x128xf32> to vector<1xf32>
      %369 = vector.shape_cast %368 : vector<1xf32> to vector<1x1x1xf32>
      %370 = vector.extract %369[0, 0, 0] : f32 from vector<1x1x1xf32>
      %371 = arith.addf %287, %370 : f32
      %c0_144 = arith.constant 0 : index
      %372 = memref.load %arg12[%c0_144] : memref<2xf32, #tpu.memory_space<smem>>
      %cst_145 = arith.constant 9.44822386E-5 : f32
      %373 = arith.mulf %371, %cst_145 : f32
      %374 = arith.addf %372, %373 : f32
      %c0_146 = arith.constant 0 : index
      %375 = memref.load %arg12[%c0_146] : memref<2xf32, #tpu.memory_space<smem>>
      memref.store %374, %arg12[%c0_146] : memref<2xf32, #tpu.memory_space<smem>>
    } else {
    }
    %c0_i32_36 = arith.constant 0 : i32
    %104 = arith.cmpi eq, %arg1, %c0_i32_36 : i32
    %105 = arith.extui %104 : i1 to i32
    %c0_i32_37 = arith.constant 0 : i32
    %106 = arith.cmpi ne, %105, %c0_i32_37 : i32
    scf.if %106 {
      %c0_39 = arith.constant 0 : index
      %c0_40 = arith.constant 0 : index
      %c0_41 = arith.constant 0 : index
      %110 = vector.load %arg5[%c0_39, %c0_40, %c0_41] : memref<1x16x128xf32, #tpu.memory_space<vmem>>, vector<1x16x128xf32>
      %111 = vector.shape_cast %110 : vector<1x16x128xf32> to vector<16x128xf32>
      %c127_i32_42 = arith.constant 127 : i32
      %112 = tpu.dynamic_rotate %111 by %c127_i32_42 dim 1 : vector<16x128xf32>, i32 -> vector<16x128xf32>
      %113 = arith.subf %111, %112 : vector<16x128xf32>
      %c15_i32_43 = arith.constant 15 : i32
      %114 = tpu.dynamic_rotate %111 by %c15_i32_43 dim 0 : vector<16x128xf32>, i32 -> vector<16x128xf32>
      %115 = arith.subf %111, %114 : vector<16x128xf32>
      %116 = vector.extract_strided_slice %28 {offsets = [0, 0, 0], sizes = [1, 16, 128], strides = [1, 1, 1]} : vector<3x16x128xf32> to vector<1x16x128xf32>
      %117 = vector.shape_cast %116 : vector<1x16x128xf32> to vector<16x128xf32>
      %c127_i32_44 = arith.constant 127 : i32
      %118 = tpu.dynamic_rotate %117 by %c127_i32_44 dim 1 : vector<16x128xf32>, i32 -> vector<16x128xf32>
      %119 = arith.subf %117, %118 : vector<16x128xf32>
      %120 = math.absf %119 : vector<16x128xf32>
      %c15_i32_45 = arith.constant 15 : i32
      %121 = tpu.dynamic_rotate %117 by %c15_i32_45 dim 0 : vector<16x128xf32>, i32 -> vector<16x128xf32>
      %122 = arith.subf %117, %121 : vector<16x128xf32>
      %123 = math.absf %122 : vector<16x128xf32>
      %124 = vector.extract_strided_slice %28 {offsets = [1, 0, 0], sizes = [1, 16, 128], strides = [1, 1, 1]} : vector<3x16x128xf32> to vector<1x16x128xf32>
      %125 = vector.shape_cast %124 : vector<1x16x128xf32> to vector<16x128xf32>
      %c127_i32_46 = arith.constant 127 : i32
      %126 = tpu.dynamic_rotate %125 by %c127_i32_46 dim 1 : vector<16x128xf32>, i32 -> vector<16x128xf32>
      %127 = arith.subf %125, %126 : vector<16x128xf32>
      %128 = math.absf %127 : vector<16x128xf32>
      %c15_i32_47 = arith.constant 15 : i32
      %129 = tpu.dynamic_rotate %125 by %c15_i32_47 dim 0 : vector<16x128xf32>, i32 -> vector<16x128xf32>
      %130 = arith.subf %125, %129 : vector<16x128xf32>
      %131 = math.absf %130 : vector<16x128xf32>
      %132 = arith.addf %120, %128 : vector<16x128xf32>
      %133 = arith.addf %123, %131 : vector<16x128xf32>
      %134 = vector.extract_strided_slice %28 {offsets = [2, 0, 0], sizes = [1, 16, 128], strides = [1, 1, 1]} : vector<3x16x128xf32> to vector<1x16x128xf32>
      %135 = vector.shape_cast %134 : vector<1x16x128xf32> to vector<16x128xf32>
      %c127_i32_48 = arith.constant 127 : i32
      %136 = tpu.dynamic_rotate %135 by %c127_i32_48 dim 1 : vector<16x128xf32>, i32 -> vector<16x128xf32>
      %137 = arith.subf %135, %136 : vector<16x128xf32>
      %138 = math.absf %137 : vector<16x128xf32>
      %c15_i32_49 = arith.constant 15 : i32
      %139 = tpu.dynamic_rotate %135 by %c15_i32_49 dim 0 : vector<16x128xf32>, i32 -> vector<16x128xf32>
      %140 = arith.subf %135, %139 : vector<16x128xf32>
      %141 = math.absf %140 : vector<16x128xf32>
      %142 = arith.addf %132, %138 : vector<16x128xf32>
      %143 = arith.addf %133, %141 : vector<16x128xf32>
      %cst_50 = arith.constant 0.333333343 : f32
      %144 = vector.broadcast %cst_50 : f32 to vector<16x128xf32>
      %145 = arith.mulf %142, %144 : vector<16x128xf32>
      %cst_51 = arith.constant 0.000000e+00 : f32
      %146 = vector.broadcast %cst_51 : f32 to vector<16x128xf32>
      %147 = arith.subf %146, %145 : vector<16x128xf32>
      %148 = math.exp %147 : vector<16x128xf32>
      %cst_52 = arith.constant 0.333333343 : f32
      %149 = vector.broadcast %cst_52 : f32 to vector<16x128xf32>
      %150 = arith.mulf %143, %149 : vector<16x128xf32>
      %cst_53 = arith.constant 0.000000e+00 : f32
      %151 = vector.broadcast %cst_53 : f32 to vector<16x128xf32>
      %152 = arith.subf %151, %150 : vector<16x128xf32>
      %153 = math.exp %152 : vector<16x128xf32>
      %c1 = arith.constant 1 : index
      %154 = memref.load %arg12[%c1] : memref<2xf32, #tpu.memory_space<smem>>
      %155 = math.absf %113 : vector<16x128xf32>
      %156 = arith.mulf %155, %148 : vector<16x128xf32>
      %157 = arith.mulf %156, %5 : vector<16x128xf32>
      %158 = vector.shape_cast %157 : vector<16x128xf32> to vector<1x16x128xf32>
      %cst_54 = arith.constant dense<0.000000e+00> : vector<1xf32>
      %159 = vector.multi_reduction <add>, %158, %cst_54 [1, 2] : vector<1x16x128xf32> to vector<1xf32>
      %160 = vector.shape_cast %159 : vector<1xf32> to vector<1x1x1xf32>
      %161 = vector.extract %160[0, 0, 0] : f32 from vector<1x1x1xf32>
      %cst_55 = arith.constant 2.460630e-04 : f32
      %162 = arith.mulf %161, %cst_55 : f32
      %163 = math.absf %115 : vector<16x128xf32>
      %164 = arith.mulf %163, %153 : vector<16x128xf32>
      %165 = arith.mulf %164, %9 : vector<16x128xf32>
      %166 = vector.shape_cast %165 : vector<16x128xf32> to vector<1x16x128xf32>
      %cst_56 = arith.constant dense<0.000000e+00> : vector<1xf32>
      %167 = vector.multi_reduction <add>, %166, %cst_56 [1, 2] : vector<1x16x128xf32> to vector<1xf32>
      %168 = vector.shape_cast %167 : vector<1xf32> to vector<1x1x1xf32>
      %169 = vector.extract %168[0, 0, 0] : f32 from vector<1x1x1xf32>
      %cst_57 = arith.constant 2.6041668E-4 : f32
      %170 = arith.mulf %169, %cst_57 : f32
      %171 = arith.addf %162, %170 : f32
      %172 = arith.addf %154, %171 : f32
      %c1_58 = arith.constant 1 : index
      %173 = memref.load %arg12[%c1_58] : memref<2xf32, #tpu.memory_space<smem>>
      memref.store %172, %arg12[%c1_58] : memref<2xf32, #tpu.memory_space<smem>>
    } else {
    }
    %c3_i32 = arith.constant 3 : i32
    %107 = arith.cmpi eq, %arg1, %c3_i32 : i32
    %108 = arith.extui %107 : i1 to i32
    %c0_i32_38 = arith.constant 0 : i32
    %109 = arith.cmpi ne, %108, %c0_i32_38 : i32
    scf.if %109 {
      %c0_39 = arith.constant 0 : index
      %c0_40 = arith.constant 0 : index
      %110 = vector.load %arg7[%c0_39, %c0_40] : memref<16x128xf32, #tpu.memory_space<vmem>>, vector<16x128xf32>
      %c0_41 = arith.constant 0 : index
      %c0_42 = arith.constant 0 : index
      %111 = vector.load %arg8[%c0_41, %c0_42] : memref<16x128xf32, #tpu.memory_space<vmem>>, vector<16x128xf32>
      %c0_43 = arith.constant 0 : index
      %c0_44 = arith.constant 0 : index
      %112 = vector.load %arg9[%c0_43, %c0_44] : memref<16x128xf32, #tpu.memory_space<vmem>>, vector<16x128xf32>
      %cst_45 = arith.constant 1.000000e+04 : f32
      %113 = vector.broadcast %cst_45 : f32 to vector<16x128xf32>
      %114 = arith.cmpf olt, %110, %113 : vector<16x128xf32>
      %cst_46 = arith.constant 0.000000e+00 : f32
      %115 = vector.broadcast %cst_46 : f32 to vector<16x128xf32>
      %116 = arith.select %114, %110, %115 : vector<16x128xi1>, vector<16x128xf32>
      %cst_47 = arith.constant 1.000000e+04 : f32
      %117 = vector.broadcast %cst_47 : f32 to vector<16x128xf32>
      %118 = arith.cmpf olt, %111, %117 : vector<16x128xf32>
      %cst_48 = arith.constant 0.000000e+00 : f32
      %119 = vector.broadcast %cst_48 : f32 to vector<16x128xf32>
      %120 = arith.select %118, %111, %119 : vector<16x128xi1>, vector<16x128xf32>
      %121 = arith.addf %116, %120 : vector<16x128xf32>
      %cst_49 = arith.constant 1.000000e+04 : f32
      %122 = vector.broadcast %cst_49 : f32 to vector<16x128xf32>
      %123 = arith.cmpf olt, %112, %122 : vector<16x128xf32>
      %cst_50 = arith.constant 0.000000e+00 : f32
      %124 = vector.broadcast %cst_50 : f32 to vector<16x128xf32>
      %125 = arith.select %123, %112, %124 : vector<16x128xi1>, vector<16x128xf32>
      %126 = arith.addf %121, %125 : vector<16x128xf32>
      %127 = vector.shape_cast %126 : vector<16x128xf32> to vector<1x16x128xf32>
      %cst_51 = arith.constant dense<0.000000e+00> : vector<1xf32>
      %128 = vector.multi_reduction <add>, %127, %cst_51 [1, 2] : vector<1x16x128xf32> to vector<1xf32>
      %129 = vector.shape_cast %128 : vector<1xf32> to vector<1x1x1xf32>
      %130 = vector.extract %129[0, 0, 0] : f32 from vector<1x1x1xf32>
      %cst_52 = arith.constant 2.44140625E-4 : f32
      %131 = arith.mulf %130, %cst_52 : f32
      %132 = tpu.iota {dimensions = array<i32: 1>} : vector<1x128xi32>
      %c0_i32_53 = arith.constant 0 : i32
      %133 = vector.broadcast %c0_i32_53 : i32 to vector<1x128xi32>
      %134 = arith.cmpi eq, %132, %133 : vector<1x128xi32>
      %cst_54 = arith.constant 0.000000e+00 : f32
      %135 = vector.broadcast %131 : f32 to vector<1x128xf32>
      %136 = vector.broadcast %cst_54 : f32 to vector<1x128xf32>
      %137 = arith.select %134, %135, %136 : vector<1x128xi1>, vector<1x128xf32>
      %c1_i32_55 = arith.constant 1 : i32
      %138 = vector.broadcast %c1_i32_55 : i32 to vector<1x128xi32>
      %139 = arith.cmpi eq, %132, %138 : vector<1x128xi32>
      %c0_56 = arith.constant 0 : index
      %140 = memref.load %arg12[%c0_56] : memref<2xf32, #tpu.memory_space<smem>>
      %cst_57 = arith.constant 0.000000e+00 : f32
      %141 = vector.broadcast %140 : f32 to vector<1x128xf32>
      %142 = vector.broadcast %cst_57 : f32 to vector<1x128xf32>
      %143 = arith.select %139, %141, %142 : vector<1x128xi1>, vector<1x128xf32>
      %144 = arith.addf %137, %143 : vector<1x128xf32>
      %c2_i32_58 = arith.constant 2 : i32
      %145 = vector.broadcast %c2_i32_58 : i32 to vector<1x128xi32>
      %146 = arith.cmpi eq, %132, %145 : vector<1x128xi32>
      %c1 = arith.constant 1 : index
      %147 = memref.load %arg12[%c1] : memref<2xf32, #tpu.memory_space<smem>>
      %cst_59 = arith.constant 0.000000e+00 : f32
      %148 = vector.broadcast %147 : f32 to vector<1x128xf32>
      %149 = vector.broadcast %cst_59 : f32 to vector<1x128xf32>
      %150 = arith.select %146, %148, %149 : vector<1x128xi1>, vector<1x128xf32>
      %151 = arith.addf %144, %150 : vector<1x128xf32>
      %c0_60 = arith.constant 0 : index
      %c0_61 = arith.constant 0 : index
      %c0_62 = arith.constant 0 : index
      %152 = vector.load %arg6[%c0_60, %c0_61, %c0_62] : memref<1x1x128xf32, #tpu.memory_space<vmem>>, vector<1x1x128xf32>
      %153 = vector.shape_cast %152 : vector<1x1x128xf32> to vector<1x128xf32>
      %154 = vector.shape_cast %151 : vector<1x128xf32> to vector<1x1x128xf32>
      tpu.vector_store %arg6[%c0_60, %c0_61, %c0_62], %154 {strides = array<i32>} : memref<1x1x128xf32, #tpu.memory_space<vmem>>, vector<1x1x128xf32>,
    } else {
    }
    return
  }
  func.func @transform_0(%arg0: i32, %arg1: i32) -> (i32, i32, i32, i32) {
    %c4_i32 = arith.constant 4 : i32
    %0 = arith.muli %arg0, %c4_i32 : i32
    %1 = arith.addi %0, %arg1 : i32
    %c0_i32 = arith.constant 0 : i32
    %c0_i32_0 = arith.constant 0 : i32
    %c0_i32_1 = arith.constant 0 : i32
    %c0_i32_2 = arith.constant 0 : i32
    return %1, %c0_i32, %c0_i32_0, %c0_i32_1 : i32, i32, i32, i32
  }
  func.func @transform_1(%arg0: i32, %arg1: i32) -> (i32, i32, i32) {
    %c4_i32 = arith.constant 4 : i32
    %0 = arith.muli %arg0, %c4_i32 : i32
    %1 = arith.addi %0, %arg1 : i32
    %c0_i32 = arith.constant 0 : i32
    %c0_i32_0 = arith.constant 0 : i32
    %c0_i32_1 = arith.constant 0 : i32
    return %1, %c0_i32, %c0_i32_0 : i32, i32, i32
  }
  func.func @transform_2(%arg0: i32, %arg1: i32) -> (i32, i32, i32, i32) {
    %c0_i32 = arith.constant 0 : i32
    %c0_i32_0 = arith.constant 0 : i32
    %c0_i32_1 = arith.constant 0 : i32
    %c0_i32_2 = arith.constant 0 : i32
    return %arg0, %c0_i32, %c0_i32_0, %c0_i32_1 : i32, i32, i32, i32
  }
  func.func @transform_3(%arg0: i32, %arg1: i32) -> (i32, i32, i32) {
    %c0_i32 = arith.constant 0 : i32
    %c0_i32_0 = arith.constant 0 : i32
    %c0_i32_1 = arith.constant 0 : i32
    return %arg0, %c0_i32, %c0_i32_0 : i32, i32, i32
  }
  func.func @transform_4(%arg0: i32, %arg1: i32) -> (i32, i32, i32) {
    %c0_i32 = arith.constant 0 : i32
    %c0_i32_0 = arith.constant 0 : i32
    %c0_i32_1 = arith.constant 0 : i32
    return %arg0, %c0_i32, %c0_i32_0 : i32, i32, i32
  }
}

</mosaic_0001>

<bundles_post_ra>
// kernel: custom-call.11
= control target key start
LH: loop header
LB: loop body
LE: loop exit
PB: predicated region body
PF: predicated region fallthrough
CT: control target
= control target key end

     0   :  { %5 = vsyncpa [#allocation6], 0  ;;  %s896_s0 = inlined_call_operand.vmem [shape: f32[2,3,3], index: 0, kind: input, shape index: {}]   ;;  %s897_s1 = inlined_call_operand.vmem [shape: f32[2,3,3], index: 1, kind: output, shape index: {0}]   ;;  %s898_s2 = inlined_call_operand.hbm [shape: s32[2,3], index: 2, kind: output, shape index: {1}]   ;;  %s899_s3 = inlined_call_operand.vmem [shape: s32[2,3], index: 3, kind: output, shape index: {2}]  }
   0x1   :  { %7 = vsyncpa [#allocation6 + $0x1], 0  ;;  %s715_s12 = smov 0   ;;  %s717_s13 = smov 0  }
   0x2   :  { %s719_s14 = smov 0   ;;  %s721_s15 = smov 0  }
   0x3 LB: > { %s736_s16 = sadd.s32 4294967295, %s687_s15   ;;  %s550_s17 = sadd.s32 4294967294, %s687_s15   ;;  %s687_s15 = sphi %s721_s15, %s907_s15   ;;  %s683_s14 = sphi %s719_s14, %s906_s14   ;;  %s679_s13 = sphi %s717_s13, %s905_s13   ;;  %s675_s12 = sphi %s715_s12, %s904_s12  }
   0x4   : > { %s740_s18 = sadd.s32 1, %s687_s15   ;;  %s17_s19 = sshrl.u32 %s687_s15, 3 }
   0x5   : > { %s18_s20 = sshrl.u32 %s740_s18, 3  ;;  %s22_s21 = sadd.s32 1, %s683_s14 }
   0x6   : > { %s19_s22 = ssub.s32 %s17_s19, %s18_s20  ;;  %p32_p0 = scmp.ne.s32.totalorder %s683_s14, %s679_s13 }
   0x7   : > { %p20_p1 = scmp.eq.s32.totalorder %s19_s22, 0  ;;  %p33_p2 = scmp.eq.s32.totalorder %s736_s16, 1 }
   0x8   : > { %p38_p3 = scmp.ne.s32.totalorder %s679_s13, %s675_s12  ;;  %p39_p4 = scmp.eq.s32.totalorder %s550_s17, 1 }
   0x9   : > { %s751_s23 = scalar_select %p20_p1, %s683_s14, %s22_s21  }
   0xa   : > { %p753_p5 = por %p33_p2, %p32_p0  ;;  %p757_p6 = por %p39_p4, %p38_p3 }
   0xb   : > { %p552_p7 = scmp.ge.s32.totalorder %s687_s15, 2 }
   0xc   : > { %s85_s26 = sand.u32 (!%p552_p7), 1, %s687_s15   ;;  %s554_s27 = sshll.u32 (!%p552_p7), %s687_s15, 2 }
   0xd   : > { %83 = sbr.rel (%p552_p7) target bundleno = 20 (0x14), region = 16  ;;  %s553_s28 = sshll.u32 (!%p552_p7), %s85_s26, 2 }
   0xe   : > { %s89_s4 = scalar_lea.vmem (!%p552_p7), %s896_s0, %s554_s27  ;;  %s87_s5 = scalar_lea.vmem (!%p552_p7), [#allocation1], %s553_s28 }
   0xf   : > { %v105_v0 = vld [vmem:[%s89_s4] sm:$0xf] (!%p552_p7) }
  0x10   : > { %106 = vst [vmem:[%s87_s5] sm:$0xf] (!%p552_p7), %v105_v0 }
  0x14 PF: > { %p555_p8 = scmp.ge.s32.totalorder %s687_s15, 1  ;;  %p122_p9 = scmp.lt.s32.totalorder %s687_s15, 3 }
  0x16   : > { %p123_p10 = pnand %p555_p8, %p122_p9 }
  0x18   : > { %126 = sbr.rel (%p123_p10) target bundleno = 451 (0x1c3), region = 50 }
  0x1f   : > { %s133_s6 = sand.u32 1, %s736_s16   ;;  %s144_s7 = sand.u32 1, %s679_s13   ;;  %v166_v1 = vlaneseq  ;;  %v693_v4 = vmov 0  }
  0x20   : > { %s773_s8 = sshll.u32 %s133_s6, 2  ;;  %s777_s9 = sshll.u32 %s144_s7, 1 }
  0x21   : > { %v780_v2 = vshrl.u32 %v166_v1, 7  ;;  %s135_s10 = scalar_lea.vmem [#allocation1], %s773_s8  ;;  %s161_s11 = sand.u32 7, %s736_s16  }
  0x22   : > { %v155_v3 = vld [vmem:[%s135_s10] sm:$0xf]  ;;  %s785_s17 = scalar_lea.vmem [#allocation4], %s161_s11  ;;  %s139_s19 = scalar_lea.vmem [#allocation3], %s773_s8 }
  0x23   : > { %156 = vst [vmem:[#allocation0] sm:$0xf] %v155_v3  ;;  %170 = vst [vmem:[#allocation9] sm:$0xff] %v780_v2  ;;  %s146_s20 = scalar_lea.vmem [#allocation5], %s777_s9  ;;  %s152_s21 = scalar_lea.vmem [#allocation8], %s777_s9 }
  0x24   : > { %165 = vst [vmem:[%s785_s17] sm:$0x1] %v693_v4  ;;  %s791_s22 = scalar_lea.vmem [#allocation7], %s161_s11  ;;  %s793_s26 = smov 0  }
  0x2a   : > { %v159_v5 = vld [vmem:[#allocation0] sm:$0xff] }
  0x2b   : > { %160 = vst [vmem:[#allocation2] sm:$0xff] %v159_v5 }
  0x2c LB: >> { %vm186_vm0 = vcmp.lt.s32.totalorder %v780_v2, 3  ;;  %v800_v8 = vstv %s691_s26  ;;  %s227_s27 = ssub.s32 128, %s691_s26  ;;  %v233_v38 = vand.u32 127, %v166_v1  ;;  %v236_v40 = vld [vmem:[%s785_s17] ss:$0 sm:$0xff]  ;;  %s239_s28 = scalar_lea.vmem [#allocation2], %s691_s26  ;;  %s691_s26 = sphi %s793_s26, %s176_s26  }
  0x2d   : >> { %vm185_vm1 = vcmp.ge.s32.totalorder %v780_v2, %v800_v8  ;;  %s245_s30 = scalar_lea.vmem [#allocation9], %s691_s26  ;;  %vm265_vm15 = vcmp.gt.s32.totalorder %v780_v2, %v800_v8  ;;  %s176_s26 = sadd.s32 1, %s691_s26  }
  0x2e   : >> { %vm187_vm3 = vmand %vm185_vm1, %vm186_vm0  ;;  %vm257_vm12 = vcmp.gt.s32.totalorder %v233_v38, %v800_v8  ;;  %vm234_vm13 = vcmp.eq.s32.totalorder %v233_v38, %v800_v8  ;;  %v247_v42 = vld [vmem:[%s245_s30] ss:$0 sm:$0xff]  ;;  %p173_p11 = scmp.ge.s32.totalorder %s176_s26, 3  }
  0x2f   : >> { %vm269_vm1 = vmand %vm265_vm15, %vm234_vm13  ;;  %s900_s6 = sshrl.u32 (%p173_p11), %s736_s16, 3  ;;  %s564_s10 = sshll.u32 (%p173_p11), %s736_s16, 2 }
  0x30   : > { %s565_s11 = sshll.u32 (%p173_p11), %s900_s6, 5 }
  0x32   : >> { %v181_v6 = vld [vmem:[#allocation2] sm:$0xff]  ;;  %v241_v41 = vld [vmem:[%s239_s28] ss:$0 sm:$0xff] }
  0x33   : >> { %v182_v7 = vand.u32 2147483647, %v181_v6 }
  0x35   : >> { %vm560_vm2 = vcmp.gt.f32.partialorder %v182_v7, -inf }
  0x36   : >> { %vm189_vm4 = vmand %vm187_vm3, %vm560_vm2 }
  0x37   : >> { %v190_v9 = vsel %vm189_vm4, %v780_v2, %v800_v8  ;;  %v191_v10 = vsel %vm189_vm4, %v182_v7, -inf }
  0x38   : >> { %v192_v11 = vrot.slane %v191_v10, 1  ;;  %v193_v12 = vrot.slane %v190_v9, 1 }
  0x3a   : >> { %vm194_vm5 = vcmp.ge.f32.partialorder %v192_v11, %v191_v10  ;;  %v197_v13 = vrot.slane %v192_v11, 1  ;;  %v198_v14 = vrot.slane %v193_v12, 1 }
  0x3b   : >> { %v195_v15 = vsel %vm194_vm5, %v192_v11, %v191_v10  ;;  %v196_v16 = vsel %vm194_vm5, %v193_v12, %v190_v9 }
  0x3c   : >> { %vm199_vm6 = vcmp.ge.f32.partialorder %v197_v13, %v195_v15  ;;  %v202_v17 = vrot.slane %v197_v13, 1  ;;  %v203_v18 = vrot.slane %v198_v14, 1 }
  0x3d   : >> { %v200_v19 = vsel %vm199_vm6, %v197_v13, %v195_v15  ;;  %v201_v20 = vsel %vm199_vm6, %v198_v14, %v196_v16 }
  0x3e   : >> { %vm204_vm7 = vcmp.ge.f32.partialorder %v202_v17, %v200_v19  ;;  %v207_v21 = vrot.slane %v202_v17, 1  ;;  %v208_v22 = vrot.slane %v203_v18, 1 }
  0x3f   : >> { %v205_v23 = vsel %vm204_vm7, %v202_v17, %v200_v19  ;;  %v206_v24 = vsel %vm204_vm7, %v203_v18, %v201_v20 }
  0x40   : >> { %vm209_vm8 = vcmp.ge.f32.partialorder %v207_v21, %v205_v23  ;;  %v212_v25 = vrot.slane %v207_v21, 1  ;;  %v213_v26 = vrot.slane %v208_v22, 1 }
  0x41   : >> { %v210_v27 = vsel %vm209_vm8, %v207_v21, %v205_v23  ;;  %v211_v28 = vsel %vm209_vm8, %v208_v22, %v206_v24 }
  0x42   : >> { %vm214_vm9 = vcmp.ge.f32.partialorder %v212_v25, %v210_v27  ;;  %v217_v29 = vrot.slane %v212_v25, 1  ;;  %v218_v30 = vrot.slane %v213_v26, 1 }
  0x43   : >> { %v215_v31 = vsel %vm214_vm9, %v212_v25, %v210_v27  ;;  %v216_v32 = vsel %vm214_vm9, %v213_v26, %v211_v28 }
  0x44   : >> { %vm219_vm10 = vcmp.ge.f32.partialorder %v217_v29, %v215_v31  ;;  %v222_v33 = vrot.slane %v217_v29, 1  ;;  %v223_v34 = vrot.slane %v218_v30, 1 }
  0x45   : >> { %v220_v35 = vsel %vm219_vm10, %v217_v29, %v215_v31  ;;  %v221_v36 = vsel %vm219_vm10, %v218_v30, %v216_v32 }
  0x46   : >> { %vm224_vm11 = vcmp.ge.f32.partialorder %v222_v33, %v220_v35 }
  0x47   : >> { %v226_v37 = vsel %vm224_vm11, %v223_v34, %v221_v36 }
  0x48   : >> { %228 = vrot.lane.b32.xlu0 %v226_v37, %s227_s27  ;;  %s357_s27 = scalar_lea.vmem (%p173_p11), %s897_s1, %s564_s10 }
  0xba   : >> { %v229_v39 = vpop.permute.xlu0 %228 }
  0xbb   : >> { %569 = vpush %v229_v39 }
  0xec   : >> { %s570_s29 = spop %569 }
  0xed   : >> { %v235_v43 = vstv %s570_s29  ;;  %s240_s4 = scalar_lea.vmem [#allocation2], %s570_s29  ;;  %s246_s5 = scalar_lea.vmem [#allocation9], %s570_s29 }
  0xee   : >> { %v242_v44 = vld [vmem:[%s240_s4] ss:$0 sm:$0xff]  ;;  %v237_v46 = vsel %vm234_vm13, %v235_v43, %v236_v40 }
  0xef   : >> { %v248_v45 = vld [vmem:[%s246_s5] ss:$0 sm:$0xff]  ;;  %243 = vst [vmem:[%s240_s4] sm:$0x1] %v241_v41  ;;  %vm251_vm14 = vcmp.ne.f32.partialorder %v242_v44, 0.0  ;;  %238 = vst [vmem:[%s785_s17] sm:$0x1] %v237_v46  ;;  %v258_v53 = vsel %vm257_vm12, %v242_v44, 0.0 }
  0xf0   : >> { %249 = vst [vmem:[%s246_s5] sm:$0x1] %v247_v42  ;;  %244 = vst [vmem:[%s239_s28] sm:$0x1] %v242_v44  ;;  %s399_s4 = sshll.u32 (%p173_p11), %s146_s20, 4  ;;  %s348_s5 = scalar_lea.sflag (%p173_p11), [#allocation6], %s144_s7  ;;  %s400_s4 = int_to_ptr.vmem [resolvable:$true] %s399_s4 }
  0xf1   : >> { %250 = vst [vmem:[%s245_s30] sm:$0x1] %v248_v45  ;;  %vm252_vm0 = vmand %vm234_vm13, %vm251_vm14  ;;  %s843_s30 = scalar_lea.hbm (%p173_p11), %s898_s2, %s565_s11  ;;  %s621_s6 = scalar_lea.vmem (%p173_p11), %s400_s4, 32 }
  0xf2   : >> { %v253_v47 = vsel %vm252_vm0, %v242_v44, 1.0  ;;  %p622_p12 = scmp.ne.s32.totalorder (%p173_p11), %s400_s4, %s621_s6  ;;  %s694_s17 = smov (%p173_p11), [#allocation5]  }
  0xf3   : >> { %v266_v48 = vsel %vm265_vm15, %v253_v47, 1.0  ;;  %s625_s10 = sshll.u32 (%p173_p11), %s694_s17, 4  ;;  %s626_s10 = int_to_ptr.vmem [resolvable:$false] %s625_s10 }
  0xf4   : >> { %619 = vrcp.f32 %v266_v48  ;;  %p623_p13 = pnand (%p173_p11), %p622_p12, %p753_p5  ;;  %s627_s8 = scalar_lea.vmem (%p173_p11), %s626_s10, 64 }
  0xf5   : > { %p628_p1 = scmp.lt.s32.totalorder (%p173_p11), %s400_s4, %s626_s10  ;;  %p629_p2 = scmp.lt.s32.totalorder (%p173_p11), %s627_s8, %s621_s6 }
  0xf6   : > { %v334_v59 = vld [vmem:[#allocation4] sm:$0x3] (%p173_p11)  ;;  %p624_p0 = pneg (%p173_p11), %p623_p13 }
  0xf7   : >> { %v262_v50 = vld [vmem:[#allocation2] sm:$0xff]  ;;  %336 = vst [vmem:[%s146_s20] sm:$0x3] (%p173_p11), %v334_v59  ;;  %p630_p3 = por (%p173_p11), %p629_p2, %p628_p1 }
  0xf8   : > { %v276_v57 = vld [vmem:[#allocation9] sm:$0xff] (%p173_p11) }
  0xf9   : > { %p631_p4 = pnand (%p173_p11), %p630_p3, %p624_p0 }
  0xfe   : >> { %v620_v49 = vpop.eup %619 }
  0xff   : >> { %v268_v51 = vmul.f32 %v620_v49, %v262_v50 }
 0x101   : >> { %v270_v52 = vsel %vm269_vm1, %v268_v51, 0.0 }
 0x102   : >> { %271 = vadd.xlane.f32.xlu0 %v270_v52 }
 0x12f   : > { %292 = vxpose.xlu0.b32.start.end [1/1] (short) (narrow) (%p173_p11), %v276_v57, 8 }
 0x18e   : > { %175 = sbr.rel (!%p173_p11) target bundleno = 44 (0x2c), region = 202 }
 0x18f   : >> { %v272_v54 = vpop.xlane.xlu0 %271 }
 0x190   : >> { %v273_v55 = vmul.f32 %v272_v54, %v258_v53 }
 0x192   : >> { %v274_v56 = vsub.f32 %v268_v51, %v273_v55 }
 0x194   : >> { %275 = vst [vmem:[#allocation2] sm:$0xff] %v274_v56 }
 0x19b   : > { %v328_v58 = vld [vmem:[#allocation2] sm:$0xf] }
 0x19c   : > { %330 = vst [vmem:[%s139_s19] sm:$0xf] %v328_v58 }
 0x1a3   : > { %v373_v60 = vld [vmem:[%s139_s19] sm:$0xf] }
 0x1a4   : > { %374 = vst [vmem:[%s357_s27] sm:$0xf] %v373_v60 }
 0x1a5   : > { %634 = shalt.err (!%p631_p4)
}
 0x1a6   : > { %s635_s7 = scalar_lea.hbm %s843_s30, 32  ;;  %s639_s11 = scalar_lea.hbm %s898_s2, 32 }
 0x1a7   : > { %p636_p8 = scmp.ne.s32.totalorder %s843_s30, %s635_s7  ;;  %p640_p11 = scmp.lt.u32.totalorder %s843_s30, %s898_s2 }
 0x1a8   : > { %p641_p12 = scmp.lt.u32.totalorder %s639_s11, %s635_s7  ;;  %p643_p0 = scmp.lt.u32.totalorder %s635_s7, %s843_s30 }
 0x1a9   : > { %p637_p9 = pnand %p636_p8, %p753_p5 }
 0x1aa   : > { %p642_p13 = por %p641_p12, %p640_p11 }
 0x1ab   : > { %p638_p10 = pneg %p637_p9 }
 0x1ac   : > { %p644_p1 = por %p643_p0, %p642_p13 }
 0x1ae   : > { %p645_p2 = pnand %p644_p1, %p638_p10 }
 0x1b0   : > { %648 = shalt.err (!%p645_p2)
}
 0x1b1   : > { %571 = dma.vmem_to_hbm [thread:$0]  (%p753_p5), %s400_s4, 32, %s843_s30, %s348_s5   ;;  %v308_v61 = vpop.trf.xlu0 }
 0x1b2   : > { %324 = vst [vmem:[%s791_s22] sm:$0x1] %v308_v61  ;;  %s903_s6 = sshrl.u32 (%p753_p5), %s736_s16, 3 }
 0x1b3   : > { %s566_s28 = sshll.u32 (%p753_p5), %s903_s6, 1 }
 0x1b4   : > { %405 = sbr.rel (!%p753_p5) target bundleno = 451 (0x1c3), region = 96  ;;  %s408_s10 = scalar_lea.vmem (%p753_p5), %s899_s3, %s566_s28 }
 0x1b9   : > { %v340_v62 = vld [vmem:[#allocation7] sm:$0x3] }
 0x1ba   : > { %342 = vst [vmem:[%s152_s21] sm:$0x3] %v340_v62 }
 0x1c1   : > { %v424_v63 = vld [vmem:[%s152_s21] sm:$0x3] }
 0x1c2   : > { %425 = vst [vmem:[%s408_s10] sm:$0x3] %v424_v63 }
 0x1c3 PF: > { %s452_s22 = sand.u32 1, %s675_s12   ;;  %p574_p5 = pnand %p552_p7, %p757_p6 }
 0x1c4   : > { %s453_s24 = scalar_lea.sflag [#allocation6], %s452_s22 }
 0x1c5   : > { %670 = dma.done.wait (!%p574_p5), %s453_s24, 32  }
 0x1c6   : > { %672 = vsyncadd (!%p574_p5), %s453_s24, 4294967264  ;;  %p10_p3 = scmp.ge.s32.totalorder %s740_s18, 4   ;;  %s904_s12 = smov %s679_s13 }
 0x1c7   : > { %s905_s13 = smov %s683_s14  ;;  %s906_s14 = smov %s751_s23 }
 0x1c8   : > { %s907_s15 = smov %s740_s18  ;;  %12 = sbr.rel (!%p10_p3) target bundleno = 3 (0x3), region = 213 }
 0x1cf   :  { %465 = vsyncpa [#allocation6], 1 }
 0x1d0   :  { %467 = vsyncpa [#allocation6 + $0x1], 1 }

// kernel: custom-call.13
= control target key start
LH: loop header
LB: loop body
LE: loop exit
PB: predicated region body
PF: predicated region fallthrough
CT: control target
= control target key end

     0   :  { %s343_s6 = smov 0   ;;  %s345_s7 = smov 0   ;;  %s390_s0 = inlined_call_operand.vmem [shape: f32[2,1,3,3], index: 0, kind: input, shape index: {}]   ;;  %s391_s1 = inlined_call_operand.vmem [shape: f32[2,1,3,3], index: 1, kind: output, shape index: {}]  }
   0x1   :  { %s347_s8 = smov 0  }
   0x2 LB: > { %s269_s9 = sadd.s32 4294967295, %s330_s8   ;;  %s33_s10 = sadd.s32 1, %s326_s7  ;;  %s330_s8 = sphi %s347_s8, %s7_s8   ;;  %s326_s7 = sphi %s345_s7, %s393_s7   ;;  %s322_s6 = sphi %s343_s6, %s392_s6  }
   0x3   : > { %p35_p0 = scmp.ge.s32.totalorder %s33_s10, 2  ;;  %p271_p1 = scmp.ge.s32.totalorder %s330_s8, 2 }
   0x4   : > { %s49_s11 = sand.u32 (!%p271_p1), 1, %s330_s8   ;;  %s273_s12 = sshll.u32 (!%p271_p1), %s326_s7, 2 }
   0x5   : > { %s395_s10 = smov (%p35_p0, %s33_s10), 0  ;;  %47 = sbr.rel (%p271_p1) target bundleno = 12 (0xc), region = 16 }
   0x6   : > { %s272_s13 = sshll.u32 (!%p271_p1), %s49_s11, 2  ;;  %s56_s16 = scalar_lea.vmem (!%p271_p1), %s390_s0, %s273_s12 }
   0x7   : > { %v72_v0 = vld [vmem:[%s56_s16] sm:$0xf] (!%p271_p1)  ;;  %s51_s17 = scalar_lea.vmem (!%p271_p1), [#allocation1], %s272_s13 }
   0x8   : > { %73 = vst [vmem:[%s51_s17] sm:$0xf] (!%p271_p1), %v72_v0 }
   0xc PF: > { %p274_p2 = scmp.ge.s32.totalorder %s330_s8, 1  ;;  %p89_p3 = scmp.lt.s32.totalorder %s330_s8, 3 }
   0xe   : > { %p90_p4 = pnand %p274_p2, %p89_p3 }
  0x10   : > { %93 = sbr.rel (%p90_p4) target bundleno = 511 (0x1ff), region = 50 }
  0x17   : > { %s370_s18 = sand.u32 1, %s269_s9   ;;  %v111_v1 = vlaneseq  ;;  %v332_v11 = vmov -1.0   ;;  %s278_s22 = sshll.u32 %s322_s6, 2 }
  0x18   : > { %s275_s19 = sshll.u32 %s370_s18, 2  ;;  %s178_s25 = scalar_lea.vmem %s391_s1, %s278_s22 }
  0x19   : > { %s102_s20 = scalar_lea.vmem [#allocation1], %s275_s19  ;;  %v112_v3 = vand.u32 127, %v111_v1  ;;  %v115_v4 = vshrl.u32 %v111_v1, 7  ;;  %s106_s21 = scalar_lea.vmem [#allocation3], %s275_s19 }
  0x1a   : > { %v109_v2 = vld [vmem:[%s102_s20] sm:$0xf] }
  0x1b   : > { %110 = vst [vmem:[#allocation0] sm:$0xf] %v109_v2  ;;  %vm113_vm0 = vcmp.lt.s32.totalorder %v112_v3, 3  ;;  %vm122_vm1 = vcmp.ge.s32.totalorder %v115_v4, %v112_v3  ;;  %vm117_vm2 = vcmp.eq.s32.totalorder %v115_v4, %v112_v3  ;;  %vm136_vm4 = vcmp.eq.s32.totalorder %v112_v3, 0 }
  0x1c   : > { %vm123_vm3 = vmand %vm122_vm1, %vm113_vm0  ;;  %vm133_vm5 = vcmp.eq.s32.totalorder %v112_v3, %v115_v4  ;;  %v137_v12 = vsel %vm136_vm4, 1.0, %v332_v11  ;;  %vm144_vm6 = vcmp.eq.s32.totalorder %v112_v3, 1  ;;  %vm154_vm7 = vcmp.eq.s32.totalorder %v112_v3, 2 }
  0x1d   : > { %v138_v13 = vsel %vm133_vm5, %v137_v12, 0.0 }
  0x22   : > { %v118_v5 = vld [vmem:[#allocation0] sm:$0xff] }
  0x23   : > { %v119_v6 = vsel %vm117_vm2, %v118_v5, 0.0  ;;  %v124_v7 = vsel %vm123_vm3, %v118_v5, 0.0 }
  0x24   : > { %120 = vadd.xlane.f32.xlu0 %v119_v6 }
  0xb1   : > { %v121_v8 = vpop.xlane.xlu0 %120 }
  0xb2   : > { %306 = vrcp.f32 %v121_v8  ;;  %vm161_vm8 = vweird.f32 %v121_v8 }
  0xbc   : > { %v307_v9 = vpop.eup %306 }
  0xbd   : > { %v126_v10 = vmul.f32 %v307_v9, %v124_v7 }
  0xbf   : > { %127 = vst [vmem:[#allocation4] sm:$0xff] %v126_v10 }
  0xc6   : > { %v140_v14 = vld [vmem:[#allocation4 + $0x1] ss:$0 sm:$0xff]  ;;  %v150_v17 = vld [vmem:[#allocation4 + $0x2] ss:$0 sm:$0xff] }
  0xc7   : > { %v141_v15 = vxor.u32 2147483648, %v140_v14  ;;  %v151_v19 = vxor.u32 2147483648, %v150_v17 }
  0xc9   : > { %v145_v16 = vmul.f32 %v141_v15, %v138_v13 }
  0xcb   : > { %146 = vadd.xlane.f32.xlu0 %v145_v16 }
 0x158   : > { %v147_v18 = vpop.xlane.xlu0 %146 }
 0x159   : > { %v148_v20 = vsel %vm144_vm6, %v147_v18, %v138_v13 }
 0x15a   : > { %v155_v21 = vmul.f32 %v151_v19, %v148_v20 }
 0x15c   : > { %156 = vadd.xlane.f32.xlu1 %v155_v21 }
 0x1e9   : > { %v157_v22 = vpop.xlane.xlu1 %156 }
 0x1ea   : > { %v158_v23 = vsel %vm154_vm7, %v157_v22, %v148_v20 }
 0x1eb   : > { %v160_v24 = vmul.f32 %v307_v9, %v158_v23 }
 0x1ed   : > { %v162_v25 = vsel %vm161_vm8, %v158_v23, %v160_v24 }
 0x1ee   : > { %163 = vst [vmem:[#allocation2] sm:$0xff] %v162_v25 }
 0x1f5   : > { %v167_v26 = vld [vmem:[#allocation2] sm:$0xf] }
 0x1f6   : > { %169 = vst [vmem:[%s106_s21] sm:$0xf] %v167_v26 }
 0x1fd   : > { %v194_v27 = vld [vmem:[%s106_s21] sm:$0xf] }
 0x1fe   : > { %195 = vst [vmem:[%s178_s25] sm:$0xf] %v194_v27 }
 0x1ff PF: > { %s7_s8 = sadd.s32 1, %s330_s8   ;;  %s392_s6 = smov %s326_s7 }
 0x200   : > { %p4_p5 = scmp.ge.s32.totalorder %s7_s8, 4   ;;  %s393_s7 = smov %s395_s10 }
 0x202   :  { %6 = sbr.rel (!%p4_p5) target bundleno = 2 (0x2), region = 112 }

// kernel: custom-call.12
= control target key start
LH: loop header
LB: loop body
LE: loop exit
PB: predicated region body
PF: predicated region fallthrough
CT: control target
= control target key end

     0   :  { %s342_s6 = smov 0   ;;  %s344_s7 = smov 0   ;;  %s389_s0 = inlined_call_operand.vmem [shape: f32[2,1,3,3], index: 0, kind: input, shape index: {}]   ;;  %s390_s1 = inlined_call_operand.vmem [shape: f32[2,1,3,3], index: 1, kind: output, shape index: {}]  }
   0x1   :  { %s346_s8 = smov 0  }
   0x2 LB: > { %s268_s9 = sadd.s32 4294967295, %s329_s8   ;;  %s33_s10 = sadd.s32 1, %s325_s7  ;;  %s329_s8 = sphi %s346_s8, %s7_s8   ;;  %s325_s7 = sphi %s344_s7, %s392_s7   ;;  %s321_s6 = sphi %s342_s6, %s391_s6  }
   0x3   : > { %p35_p0 = scmp.ge.s32.totalorder %s33_s10, 2  ;;  %p270_p1 = scmp.ge.s32.totalorder %s329_s8, 2 }
   0x4   : > { %s49_s11 = sand.u32 (!%p270_p1), 1, %s329_s8   ;;  %s272_s12 = sshll.u32 (!%p270_p1), %s325_s7, 2 }
   0x5   : > { %s394_s10 = smov (%p35_p0, %s33_s10), 0  ;;  %47 = sbr.rel (%p270_p1) target bundleno = 12 (0xc), region = 16 }
   0x6   : > { %s271_s13 = sshll.u32 (!%p270_p1), %s49_s11, 2  ;;  %s56_s16 = scalar_lea.vmem (!%p270_p1), %s389_s0, %s272_s12 }
   0x7   : > { %v72_v0 = vld [vmem:[%s56_s16] sm:$0xf] (!%p270_p1)  ;;  %s51_s17 = scalar_lea.vmem (!%p270_p1), [#allocation1], %s271_s13 }
   0x8   : > { %73 = vst [vmem:[%s51_s17] sm:$0xf] (!%p270_p1), %v72_v0 }
   0xc PF: > { %p273_p2 = scmp.ge.s32.totalorder %s329_s8, 1  ;;  %p89_p3 = scmp.lt.s32.totalorder %s329_s8, 3 }
   0xe   : > { %p90_p4 = pnand %p273_p2, %p89_p3 }
  0x10   : > { %93 = sbr.rel (%p90_p4) target bundleno = 511 (0x1ff), region = 50 }
  0x17   : > { %s369_s18 = sand.u32 1, %s268_s9   ;;  %v111_v1 = vlaneseq  ;;  %v331_v11 = vmov -1.0   ;;  %s277_s22 = sshll.u32 %s321_s6, 2 }
  0x18   : > { %s274_s19 = sshll.u32 %s369_s18, 2  ;;  %s177_s25 = scalar_lea.vmem %s390_s1, %s277_s22 }
  0x19   : > { %s102_s20 = scalar_lea.vmem [#allocation1], %s274_s19  ;;  %v112_v3 = vand.u32 127, %v111_v1  ;;  %v115_v4 = vshrl.u32 %v111_v1, 7  ;;  %s106_s21 = scalar_lea.vmem [#allocation3], %s274_s19 }
  0x1a   : > { %v109_v2 = vld [vmem:[%s102_s20] sm:$0xf] }
  0x1b   : > { %110 = vst [vmem:[#allocation0] sm:$0xf] %v109_v2  ;;  %vm113_vm0 = vcmp.lt.s32.totalorder %v112_v3, 3  ;;  %vm122_vm1 = vcmp.le.s32.totalorder %v115_v4, %v112_v3  ;;  %vm117_vm2 = vcmp.eq.s32.totalorder %v115_v4, %v112_v3  ;;  %vm136_vm4 = vcmp.eq.s32.totalorder %v112_v3, 2 }
  0x1c   : > { %vm123_vm3 = vmand %vm122_vm1, %vm113_vm0  ;;  %vm133_vm5 = vcmp.eq.s32.totalorder %v112_v3, %v115_v4  ;;  %v137_v12 = vsel %vm136_vm4, 1.0, %v331_v11  ;;  %vm144_vm6 = vcmp.eq.s32.totalorder %v112_v3, 1  ;;  %vm153_vm7 = vcmp.eq.s32.totalorder %v112_v3, 0 }
  0x1d   : > { %v138_v13 = vsel %vm133_vm5, %v137_v12, 0.0 }
  0x22   : > { %v118_v5 = vld [vmem:[#allocation0] sm:$0xff] }
  0x23   : > { %v119_v6 = vsel %vm117_vm2, %v118_v5, 0.0  ;;  %v124_v7 = vsel %vm123_vm3, %v118_v5, 0.0 }
  0x24   : > { %120 = vadd.xlane.f32.xlu0 %v119_v6 }
  0xb1   : > { %v121_v8 = vpop.xlane.xlu0 %120 }
  0xb2   : > { %305 = vrcp.f32 %v121_v8  ;;  %vm160_vm8 = vweird.f32 %v121_v8 }
  0xbc   : > { %v306_v9 = vpop.eup %305 }
  0xbd   : > { %v126_v10 = vmul.f32 %v306_v9, %v124_v7 }
  0xbf   : > { %127 = vst [vmem:[#allocation4] sm:$0xff] %v126_v10 }
  0xc6   : > { %v140_v14 = vld [vmem:[#allocation4 + $0x1] ss:$0 sm:$0xff]  ;;  %v149_v17 = vld [vmem:[#allocation4] ss:$0 sm:$0xff] }
  0xc7   : > { %v141_v15 = vxor.u32 2147483648, %v140_v14  ;;  %v150_v19 = vxor.u32 2147483648, %v149_v17 }
  0xc9   : > { %v145_v16 = vmul.f32 %v141_v15, %v138_v13 }
  0xcb   : > { %146 = vadd.xlane.f32.xlu0 %v145_v16 }
 0x158   : > { %v147_v18 = vpop.xlane.xlu0 %146 }
 0x159   : > { %v148_v20 = vsel %vm144_vm6, %v147_v18, %v138_v13 }
 0x15a   : > { %v154_v21 = vmul.f32 %v150_v19, %v148_v20 }
 0x15c   : > { %155 = vadd.xlane.f32.xlu1 %v154_v21 }
 0x1e9   : > { %v156_v22 = vpop.xlane.xlu1 %155 }
 0x1ea   : > { %v157_v23 = vsel %vm153_vm7, %v156_v22, %v148_v20 }
 0x1eb   : > { %v159_v24 = vmul.f32 %v306_v9, %v157_v23 }
 0x1ed   : > { %v161_v25 = vsel %vm160_vm8, %v157_v23, %v159_v24 }
 0x1ee   : > { %162 = vst [vmem:[#allocation2] sm:$0xff] %v161_v25 }
 0x1f5   : > { %v166_v26 = vld [vmem:[#allocation2] sm:$0xf] }
 0x1f6   : > { %168 = vst [vmem:[%s106_s21] sm:$0xf] %v166_v26 }
 0x1fd   : > { %v193_v27 = vld [vmem:[%s106_s21] sm:$0xf] }
 0x1fe   : > { %194 = vst [vmem:[%s177_s25] sm:$0xf] %v193_v27 }
 0x1ff PF: > { %s7_s8 = sadd.s32 1, %s329_s8   ;;  %s391_s6 = smov %s325_s7 }
 0x200   : > { %p4_p5 = scmp.ge.s32.totalorder %s7_s8, 4   ;;  %s392_s7 = smov %s394_s10 }
 0x202   :  { %6 = sbr.rel (!%p4_p5) target bundleno = 2 (0x2), region = 111 }

// kernel: unsup_loss_forward.2
= control target key start
LH: loop header
LB: loop body
LE: loop exit
PB: predicated region body
PF: predicated region fallthrough
CT: control target
= control target key end

     0   :  { %9 = vsyncpa [#allocation3], 0  ;;  %s614_s12 = smov 0   ;;  %s616_s13 = smov 0   ;;  %s747_s0 = inlined_call_operand.vmem [shape: f32[8,12], index: 0, kind: input, shape index: {}]   ;;  %s748_s1 = inlined_call_operand.vmem [shape: f32[2,16,128], index: 1, kind: input, shape index: {}]   ;;  %s749_s2 = inlined_call_operand.vmem [shape: f32[8,16,128], index: 2, kind: output, shape index: {0}]   ;;  %s750_s3 = inlined_call_operand.vmem [shape: f32[8,16,128], index: 3, kind: output, shape index: {1}]  }
   0x1   :  { %s618_s14 = smov 0   ;;  %s620_s15 = smov 0  }
   0x2   :  { %s622_s16 = smov 0  }
   0x3 LB: > { %s453_s17 = sadd.s32 4294967295, %s591_s16   ;;  %s24_s18 = sadd.s32 1, %s583_s14  ;;  %s591_s16 = sphi %s622_s16, %s15_s16   ;;  %s587_s15 = sphi %s620_s15, %s756_s15   ;;  %s583_s14 = sphi %s618_s14, %s755_s14   ;;  %s579_s13 = sphi %s616_s13, %s754_s13   ;;  %s575_s12 = sphi %s614_s12, %s753_s12  }
   0x4   : > { %p25_p0 = scmp.ge.s32.totalorder %s24_s18, 4  ;;  %s27_s19 = sadd.s32 1, %s587_s15 }
   0x5   : > { %p459_p1 = scmp.ge.s32.totalorder %s591_s16, 1  ;;  %p139_p2 = scmp.lt.s32.totalorder %s591_s16, 9 }
   0x6   : > { %s758_s18 = smov (%p25_p0, %s24_s18), 0  ;;  %s760_s19 = smov (!%p25_p0, %s27_s19), %s587_s15 }
   0x7   : > { %p647_p3 = pnand %p459_p1, %p139_p2  ;;  %p29_p4 = scmp.ge.s32.totalorder %s760_s19, 2 }
   0x8   : > { %p651_p5 = scmp.eq.s32.totalorder %s453_s17, 0  ;;  %s152_s24 = sshll.u32 %s747_s0, 4  ;;  %s153_s24 = int_to_ptr.vmem [resolvable:$true] %s152_s24 }
   0x9   : > { %p483_p6 = pneg %p647_p3  ;;  %s762_s19 = smov (%p29_p4, %s760_s19), 0 }
   0xa   : > { %s534_s25 = scalar_lea.vmem %s153_s24, 128  ;;  %p542_p12 = scmp.lt.s32.totalorder %s153_s24, %s153_s24 }
   0xb   : > { %p484_p7 = pnand %p651_p5, %p483_p6  ;;  %p535_p8 = scmp.ne.s32.totalorder %s153_s24, %s534_s25 }
   0xc   : > { %p543_p13 = scmp.lt.s32.totalorder %s534_s25, %s534_s25 }
   0xd   : > { %p536_p9 = pneg %p484_p7 }
   0xe   : > { %p544_p0 = por %p543_p13, %p542_p12 }
   0xf   : > { %p537_p10 = pnand %p536_p9, %p535_p8 }
  0x11   : > { %p538_p11 = pneg %p537_p10 }
  0x13   : > { %p545_p1 = pnand %p544_p0, %p538_p11 }
  0x15   : > { %548 = shalt.err (!%p545_p1)
}
  0x16   : > { %s593_s26 = smov [#allocation2]   ;;  %173 = sbr.rel (%p647_p3) target bundleno = 73 (0x49), region = 28 }
  0x17   : > { %486 = dma.vmem_to_smem (!%p484_p7), %s153_s24, 128, %s593_s26, [#allocation3]  }
  0x1d   : > { %570 = dma.done.wait (%p651_p5), [#allocation3], 128  }
  0x1e   : > { %572 = vsyncadd (%p651_p5), [#allocation3], 4294967168 }
  0x1f   : > { %179 = sfence }
  0x20   : > { %s466_s27 = sshll.u32 %s579_s13, 2  ;;  %p207_p2 = scmp.lt.s32.totalorder %s579_s13, 1  ;;  %v234_v0 = vlaneseq }
  0x21   : > { %s672_s28 = sadd.s32 %s575_s12, %s466_s27 }
  0x22   : > { %s676_s29 = sshll.u32 %s672_s28, 7  ;;  %s764_s13 = smov (!%p207_p2, %s579_s13), 1  ;;  %v238_v1 = vshrl.u32 %v234_v0, 7  ;;  %v235_v2 = vand.u32 127, %v234_v0 }
  0x23   : > { %s244_s30 = sadd.s32 1, %s676_s29  ;;  %s683_s4 = sld [smem:[#allocation2 + %s676_s29]] }
  0x24   : > { %s685_s5 = sld [smem:[#allocation2 + %s244_s30]]  ;;  %s254_s6 = sadd.s32 6, %s676_s29  ;;  %v239_v3 = vadd.s32 8, %v238_v1  ;;  %v236_v4 = vcvt.s32.f32 %v235_v2  ;;  %v240_v5 = vcvt.s32.f32 %v238_v1 }
  0x25   : > { %s255_s7 = sld [smem:[#allocation2 + %s254_s6]]  ;;  %s256_s8 = sadd.s32 7, %s676_s29 }
  0x26   : > { %s257_s9 = sld [smem:[#allocation2 + %s256_s8]]  ;;  %s258_s10 = sadd.s32 8, %s676_s29  ;;  %v241_v6 = vcvt.s32.f32 %v239_v3 }
  0x27   : > { %s690_s11 = sld [smem:[#allocation2 + %s258_s10]]  ;;  %s476_s12 = sshll.u32 %s764_s13, 4 }
  0x28   : > { %s264_s17 = sadd.s32 11, %s676_s29  ;;  %s246_s20 = sadd.s32 2, %s676_s29 }
  0x29   : > { %s695_s21 = sld [smem:[#allocation2 + %s264_s17]]  ;;  %s248_s22 = sadd.s32 3, %s676_s29  ;;  %v266_v10 = vstv %s683_s4 }
  0x2a   : > { %s250_s23 = sadd.s32 4, %s676_s29  ;;  %s249_s24 = sld [smem:[#allocation2 + %s248_s22]]  ;;  %v268_v11 = vstv %s685_s5  ;;  %v267_v17 = vmul.f32 %v266_v10, %v236_v4 }
  0x2b   : > { %v296_v7 = vstv %s255_s7  ;;  %s699_s25 = sld [smem:[#allocation2 + %s250_s23]]  ;;  %s252_s13 = sadd.s32 5, %s676_s29  ;;  %v269_v18 = vmul.f32 %v268_v11, %v240_v5  ;;  %v270_v22 = vmul.f32 %v268_v11, %v241_v6 }
  0x2c   : > { %s701_s26 = sld [smem:[#allocation2 + %s246_s20]]  ;;  %v297_v8 = vmul.f32 %v296_v7, %v236_v4  ;;  %v298_v9 = vstv %s257_s9  ;;  %s211_s6 = scalar_lea.vmem %s748_s1, %s476_s12 }
  0x2d   : > { %v299_v12 = vmul.f32 %v298_v9, %v240_v5  ;;  %s709_s8 = sld [smem:[#allocation2 + %s252_s13]]  ;;  %v303_v13 = vstv %s690_s11  ;;  %v300_v14 = vmul.f32 %v298_v9, %v241_v6  ;;  %v232_v16 = vld [vmem:[%s211_s6] sm:$0xff]  ;;  %v233_v21 = vld [vmem:[%s211_s6 + $0x8] sm:$0xff]  ;;  %s260_s4 = sadd.s32 9, %s676_s29  ;;  %v271_v30 = vadd.f32 %v269_v18, %v267_v17 }
  0x2e   : > { %s262_s5 = sadd.s32 10, %s676_s29  ;;  %s261_s7 = sld [smem:[#allocation2 + %s260_s4]]  ;;  %v272_v35 = vadd.f32 %v270_v22, %v267_v17 }
  0x2f   : > { %v301_v15 = vadd.f32 %v299_v12, %v297_v8  ;;  %v302_v19 = vadd.f32 %v300_v14, %v297_v8  ;;  %v308_v24 = vstv %s695_s21  ;;  %s263_s9 = sld [smem:[#allocation2 + %s262_s5]]  ;;  %p214_p3 = scmp.lt.s32.totalorder %s672_s28, 7 }
  0x30   : > { %v281_v23 = vstv %s249_s24 }
  0x31   : > { %v304_v20 = vadd.f32 %v303_v13, %v301_v15  ;;  %v305_v25 = vadd.f32 %v303_v13, %v302_v19  ;;  %v282_v26 = vmul.f32 %v281_v23, %v236_v4  ;;  %v283_v27 = vstv %s699_s25  ;;  %s766_s28 = smov (!%p214_p3, %s672_s28), 7 }
  0x32   : > { %v284_v29 = vmul.f32 %v283_v27, %v240_v5  ;;  %v273_v31 = vstv %s701_s26  ;;  %v285_v33 = vmul.f32 %v283_v27, %v241_v6  ;;  %s477_s29 = sshll.u32 %s766_s28, 4 }
  0x33   : > { %v306_v28 = vmul.f32 %v304_v20, %v232_v16  ;;  %v307_v32 = vmul.f32 %v305_v25, %v233_v21  ;;  %v288_v37 = vstv %s709_s8  ;;  %v274_v40 = vadd.f32 %v273_v31, %v271_v30  ;;  %s218_s12 = scalar_lea.vmem %s749_s2, %s477_s29  ;;  %s227_s21 = scalar_lea.vmem %s750_s3, %s477_s29 }
  0x34   : > { %v286_v36 = vadd.f32 %v284_v29, %v282_v26  ;;  %v287_v39 = vadd.f32 %v285_v33, %v282_v26  ;;  %v275_v43 = vadd.f32 %v273_v31, %v272_v35  ;;  %v278_v48 = vstv %s261_s7 }
  0x35   : > { %v309_v34 = vadd.f32 %v308_v24, %v306_v28  ;;  %v310_v38 = vadd.f32 %v308_v24, %v307_v32  ;;  %v276_v46 = vmul.f32 %v274_v40, %v232_v16  ;;  %v293_v50 = vstv %s263_s9 }
  0x36   : > { %v289_v42 = vadd.f32 %v288_v37, %v286_v36  ;;  %v290_v45 = vadd.f32 %v288_v37, %v287_v39  ;;  %v277_v49 = vmul.f32 %v275_v43, %v233_v21 }
  0x37   : > { %vm311_vm0 = vcmp.gt.f32.partialorder %v309_v34, 1e-06  ;;  %vm312_vm1 = vcmp.gt.f32.partialorder %v310_v38, 1e-06  ;;  %v279_v52 = vadd.f32 %v278_v48, %v276_v46 }
  0x38   : > { %v313_v41 = vsel %vm311_vm0, %v309_v34, 1.0  ;;  %v314_v44 = vsel %vm312_vm1, %v310_v38, 1.0  ;;  %v291_v47 = vmul.f32 %v289_v42, %v232_v16  ;;  %v292_v51 = vmul.f32 %v290_v45, %v233_v21 }
  0x39   : > { %530 = vrcp.f32 %v313_v41  ;;  %v280_v54 = vadd.f32 %v278_v48, %v277_v49 }
  0x3a   : > { %532 = vrcp.f32 %v314_v44  ;;  %v294_v53 = vadd.f32 %v293_v50, %v291_v47  ;;  %v295_v55 = vadd.f32 %v293_v50, %v292_v51 }
  0x43   : > { %v531_v56 = vpop.eup %530 }
  0x44   : > { %v533_v57 = vpop.eup %532  ;;  %v317_v58 = vmul.f32 %v531_v56, %v279_v52  ;;  %v323_v59 = vmul.f32 %v531_v56, %v294_v53 }
  0x45   : > { %v318_v60 = vmul.f32 %v533_v57, %v280_v54  ;;  %v324_v61 = vmul.f32 %v533_v57, %v295_v55 }
  0x46   : > { %v319_v62 = vsel %vm311_vm0, %v317_v58, -2.0  ;;  %v325_v63 = vsel %vm311_vm0, %v323_v59, -2.0 }
  0x47   : > { %321 = vst [vmem:[%s218_s12] sm:$0xff] %v319_v62  ;;  %v320_v0 = vsel %vm312_vm1, %v318_v60, -2.0  ;;  %327 = vst [vmem:[%s227_s21] sm:$0xff] %v325_v63  ;;  %v326_v1 = vsel %vm312_vm1, %v324_v61, -2.0 }
  0x48   : > { %322 = vst [vmem:[%s218_s12 + $0x8] sm:$0xff] %v320_v0  ;;  %328 = vst [vmem:[%s227_s21 + $0x8] sm:$0xff] %v326_v1 }
  0x49 PF: > { %s15_s16 = sadd.s32 1, %s591_s16   ;;  %s753_s12 = smov %s583_s14 }
  0x4a   : > { %p12_p4 = scmp.ge.s32.totalorder %s15_s16, 10   ;;  %s754_s13 = smov %s587_s15 }
  0x4b   : > { %s755_s14 = smov %s758_s18  ;;  %s756_s15 = smov %s762_s19 }
  0x4c   :  { %14 = sbr.rel (!%p12_p4) target bundleno = 3 (0x3), region = 75 }
  0x53   :  { %378 = vsyncpa [#allocation3], 1 }
  0x54   :  { %380 = vsyncpa [#allocation3 + $0x1], 1 }

// kernel: unsup_loss_forward.3
= control target key start
LH: loop header
LB: loop body
LE: loop exit
PB: predicated region body
PF: predicated region fallthrough
CT: control target
= control target key end

     0   :  { %s3143_s0 = inlined_call_operand.hbm [shape: f32[8,3,16,128], index: 0, kind: input, shape index: {}]   ;;  %s3144_s1 = inlined_call_operand.hbm [shape: f32[8,16,128], index: 1, kind: input, shape index: {}]   ;;  %s3145_s2 = inlined_call_operand.hbm [shape: f32[2,3,16,128], index: 2, kind: input, shape index: {}]   ;;  %s3146_s3 = inlined_call_operand.hbm [shape: f32[2,16,128], index: 3, kind: input, shape index: {}]   ;;  %s3147_s4 = inlined_call_operand.hbm [shape: f32[2,1,128], index: 4, kind: output, shape index: {}]  }
   0x1   :  { %3181 = sst [smem:[#allocation39_spill]] %s3143_s0 }
   0x2   :  { %3182 = sst [smem:[#allocation40_spill]] %s3144_s1 }
   0x3   :  { %3183 = sst [smem:[#allocation41_spill]] %s3145_s2 }
   0x4   :  { %9 = vsyncpa [#allocation9], 0 }
   0x5   :  { %11 = vsyncpa [#allocation9 + $0x1], 0 }
   0x6   :  { %12 = vsyncpa [#allocation12], 0 }
   0x7   :  { %14 = vsyncpa [#allocation12 + $0x1], 0 }
   0x8   :  { %15 = vsyncpa [#allocation15], 0 }
   0x9   :  { %17 = vsyncpa [#allocation15 + $0x1], 0 }
   0xa   :  { %18 = vsyncpa [#allocation10], 0 }
   0xb   :  { %20 = vsyncpa [#allocation10 + $0x1], 0  ;;  %s2028_s15 = smov 0   ;;  %s2030_s16 = smov 0  }
   0xc   :  { %s2032_s17 = smov 0   ;;  %s2034_s18 = smov 0  }
   0xd   :  { %s2036_s19 = smov 0   ;;  %s2038_s20 = smov 0  }
   0xe   :  { %s2040_s21 = smov 0   ;;  %s2042_s22 = smov 0  }
   0xf   :  { %s2044_s23 = smov 0   ;;  %s2046_s24 = smov 0  }
  0x10   :  { %s2048_s25 = smov 0  }
  0x11 LB: > { %3184 = sst [smem:[#allocation22_spill]] %s1953_s17  ;;  %s2082_s26 = sadd.s32 4294967295, %s1985_s25   ;;  %s1985_s25 = sphi %s2048_s25, %s26_s25   ;;  %s1981_s24 = sphi %s2046_s24, %s3246_s24   ;;  %s1977_s23 = sphi %s2044_s23, %s3237_s23   ;;  %s1973_s22 = sphi %s2042_s22, %s3245_s22   ;;  %s1969_s21 = sphi %s2040_s21, %s3244_s21   ;;  %s1965_s20 = sphi %s2038_s20, %s3243_s20   ;;  %s1961_s19 = sphi %s2036_s19, %s3242_s19   ;;  %s1957_s18 = sphi %s2034_s18, %s3241_s18   ;;  %s1953_s17 = sphi %s2032_s17, %s3233_s17   ;;  %s1949_s16 = sphi %s2030_s16, %s3240_s16   ;;  %s1945_s15 = sphi %s2028_s15, %s3239_s15  }
  0x12   : > { %3185 = sst [smem:[#allocation23_spill]] %s1965_s20  ;;  %s35_s27 = sadd.s32 1, %s1977_s23 }
  0x13   : > { %3186 = sst [smem:[#allocation24_spill]] %s1977_s23  ;;  %p36_p0 = scmp.ge.s32.totalorder %s35_s27, 4 }
  0x14   : > { %s38_s28 = sadd.s32 1, %s1981_s24  ;;  %s1531_s29 = sshll.u32 %s1981_s24, 2 }
  0x15   : > { %s49_s30 = sadd.s32 1, %s1965_s20  ;;  %s3248_s27 = smov (%p36_p0, %s35_s27), 0 }
  0x16   : > { %3187 = sst [smem:[#allocation25_spill]] %s3248_s27  ;;  %s3250_s28 = smov (!%p36_p0, %s38_s28), %s1981_s24 }
  0x17   : > { %s2092_s5 = sadd.s32 %s1977_s23, %s1531_s29  ;;  %p56_p1 = scmp.ne.s32.totalorder %s1965_s20, %s1961_s19 }
  0x18   : > { %p40_p2 = scmp.ge.s32.totalorder %s3250_s28, 2  ;;  %p3153_p3 = scmp.eq.s32.totalorder %s1985_s25, 0 }
  0x19   : > { %p62_p4 = scmp.ne.s32.totalorder %s1961_s19, %s1957_s18  ;;  %p3152_p5 = scmp.eq.s32.totalorder %s2082_s26, 0 }
  0x1a   : > { %s3252_s28 = smov (%p40_p2, %s3250_s28), 0  ;;  %p58_p6 = por %p3153_p3, %p56_p1 }
  0x1b   : > { %3188 = sst [smem:[#allocation26_spill]] %s3252_s28  ;;  %p2105_p7 = por %p3152_p5, %p62_p4 }
  0x1c   : > { %s1532_s7 = sshll.u32 %s3252_s28, 2  ;;  %s102_s8 = ssub.s32 %s1981_s24, %s3252_s28 }
  0x1d   : > { %s3189_s6 = scalar_select %p2105_p7, 1, 0 }
  0x1e   : > { %s45_s9 = sadd.s32 %s1532_s7, %s3248_s27  ;;  %p2113_p8 = scmp.eq.s32.totalorder %s102_s8, 0 }
  0x1f   : > { %s46_s11 = ssub.s32 %s2092_s5, %s45_s9  ;;  %p3151_p10 = scmp.lt.s32.totalorder %s1985_s25, 8 }
  0x20   : > { %p47_p9 = scmp.eq.s32.totalorder %s46_s11, 0  ;;  %s2120_s12 = sand.u32 1, %s1965_s20  }
  0x21   : > { %p2127_p11 = pnand %p3151_p10, %p58_p6  ;;  %s217_s18 = sand.u32 1, %s1985_s25  }
  0x22   : > { %s2123_s13 = scalar_select %p47_p9, %s1965_s20, %s49_s30  }
  0x23   : > { %s1539_s29 = sshll.u32 %s2120_s12, 4  ;;  %s1563_s7 = sshll.u32 %s2092_s5, 8 }
  0x24   : > { %3191 = sst [smem:[#allocation27_spill]] %s2123_s13  ;;  %s3193_s1 = sld [smem:[#allocation40_spill]] }
  0x25   : > { %s221_s30 = scalar_lea.vmem [#allocation11], %s1539_s29  ;;  %s2142_s27 = scalar_lea.sflag [#allocation12], %s217_s18 }
  0x26   : > { %s230_s11 = sshll.u32 %s221_s30, 4  ;;  %p1733_p0 = pneg %p2127_p11  ;;  %s2139_s11 = int_to_ptr.vmem [resolvable:$true] %s230_s11 }
  0x2a   : > { %s2137_s9 = scalar_lea.hbm %s3193_s1, %s1563_s7  ;;  %s1736_s8 = scalar_lea.hbm %s3193_s1, 2048 }
  0x2b   : > { %s1731_s23 = scalar_lea.hbm %s2137_s9, 256  ;;  %p1737_p4 = scmp.lt.u32.totalorder %s2137_s9, %s3193_s1 }
  0x2c   : > { %p1732_p13 = scmp.ne.s32.totalorder %s2137_s9, %s1731_s23  ;;  %p1738_p6 = scmp.lt.u32.totalorder %s1736_s8, %s1731_s23 }
  0x2d   : > { %p1740_p10 = scmp.lt.u32.totalorder %s1731_s23, %s2137_s9 }
  0x2e   : > { %p1734_p1 = pnand %p1733_p0, %p1732_p13  ;;  %p1739_p9 = por %p1738_p6, %p1737_p4 }
  0x30   : > { %p1735_p2 = pneg %p1734_p1  ;;  %p1741_p5 = por %p1740_p10, %p1739_p9 }
  0x32   : > { %p1742_p3 = pnand %p1741_p5, %p1735_p2 }
  0x34   : > { %1745 = shalt.err (!%p1742_p3)
}
  0x35   : > { %s1746_s18 = scalar_lea.vmem %s2139_s11, 256  ;;  %s1987_s30 = smov [#allocation11]  }
  0x36   : > { %p1747_p13 = scmp.ne.s32.totalorder %s2139_s11, %s1746_s18  ;;  %s1751_s28 = sshll.u32 %s1987_s30, 4  ;;  %s1752_s28 = int_to_ptr.vmem [resolvable:$false] %s1751_s28 }
  0x37   : > { %s1753_s13 = scalar_lea.vmem %s1752_s28, 512  ;;  %p1754_p7 = scmp.lt.s32.totalorder %s2139_s11, %s1752_s28 }
  0x38   : > { %p1749_p1 = pnand %p1747_p13, %p1733_p0  ;;  %p1755_p4 = scmp.lt.s32.totalorder %s1753_s13, %s1746_s18 }
  0x3a   : > { %p1750_p12 = pneg %p1749_p1  ;;  %p1756_p6 = por %p1755_p4, %p1754_p7 }
  0x3c   : > { %p1757_p10 = pnand %p1756_p6, %p1750_p12 }
  0x3e   : > { %1760 = shalt.err (!%p1757_p10)
}
  0x3f   : > { %s3156_s23 = smov 128   ;;  %s3158_s7 = smov 8  }
  0x40   : > { %1599 = dma.hbm_to_vmem [thread:$0]  (!%p2127_p11), %s2137_s9, 256, %s2139_s11, %s2142_s27, %s3156_s23, %s3156_s23, %s3158_s7  }
  0x41   : > { %p280_p3 = scmp.lt.s32.totalorder %s1985_s25, 9  ;;  %p3194_p5 = scmp.ge.s32.totalorder %s1985_s25, 1 }
  0x42   : > { %s1565_s29 = smul.u32 48, %s2120_s12  ;;  %s3196_s0 = sld [smem:[#allocation39_spill]] }
  0x43   : > { %p2176_p7 = pnand %p3194_p5, %p280_p3  ;;  %s1566_s18 = smul.u32 768, %s2092_s5 }
  0x44   : > { %s198_s1 = scalar_lea.vmem [#allocation8], %s1565_s29  ;;  %s195_s9 = scalar_lea.sflag [#allocation9], %s2120_s12 }
  0x45   : > { %s3195_s8 = scalar_select %p2176_p7, 1, 0 }
  0x46   : > { %s207_s20 = sshll.u32 %s198_s1, 4  ;;  %s2187_s20 = int_to_ptr.vmem [resolvable:$true] %s207_s20 }
  0x48   : > { %s2185_s13 = scalar_lea.hbm %s3196_s0, %s1566_s18  ;;  %s1766_s18 = scalar_lea.hbm %s3196_s0, 6144 }
  0x49   : > { %s1761_s11 = scalar_lea.hbm %s2185_s13, 768  ;;  %p1767_p13 = scmp.lt.u32.totalorder %s2185_s13, %s3196_s0 }
  0x4a   : > { %p1762_p12 = scmp.ne.s32.totalorder %s2185_s13, %s1761_s11  ;;  %p1768_p1 = scmp.lt.u32.totalorder %s1766_s18, %s1761_s11 }
  0x4b   : > { %p1770_p6 = scmp.lt.u32.totalorder %s1761_s11, %s2185_s13 }
  0x4c   : > { %p1764_p2 = pnand %p1762_p12, %p1733_p0  ;;  %p1769_p4 = por %p1768_p1, %p1767_p13 }
  0x4e   : > { %p1765_p9 = pneg %p1764_p2  ;;  %p1771_p10 = por %p1770_p6, %p1769_p4 }
  0x50   : > { %p1772_p3 = pnand %p1771_p10, %p1765_p9 }
  0x52   : > { %1775 = shalt.err (!%p1772_p3)
}
  0x53   : > { %s1776_s1 = scalar_lea.vmem %s2187_s20, 768  ;;  %s1990_s23 = smov [#allocation8]  }
  0x54   : > { %p1777_p5 = scmp.ne.s32.totalorder %s2187_s20, %s1776_s1  ;;  %s1781_s29 = sshll.u32 %s1990_s23, 4  ;;  %s1782_s29 = int_to_ptr.vmem [resolvable:$false] %s1781_s29 }
  0x55   : > { %s1783_s5 = scalar_lea.vmem %s1782_s29, 1536  ;;  %p1784_p7 = scmp.lt.s32.totalorder %s2187_s20, %s1782_s29 }
  0x56   : > { %p1779_p12 = pnand %p1777_p5, %p1733_p0  ;;  %p1785_p13 = scmp.lt.s32.totalorder %s1783_s5, %s1776_s1 }
  0x58   : > { %p1780_p2 = pneg %p1779_p12  ;;  %p1786_p1 = por %p1785_p13, %p1784_p7 }
  0x5a   : > { %p1787_p4 = pnand %p1786_p1, %p1780_p2 }
  0x5c   : > { %1790 = shalt.err (!%p1787_p4)
}
  0x5d   : > { %s3197_s11 = smov 128   ;;  %s1530_s14 = sadd.s32 4294967294, %s1985_s25  }
  0x5e   : > { %1596 = dma.hbm_to_vmem [thread:$0]  (!%p2127_p11), %s2185_s13, 768, %s2187_s20, %s195_s9, %s3197_s11, %s3197_s11, %s3158_s7  }
  0x5f   : > { %s105_s18 = sadd.s32 1, %s1953_s17  ;;  %p112_p0 = scmp.ne.s32.totalorder %s1953_s17, %s1949_s16 }
  0x60   : > { %s2225_s12 = scalar_select %p2113_p8, %s1953_s17, %s105_s18  }
  0x61   : > { %p3199_p7 = scmp.eq.s32.totalorder %s1985_s25, 0  ;;  %p118_p6 = scmp.ne.s32.totalorder %s1949_s16, %s1945_s15 }
  0x62   : > { %3198 = sst [smem:[#allocation28_spill]] %s2225_s12  ;;  %p168_p10 = scmp.eq.s32.totalorder %s2082_s26, 7 }
  0x63   : > { %p114_p9 = por %p112_p0, %p3199_p7  ;;  %p174_p3 = scmp.eq.s32.totalorder %s1530_s14, 7 }
  0x64   : > { %p3200_p5 = scmp.eq.s32.totalorder %s2082_s26, 0  ;;  %s2239_s28 = sand.u32 1, %s1953_s17  }
  0x65   : > { %p2241_p11 = por %p168_p10, %p112_p0  ;;  %p2245_p8 = por %p174_p3, %p118_p6 }
  0x66   : > { %p2234_p12 = por %p118_p6, %p3200_p5  ;;  %s1567_s13 = smul.u32 48, %s2239_s28 }
  0x67   : > { %s3202_s20 = scalar_select %p2241_p11, 1, 0 }
  0x68   : > { %s3203_s10 = scalar_select %p2245_p8, 1, 0 }
  0x69   : > { %p3204_p2 = scmp.lt.s32.totalorder %s1985_s25, 8  ;;  %s1568_s1 = smul.u32 768, %s1981_s24 }
  0x6a   : > { %s3206_s2 = sld [smem:[#allocation41_spill]]  ;;  %s244_s14 = scalar_lea.vmem [#allocation13], %s1567_s13 }
  0x6b   : > { %p2252_p13 = pnand %p3204_p2, %p114_p9  ;;  %s251_s18 = sshll.u32 %s244_s14, 4  ;;  %s2262_s18 = int_to_ptr.vmem [resolvable:$true] %s251_s18 }
  0x6c   : > { %s1544_s7 = sshll.u32 %s2239_s28, 4 }
  0x6d   : > { %p1793_p4 = pneg %p2252_p13 }
  0x70   : > { %s2260_s5 = scalar_lea.hbm %s3206_s2, %s1568_s1  ;;  %s1796_s29 = scalar_lea.hbm %s3206_s2, 1536 }
  0x71   : > { %s1791_s0 = scalar_lea.hbm %s2260_s5, 768  ;;  %p1797_p9 = scmp.lt.u32.totalorder %s2260_s5, %s3206_s2 }
  0x72   : > { %p1792_p1 = scmp.ne.s32.totalorder %s2260_s5, %s1791_s0  ;;  %p1798_p6 = scmp.lt.u32.totalorder %s1796_s29, %s1791_s0 }
  0x73   : > { %p1800_p3 = scmp.lt.u32.totalorder %s1791_s0, %s2260_s5 }
  0x74   : > { %p1794_p0 = pnand %p1793_p4, %p1792_p1  ;;  %p1799_p10 = por %p1798_p6, %p1797_p9 }
  0x76   : > { %p1795_p7 = pneg %p1794_p0  ;;  %p1801_p5 = por %p1800_p3, %p1799_p10 }
  0x78   : > { %p1802_p2 = pnand %p1801_p5, %p1795_p7 }
  0x7a   : > { %1805 = shalt.err (!%p1802_p2)
}
  0x7b   : > { %s1806_s13 = scalar_lea.vmem %s2262_s18, 768  ;;  %s1991_s14 = smov [#allocation13]  }
  0x7c   : > { %p1807_p1 = scmp.ne.s32.totalorder %s2262_s18, %s1806_s13  ;;  %s1811_s23 = sshll.u32 %s1991_s14, 4  ;;  %s1812_s23 = int_to_ptr.vmem [resolvable:$false] %s1811_s23 }
  0x7d   : > { %s1813_s17 = scalar_lea.vmem %s1812_s23, 1536  ;;  %p1814_p11 = scmp.lt.s32.totalorder %s2262_s18, %s1812_s23 }
  0x7e   : > { %p1809_p0 = pnand %p1807_p1, %p1793_p4  ;;  %p1815_p9 = scmp.lt.s32.totalorder %s1813_s17, %s1806_s13 }
  0x80   : > { %p1810_p8 = pneg %p1809_p0  ;;  %p1816_p6 = por %p1815_p9, %p1814_p11 }
  0x82   : > { %p1817_p10 = pnand %p1816_p6, %p1810_p8 }
  0x84   : > { %1820 = shalt.err (!%p1817_p10)
}
  0x85   : > { %s3207_s0 = smov 8   ;;  %s1564_s12 = sshll.u32 %s1981_s24, 8 }
  0x86   : > { %1602 = dma.hbm_to_vmem [thread:$0]  (!%p2252_p13), %s2260_s5, 768, %s2262_s18, %s2142_s27, %s3197_s11, %s3197_s11, %s3207_s0  }
  0x87   : > { %s2298_s13 = scalar_lea.hbm %s3146_s3, %s1564_s12  ;;  %s265_s14 = scalar_lea.vmem [#allocation14], %s1544_s7 }
  0x88   : > { %s272_s23 = sshll.u32 %s265_s14, 4  ;;  %s262_s17 = scalar_lea.sflag [#allocation15], %s2239_s28  ;;  %s2302_s23 = int_to_ptr.vmem [resolvable:$true] %s272_s23 }
  0x89   : > { %s1821_s2 = scalar_lea.hbm %s2298_s13, 256  ;;  %s1826_s18 = scalar_lea.hbm %s3146_s3, 512 }
  0x8a   : > { %p1822_p11 = scmp.ne.s32.totalorder %s2298_s13, %s1821_s2  ;;  %p1827_p3 = scmp.lt.u32.totalorder %s2298_s13, %s3146_s3 }
  0x8b   : > { %p1828_p5 = scmp.lt.u32.totalorder %s1826_s18, %s1821_s2  ;;  %p1830_p1 = scmp.lt.u32.totalorder %s1821_s2, %s2298_s13 }
  0x8c   : > { %p1824_p8 = pnand %p1822_p11, %p1793_p4 }
  0x8d   : > { %p1829_p2 = por %p1828_p5, %p1827_p3 }
  0x8e   : > { %p1825_p7 = pneg %p1824_p8 }
  0x8f   : > { %p1831_p0 = por %p1830_p1, %p1829_p2 }
  0x91   : > { %p1832_p9 = pnand %p1831_p0, %p1825_p7 }
  0x93   : > { %1835 = shalt.err (!%p1832_p9)
}
  0x94   : > { %s1836_s7 = scalar_lea.vmem %s2302_s23, 256  ;;  %s1992_s29 = smov [#allocation14]  }
  0x95   : > { %p1837_p6 = scmp.ne.s32.totalorder %s2302_s23, %s1836_s7  ;;  %s1841_s14 = sshll.u32 %s1992_s29, 4  ;;  %s1842_s14 = int_to_ptr.vmem [resolvable:$false] %s1841_s14 }
  0x96   : > { %s1843_s27 = scalar_lea.vmem %s1842_s14, 512  ;;  %p1844_p8 = scmp.lt.s32.totalorder %s2302_s23, %s1842_s14 }
  0x97   : > { %p1839_p10 = pnand %p1837_p6, %p1793_p4  ;;  %p1845_p3 = scmp.lt.s32.totalorder %s1843_s27, %s1836_s7 }
  0x99   : > { %p1840_p11 = pneg %p1839_p10  ;;  %p1846_p5 = por %p1845_p3, %p1844_p8 }
  0x9b   : > { %p1847_p2 = pnand %p1846_p5, %p1840_p11 }
  0x9d   : > { %1850 = shalt.err (!%p1847_p2)
}
  0x9e   : > { %1605 = dma.hbm_to_vmem [thread:$0]  (!%p2252_p13), %s2298_s13, 256, %s2302_s23, %s262_s17, %s3197_s11, %s3197_s11, %s3207_s0  }
  0x9f   : > { %p3208_p4 = scmp.ne.s32.totalorder %s3195_s8, 0 }
  0xa1   : > { %284 = sbr.rel (%p3208_p4) target bundleno = 1538 (0x602), region = 36 }
  0xa8   : > { %s286_s2 = sand.u32 1, %s1961_s19   ;;  %p3209_p7 = scmp.ne.s32.totalorder %s3189_s6, 0 }
  0xa9   : > { %s1569_s5 = smul.u32 48, %s286_s2  ;;  %s287_s18 = scalar_lea.sflag [#allocation9], %s286_s2 }
  0xab   : > { %s2336_s12 = scalar_lea.vmem [#allocation8], %s1569_s5 }
  0xac   : > { %1924 = dma.done.wait (%p3209_p7), %s287_s18, 768  }
  0xad   : > { %1926 = vsyncadd (%p3209_p7), %s287_s18, 4294966528  ;;  %s295_s28 = sand.u32 1, %s2082_s26   ;;  %s1548_s9 = sshll.u32 %s286_s2, 4 }
  0xae   : > { %s296_s11 = scalar_lea.sflag [#allocation12], %s295_s28  ;;  %s2343_s0 = scalar_lea.vmem [#allocation11], %s1548_s9 }
  0xaf   : > { %1928 = dma.done.wait (%p3209_p7), %s296_s11, 256  }
  0xb0   : > { %1930 = vsyncadd (%p3209_p7), %s296_s11, 4294967040  ;;  %s2350_s8 = sand.u32 1, %s1949_s16  }
  0xb1   : > { %s1570_s13 = smul.u32 48, %s2350_s8 }
  0xb3   : > { %s2353_s23 = scalar_lea.vmem [#allocation13], %s1570_s13 }
  0xb4   : > { %1932 = dma.done.wait (%p2234_p12), %s296_s11, 768  }
  0xb5   : > { %1934 = vsyncadd (%p2234_p12), %s296_s11, 4294966528  ;;  %s1549_s26 = sshll.u32 %s2350_s8, 4  ;;  %s314_s17 = scalar_lea.sflag [#allocation15], %s2350_s8 }
  0xb6   : > { %s2361_s6 = scalar_lea.vmem [#allocation14], %s1549_s26 }
  0xb7   : > { %1936 = dma.done.wait (%p2234_p12), %s314_s17, 256  }
  0xb8   : > { %1938 = vsyncadd (%p2234_p12), %s314_s17, 4294967040  ;;  %v360_v0 = vlaneseq  ;;  %v1993_v4 = vmov 0.0   ;;  %v2384_v6 = vld [vmem:[%s2336_s12] sm:$0xff]  ;;  %v2387_v7 = vld [vmem:[%s2336_s12 + $0x8] sm:$0xff]  ;;  %s355_s30 = scalar_lea.vmem [#allocation16], %s2350_s8  ;;  %p1554_p12 = scmp.ne.s32.totalorder %s1969_s21, 0 }
  0xb9   : > { %v2390_v8 = vld [vmem:[%s2336_s12 + $0x10] sm:$0xff]  ;;  %v2398_v11 = vld [vmem:[%s2336_s12 + $0x18] sm:$0xff]  ;;  %v2401_v12 = vld [vmem:[%s2336_s12 + $0x20] sm:$0xff]  ;;  %s1994_s1 = smov (!%p1554_p12), 1   ;;  %s1995_s7 = smov (!%p1554_p12), 127  }
  0xba   : > { %v2367_v1 = vshrl.u32 %v360_v0, 7  ;;  %v2369_v2 = vand.u32 127, %v360_v0  ;;  %v2404_v13 = vld [vmem:[%s2336_s12 + $0x28] sm:$0xff]  ;;  %v2407_v14 = vld [vmem:[%s2343_s0] sm:$0xff]  ;;  %v2419_v18 = vld [vmem:[%s2353_s23 + $0x10] sm:$0xff]  ;;  %s1997_s29 = smov (!%p1554_p12), 0.0  }
  0xbb   : > { %v2410_v15 = vld [vmem:[%s2343_s0 + $0x8] sm:$0xff]  ;;  %v2413_v16 = vld [vmem:[%s2353_s23] sm:$0xff]  ;;  %3216 = vst [vmem:[#allocation35_spill] sm:$0xff] %v2419_v18  ;;  %v2422_v19 = vld [vmem:[%s2353_s23 + $0x18] sm:$0xff]  ;;  %v471_v23 = vrot.slane (!%p1554_p12), %v2419_v18, 7  ;;  %v477_v25 = vrot.slane (!%p1554_p12), %v2419_v18, 1  ;;  %v498_v58 = vmul.f32 (!%p1554_p12), %v2419_v18, %v2419_v18 }
  0xbc   : > { %3210 = vst [vmem:[#allocation29_spill] sm:$0xff] %v2367_v1  ;;  %3211 = vst [vmem:[#allocation30_spill] sm:$0xff] %v2369_v2  ;;  %v362_v3 = vadd.s32 8, %v2367_v1  ;;  %vm365_vm0 = vcmp.lt.s32.totalorder %v2369_v2, 127  ;;  %vm374_vm1 = vcmp.ge.s32.totalorder %v2367_v1, 1  ;;  %vm378_vm2 = vcmp.ge.s32.totalorder %v2369_v2, 1 }
  0xbd   : > { %v2377_v5 = vsel %vm365_vm0, 1.0, %v1993_v4  ;;  %vm379_vm3 = vmand %vm374_vm1, %vm378_vm2  ;;  %3214 = vst [vmem:[#allocation33_spill] sm:$0xff] %v2413_v16  ;;  %v2416_v17 = vld [vmem:[%s2353_s23 + $0x8] sm:$0xff]  ;;  %v2425_v20 = vld [vmem:[%s2353_s23 + $0x20] sm:$0xff]  ;;  %404 = sbr.rel (%p1554_p12) target bundleno = 360 (0x168), region = 56  ;;  %vm417_vm8 = vcmp.lt.s32.totalorder (!%p1554_p12), %v2367_v1, 1  ;;  %v443_v32 = vmul.f32 (!%p1554_p12), %v2413_v16, %v2413_v16  ;;  %v499_v59 = vmul.f32 (!%p1554_p12), %v2422_v19, %v2422_v19 }
  0xbe   : > { %3212 = vst [vmem:[#allocation31_spill] sm:$0xff] %v2377_v5  ;;  %vm369_vm4 = vcmp.lt.s32.totalorder %v362_v3, 15  ;;  %vm381_vm5 = vmand %vm379_vm3, %vm365_vm0  ;;  %v2428_v21 = vld [vmem:[%s2353_s23 + $0x28] sm:$0xff]  ;;  %vm424_vm9 = vcmp.lt.s32.totalorder (!%p1554_p12), %v2367_v1, 7  ;;  %v472_v24 = vrot.slane (!%p1554_p12), %v2422_v19, 7  ;;  %v478_v26 = vrot.slane (!%p1554_p12), %v2422_v19, 1 }
  0xbf   : > { %v2393_v9 = vsel %vm369_vm4, 1.0, %v1993_v4  ;;  %v2395_v10 = vsel %vm381_vm5, 1.0, %v1993_v4  ;;  %3215 = vst [vmem:[#allocation34_spill] sm:$0xff] %v2416_v17  ;;  %3217 = vst [vmem:[#allocation36_spill] sm:$0xff] %v2422_v19  ;;  %v415_v27 = vrot.slane (!%p1554_p12), %v2413_v16, 7  ;;  %v416_v28 = vrot.slane (!%p1554_p12), %v2416_v17, 7 }
  0xc0   : > { %3213 = vst [vmem:[#allocation32_spill] sm:$0xff] %v2393_v9  ;;  %3218 = vst [vmem:[#allocation37_spill] sm:$0xff] %v2425_v20  ;;  %v473_v29 = vsel (!%p1554_p12), %vm417_vm8, %v471_v23, %v472_v24  ;;  %v422_v30 = vrot.slane (!%p1554_p12), %v2413_v16, 1  ;;  %v423_v31 = vrot.slane (!%p1554_p12), %v2416_v17, 1  ;;  %v480_v34 = vsel (!%p1554_p12), %vm424_vm9, %v478_v26, %v477_v25  ;;  %412 = sst [smem:[#allocation7]] (!%p1554_p12), %s1997_s29 }
  0xc1   : > { %3219 = vst [vmem:[#allocation38_spill] sm:$0xff] %v2428_v21  ;;  %vm380_vm6 = vmand %vm369_vm4, %vm378_vm2  ;;  %v476_v33 = vadd.f32 (!%p1554_p12), %v473_v29, %v2422_v19  ;;  %v419_v35 = vsel (!%p1554_p12), %vm417_vm8, %v416_v28, %v415_v27  ;;  %v444_v36 = vmul.f32 (!%p1554_p12), %v2416_v17, %v2416_v17  ;;  %v445_v39 = vrot.slane (!%p1554_p12), %v443_v32, 7  ;;  %414 = sst [smem:[#allocation7 + $0x1]] (!%p1554_p12), %s1997_s29 }
  0xc2   : > { %vm382_vm7 = vmand %vm380_vm6, %vm365_vm0  ;;  %v420_v37 = vadd.f32 (!%p1554_p12), %v419_v35, %v2413_v16  ;;  %v425_v38 = vsel (!%p1554_p12), %vm424_vm9, %v422_v30, %v423_v31  ;;  %v451_v40 = vrot.slane (!%p1554_p12), %v443_v32, 1  ;;  %v418_v44 = vsel (!%p1554_p12), %vm417_vm8, %v415_v27, %v416_v28 }
  0xc3   : > { %v2435_v22 = vsel %vm382_vm7, 1.0, %v1993_v4  ;;  %v2465_v41 = vadd.f32 (!%p1554_p12), %v480_v34, %v476_v33  ;;  %v446_v42 = vrot.slane (!%p1554_p12), %v444_v36, 7  ;;  %v452_v43 = vrot.slane (!%p1554_p12), %v444_v36, 1 }
  0xc4   : > { %v2469_v45 = vadd.f32 %v425_v38, %v420_v37  ;;  %v421_v46 = vadd.f32 %v418_v44, %v2416_v17  ;;  %v426_v47 = vsel %vm424_vm9, %v423_v31, %v422_v30  ;;  %v474_v48 = vsel %vm417_vm8, %v472_v24, %v471_v23 }
  0xc5   : > { %485 = vrot.lane.b32.xlu1 %v2465_v41, %s1994_s1  ;;  %v448_v49 = vsel %vm417_vm8, %v446_v42, %v445_v39  ;;  %v453_v50 = vsel %vm424_vm9, %v451_v40, %v452_v43  ;;  %v447_v51 = vsel %vm417_vm8, %v445_v39, %v446_v42  ;;  %v454_v52 = vsel %vm424_vm9, %v452_v43, %v451_v40 }
  0xc6   : > { %429 = vrot.lane.b32.xlu0 %v2469_v45, %s1994_s1  ;;  %v449_v53 = vadd.f32 %v448_v49, %v443_v32  ;;  %v2488_v54 = vadd.f32 %v426_v47, %v421_v46  ;;  %v450_v55 = vadd.f32 %v447_v51, %v444_v36  ;;  %v475_v56 = vadd.f32 %v474_v48, %v2419_v18 }
  0xc7   : > { %v479_v57 = vsel %vm424_vm9, %v477_v25, %v478_v26  ;;  %v527_v60 = vrot.slane %v2425_v20, 7  ;;  %v528_v0 = vrot.slane %v2428_v21, 7  ;;  %v500_v3 = vrot.slane %v498_v58, 7 }
  0xc8   : > { %v2498_v61 = vadd.f32 %v453_v50, %v449_v53  ;;  %v2500_v62 = vadd.f32 %v454_v52, %v450_v55  ;;  %v2502_v63 = vadd.f32 %v479_v57, %v475_v56  ;;  %v501_v4 = vrot.slane %v499_v59, 7 }
  0xc9   : > { %v506_v23 = vrot.slane %v498_v58, 1  ;;  %v507_v24 = vrot.slane %v499_v59, 1  ;;  %v529_v25 = vsel %vm417_vm8, %v527_v60, %v528_v0  ;;  %v533_v26 = vrot.slane %v2425_v20, 1 }
  0xca   : > { %457 = vrot.lane.b32.xlu1 %v2498_v61, %s1994_s1  ;;  %431 = vrot.lane.b32.xlu0 %v2488_v54, %s1994_s1  ;;  %v534_v27 = vrot.slane %v2428_v21, 1  ;;  %v530_v28 = vsel %vm417_vm8, %v528_v0, %v527_v60  ;;  %v502_v29 = vsel %vm417_vm8, %v500_v3, %v501_v4  ;;  %v503_v31 = vsel %vm417_vm8, %v501_v4, %v500_v3 }
  0xcb   : > { %v509_v30 = vsel %vm424_vm9, %v507_v24, %v506_v23  ;;  %v508_v32 = vsel %vm424_vm9, %v506_v23, %v507_v24  ;;  %v505_v33 = vadd.f32 %v502_v29, %v499_v59  ;;  %v504_v34 = vadd.f32 %v503_v31, %v498_v58 }
  0xcc   : > { %v532_v35 = vadd.f32 %v529_v25, %v2428_v21  ;;  %v536_v36 = vsel %vm424_vm9, %v534_v27, %v533_v26  ;;  %v554_v37 = vmul.f32 %v2425_v20, %v2425_v20  ;;  %v555_v38 = vmul.f32 %v2428_v21, %v2428_v21 }
  0xcd   : > { %v2534_v39 = vadd.f32 %v509_v30, %v505_v33  ;;  %v2536_v40 = vadd.f32 %v508_v32, %v504_v34  ;;  %v531_v42 = vadd.f32 %v530_v28, %v2425_v20  ;;  %v535_v43 = vsel %vm424_vm9, %v533_v26, %v534_v27 }
  0xce   : > { %459 = vrot.lane.b32.xlu1 %v2500_v62, %s1994_s1  ;;  %483 = vrot.lane.b32.xlu0 %v2502_v63, %s1994_s1  ;;  %v556_v44 = vrot.slane %v554_v37, 7  ;;  %v557_v46 = vrot.slane %v555_v38, 7  ;;  %v562_v47 = vrot.slane %v554_v37, 1  ;;  %v563_v48 = vrot.slane %v555_v38, 1 }
  0xcf   : > { %v2541_v49 = vadd.f32 %v536_v36, %v532_v35  ;;  %v2551_v52 = vadd.f32 %v535_v43, %v531_v42  ;;  %v1996_v60 = vmov 1e+20  }
  0xd0   : > { %v558_v50 = vsel %vm417_vm8, %v556_v44, %v557_v46  ;;  %v559_v51 = vsel %vm417_vm8, %v557_v46, %v556_v44  ;;  %v565_v56 = vsel %vm424_vm9, %v563_v48, %v562_v47  ;;  %v564_v57 = vsel %vm424_vm9, %v562_v47, %v563_v48  ;;  %405 = vst [vmem:[#allocation2] sm:$0xff] %v1996_v60 }
  0xd1   : > { %v561_v53 = vadd.f32 %v558_v50, %v555_v38  ;;  %v560_v55 = vadd.f32 %v559_v51, %v554_v37  ;;  %406 = vst [vmem:[#allocation2 + $0x8] sm:$0xff] %v1996_v60  ;;  %407 = vst [vmem:[#allocation3] sm:$0xff] %v1996_v60 }
  0xd2   : > { %514 = vrot.lane.b32.xlu1 %v2534_v39, %s1994_s1  ;;  %512 = vrot.lane.b32.xlu0 %v2536_v40, %s1994_s1  ;;  %408 = vst [vmem:[#allocation3 + $0x8] sm:$0xff] %v1996_v60  ;;  %409 = vst [vmem:[#allocation4] sm:$0xff] %v1996_v60 }
  0xd3   : > { %v2561_v58 = vadd.f32 %v565_v56, %v561_v53  ;;  %v2563_v59 = vadd.f32 %v564_v57, %v560_v55  ;;  %410 = vst [vmem:[#allocation4 + $0x8] sm:$0xff] %v1996_v60 }
  0xd6   : > { %541 = vrot.lane.b32.xlu1 %v2541_v49, %s1994_s1  ;;  %539 = vrot.lane.b32.xlu0 %v2551_v52, %s1994_s1 }
  0xda   : > { %570 = vrot.lane.b32.xlu1 %v2561_v58, %s1994_s1  ;;  %568 = vrot.lane.b32.xlu0 %v2563_v59, %s1994_s1 }
  0xde   : > { %437 = vrot.lane.b32.xlu1 %v2488_v54, %s1995_s7  ;;  %435 = vrot.lane.b32.xlu0 %v2469_v45, %s1995_s7 }
  0xe2   : > { %465 = vrot.lane.b32.xlu1 %v2500_v62, %s1995_s7  ;;  %463 = vrot.lane.b32.xlu0 %v2498_v61, %s1995_s7 }
  0xe6   : > { %491 = vrot.lane.b32.xlu1 %v2465_v41, %s1995_s7  ;;  %489 = vrot.lane.b32.xlu0 %v2502_v63, %s1995_s7 }
  0xea   : > { %520 = vrot.lane.b32.xlu1 %v2534_v39, %s1995_s7  ;;  %518 = vrot.lane.b32.xlu0 %v2536_v40, %s1995_s7 }
  0xee   : > { %547 = vrot.lane.b32.xlu1 %v2541_v49, %s1995_s7  ;;  %545 = vrot.lane.b32.xlu0 %v2551_v52, %s1995_s7 }
  0xf2   : > { %576 = vrot.lane.b32.xlu1 %v2561_v58, %s1995_s7  ;;  %574 = vrot.lane.b32.xlu0 %v2563_v59, %s1995_s7 }
 0x137   : > { %v486_v0 = vpop.permute.xlu1 %485 }
 0x138   : > { %v430_v3 = vpop.permute.xlu0 %429  ;;  %v488_v48 = vadd.f32 %v486_v0, %v2465_v41 }
 0x139   : > { %v433_v32 = vadd.f32 %v430_v3, %v2469_v45 }
 0x13c   : > { %v458_v4 = vpop.permute.xlu1 %457  ;;  %v432_v23 = vpop.permute.xlu0 %431 }
 0x13d   : > { %v434_v33 = vadd.f32 %v432_v23, %v2488_v54  ;;  %v461_v38 = vadd.f32 %v458_v4, %v2498_v61 }
 0x140   : > { %v460_v24 = vpop.permute.xlu1 %459  ;;  %v484_v25 = vpop.permute.xlu0 %483 }
 0x141   : > { %v462_v42 = vadd.f32 %v460_v24, %v2500_v62  ;;  %v487_v45 = vadd.f32 %v484_v25, %v2502_v63 }
 0x144   : > { %v515_v26 = vpop.permute.xlu1 %514  ;;  %v513_v27 = vpop.permute.xlu0 %512 }
 0x145   : > { %v517_v61 = vadd.f32 %v515_v26, %v2534_v39  ;;  %v516_v62 = vadd.f32 %v513_v27, %v2536_v40 }
 0x148   : > { %v542_v28 = vpop.permute.xlu1 %541  ;;  %v540_v29 = vpop.permute.xlu0 %539 }
 0x149   : > { %v544_v41 = vadd.f32 %v542_v28, %v2541_v49  ;;  %v543_v63 = vadd.f32 %v540_v29, %v2551_v52 }
 0x14c   : > { %v571_v30 = vpop.permute.xlu1 %570  ;;  %v569_v31 = vpop.permute.xlu0 %568 }
 0x14d   : > { %v573_v39 = vadd.f32 %v571_v30, %v2561_v58  ;;  %v572_v40 = vadd.f32 %v569_v31, %v2563_v59 }
 0x150   : > { %v438_v34 = vpop.permute.xlu1 %437  ;;  %v436_v35 = vpop.permute.xlu0 %435 }
 0x151   : > { %v440_v36 = vadd.f32 %v438_v34, %v434_v33  ;;  %v439_v37 = vadd.f32 %v436_v35, %v433_v32 }
 0x153   : > { %442 = vst [vmem:[#allocation5 + $0x8] sm:$0xff] %v440_v36  ;;  %441 = vst [vmem:[#allocation5] sm:$0xff] %v439_v37 }
 0x154   : > { %v466_v43 = vpop.permute.xlu1 %465  ;;  %v464_v44 = vpop.permute.xlu0 %463 }
 0x155   : > { %v468_v46 = vadd.f32 %v466_v43, %v462_v42  ;;  %v467_v47 = vadd.f32 %v464_v44, %v461_v38 }
 0x157   : > { %470 = vst [vmem:[#allocation6 + $0x8] sm:$0xff] %v468_v46  ;;  %469 = vst [vmem:[#allocation6] sm:$0xff] %v467_v47 }
 0x158   : > { %v492_v54 = vpop.permute.xlu1 %491  ;;  %v490_v50 = vpop.permute.xlu0 %489 }
 0x159   : > { %v494_v51 = vadd.f32 %v492_v54, %v488_v48  ;;  %v493_v53 = vadd.f32 %v490_v50, %v487_v45 }
 0x15b   : > { %497 = vst [vmem:[#allocation5 + $0x18] sm:$0xff] %v494_v51  ;;  %496 = vst [vmem:[#allocation5 + $0x10] sm:$0xff] %v493_v53 }
 0x15c   : > { %v521_v55 = vpop.permute.xlu1 %520  ;;  %v519_v56 = vpop.permute.xlu0 %518 }
 0x15d   : > { %v523_v57 = vadd.f32 %v521_v55, %v517_v61  ;;  %v522_v60 = vadd.f32 %v519_v56, %v516_v62 }
 0x15f   : > { %526 = vst [vmem:[#allocation6 + $0x18] sm:$0xff] %v523_v57  ;;  %525 = vst [vmem:[#allocation6 + $0x10] sm:$0xff] %v522_v60 }
 0x160   : > { %v548_v0 = vpop.permute.xlu1 %547  ;;  %v546_v3 = vpop.permute.xlu0 %545 }
 0x161   : > { %v550_v4 = vadd.f32 %v548_v0, %v544_v41  ;;  %v549_v23 = vadd.f32 %v546_v3, %v543_v63 }
 0x163   : > { %553 = vst [vmem:[#allocation5 + $0x28] sm:$0xff] %v550_v4  ;;  %552 = vst [vmem:[#allocation5 + $0x20] sm:$0xff] %v549_v23 }
 0x164   : > { %v577_v24 = vpop.permute.xlu1 %576  ;;  %v575_v25 = vpop.permute.xlu0 %574 }
 0x165   : > { %v579_v26 = vadd.f32 %v577_v24, %v573_v39  ;;  %v578_v27 = vadd.f32 %v575_v25, %v572_v40 }
 0x167   : > { %582 = vst [vmem:[#allocation6 + $0x28] sm:$0xff] %v579_v26  ;;  %581 = vst [vmem:[#allocation6 + $0x20] sm:$0xff] %v578_v27 }
 0x168 PF: > { %v606_v49 = vsub.f32 %v2390_v8, %v2419_v18  ;;  %v583_v52 = vsub.f32 %v2384_v6, %v2413_v16  ;;  %v607_v58 = vsub.f32 %v2398_v11, %v2422_v19  ;;  %v584_v59 = vsub.f32 %v2387_v7, %v2416_v17  ;;  %s1998_s14 = smov 127   ;;  %p1555_p13 = scmp.ge.s32.totalorder %s1969_s21, 2 }
 0x169   : > { %v635_v30 = vsub.f32 %v2404_v13, %v2428_v21  ;;  %v634_v33 = vsub.f32 %v2401_v12, %v2425_v20  ;;  %vm599_vm10 = vcmp.lt.s32.totalorder %v2367_v1, 7  ;;  %vm708_vm11 = vcmp.lt.s32.totalorder (!%p1555_p13), %v2367_v1, 1  ;;  %s1999_s27 = smov (!%p1555_p13), 1   ;;  %s2000_s2 = smov (!%p1555_p13), 127  }
 0x16a   : > { %v2602_v28 = vmul.f32 %v606_v49, %v2407_v14  ;;  %v585_v29 = vmul.f32 %v583_v52, %v2407_v14  ;;  %v609_v31 = vmul.f32 %v607_v58, %v2410_v15  ;;  %v586_v32 = vmul.f32 %v584_v59, %v2410_v15  ;;  %s1185_s12 = sld [smem:[#allocation7]] (!%p1555_p13) }
 0x16b   : > { %v637_v34 = vmul.f32 %v635_v30, %v2410_v15  ;;  %v636_v35 = vmul.f32 %v634_v33, %v2407_v14 }
 0x16c   : > { %612 = vrot.lane.b32.xlu1 %v2602_v28, %s1998_s14  ;;  %589 = vrot.lane.b32.xlu0 %v585_v29, %s1998_s14  ;;  %v620_v36 = vrot.slane %v2602_v28, 1  ;;  %v621_v37 = vrot.slane %v609_v31, 1  ;;  %v597_v38 = vrot.slane %v585_v29, 1  ;;  %v598_v42 = vrot.slane %v586_v32, 1 }
 0x16d   : > { %v648_v43 = vrot.slane %v636_v35, 1  ;;  %v649_v44 = vrot.slane %v637_v34, 1  ;;  %v611_v3 = vand.u32 2147483647, %v609_v31  ;;  %v588_v4 = vand.u32 2147483647, %v586_v32 }
 0x16e   : > { %v623_v46 = vsel %vm599_vm10, %v621_v37, %v620_v36  ;;  %v601_v47 = vsel %vm599_vm10, %v598_v42, %v597_v38  ;;  %v622_v50 = vsel %vm599_vm10, %v620_v36, %v621_v37  ;;  %v600_v51 = vsel %vm599_vm10, %v597_v38, %v598_v42 }
 0x16f   : > { %v625_v48 = vsub.f32 %v623_v46, %v609_v31  ;;  %v651_v45 = vsel %vm599_vm10, %v649_v44, %v648_v43  ;;  %v603_v54 = vsub.f32 %v601_v47, %v586_v32  ;;  %v624_v55 = vsub.f32 %v622_v50, %v2602_v28 }
 0x170   : > { %614 = vrot.lane.b32.xlu1 %v609_v31, %s1998_s14  ;;  %591 = vrot.lane.b32.xlu0 %v586_v32, %s1998_s14  ;;  %v653_v62 = vsub.f32 %v651_v45, %v637_v34  ;;  %v650_v60 = vsel %vm599_vm10, %v648_v43, %v649_v44  ;;  %v602_v41 = vsub.f32 %v600_v51, %v585_v29  ;;  %v610_v23 = vand.u32 2147483647, %v2602_v28 }
 0x171   : > { %v627_v56 = vand.u32 2147483647, %v625_v48  ;;  %v605_v57 = vand.u32 2147483647, %v603_v54  ;;  %v626_v25 = vand.u32 2147483647, %v624_v55  ;;  %v652_v26 = vsub.f32 %v650_v60, %v636_v35 }
 0x172   : > { %v655_v24 = vand.u32 2147483647, %v653_v62  ;;  %v587_v27 = vand.u32 2147483647, %v585_v29  ;;  %v604_v59 = vand.u32 2147483647, %v602_v41  ;;  %v629_v43 = vadd.f32 %v611_v3, %v588_v4 }
 0x173   : > { %v633_v58 = vadd.f32 %v627_v56, %v605_v57  ;;  %v639_v33 = vand.u32 2147483647, %v637_v34  ;;  %v638_v44 = vand.u32 2147483647, %v636_v35  ;;  %v654_v46 = vand.u32 2147483647, %v652_v26 }
 0x174   : > { %642 = vrot.lane.b32.xlu1 %v637_v34, %s1998_s14  ;;  %640 = vrot.lane.b32.xlu0 %v636_v35, %s1998_s14  ;;  %v628_v47 = vadd.f32 %v610_v23, %v587_v27  ;;  %v632_v54 = vadd.f32 %v626_v25, %v604_v59  ;;  %v675_v60 = vsub.f32 1.0, %v2410_v15  ;;  %v681_v27 = vld [vmem:[#allocation2 + $0x8] sm:$0xff]  ;;  %v683_v59 = vld [vmem:[#allocation3 + $0x8] sm:$0xff] }
 0x175   : > { %v661_v45 = vadd.f32 %v655_v24, %v633_v58 }
 0x176   : > { %v660_v57 = vadd.f32 %v654_v46, %v632_v54  ;;  %v677_v23 = vmul.f32 10000.0, %v675_v60  ;;  %v893_v54 = vrot.slane (!%p1555_p13), %v2390_v8, 7 }
 0x177   : > { %v667_v55 = vmul.f32 %v2393_v9, %v661_v45 }
 0x1de   : > { %v613_v53 = vpop.permute.xlu1 %612  ;;  %v590_v61 = vpop.permute.xlu0 %589 }
 0x1df   : > { %v616_v63 = vsub.f32 %v613_v53, %v2602_v28  ;;  %v593_v0 = vsub.f32 %v590_v61, %v585_v29  ;;  %v657_v53 = vadd.f32 %v639_v33, %v629_v43  ;;  %v656_v61 = vadd.f32 %v638_v44, %v628_v47  ;;  %v684_v43 = vld [vmem:[#allocation4] sm:$0xff] }
 0x1e1   : > { %v618_v30 = vand.u32 2147483647, %v616_v63  ;;  %v595_v36 = vand.u32 2147483647, %v593_v0  ;;  %v662_v3 = vmul.f32 0.16666667, %v656_v61 }
 0x1e2   : > { %v615_v39 = vpop.permute.xlu1 %614  ;;  %v592_v40 = vpop.permute.xlu0 %591 }
 0x1e3   : > { %v617_v49 = vsub.f32 %v615_v39, %v609_v31  ;;  %v594_v52 = vsub.f32 %v592_v40, %v586_v32  ;;  %v630_v29 = vadd.f32 %v618_v30, %v595_v36  ;;  %v682_v30 = vld [vmem:[#allocation3] sm:$0xff] }
 0x1e5   : > { %v619_v37 = vand.u32 2147483647, %v617_v49  ;;  %v596_v38 = vand.u32 2147483647, %v594_v52  ;;  %v680_v49 = vld [vmem:[#allocation2] sm:$0xff] }
 0x1e6   : > { %v643_v42 = vpop.permute.xlu1 %642  ;;  %v641_v28 = vpop.permute.xlu0 %640 }
 0x1e7   : > { %v645_v48 = vsub.f32 %v643_v42, %v637_v34  ;;  %v644_v50 = vsub.f32 %v641_v28, %v636_v35  ;;  %v631_v31 = vadd.f32 %v619_v37, %v596_v38  ;;  %v674_v34 = vsub.f32 1.0, %v2407_v14  ;;  %v685_v42 = vld [vmem:[#allocation4 + $0x8] sm:$0xff] }
 0x1e8   : > { %v663_v35 = vmul.f32 0.16666667, %v657_v53  ;;  %v749_v53 = vrot.slane (!%p1555_p13), %v2384_v6, 1 }
 0x1e9   : > { %v647_v32 = vand.u32 2147483647, %v645_v48  ;;  %v646_v51 = vand.u32 2147483647, %v644_v50  ;;  %v676_v40 = vmul.f32 10000.0, %v674_v34  ;;  %v894_v50 = vrot.slane (!%p1555_p13), %v2398_v11, 7 }
 0x1eb   : > { %v659_v62 = vadd.f32 %v647_v32, %v631_v31  ;;  %v658_v56 = vadd.f32 %v646_v51, %v630_v29  ;;  %v899_v29 = vrot.slane (!%p1555_p13), %v2390_v8, 1  ;;  %v900_v31 = vrot.slane (!%p1555_p13), %v2398_v11, 1 }
 0x1ec   : > { %v743_v32 = vrot.slane (!%p1555_p13), %v2384_v6, 7  ;;  %v744_v51 = vrot.slane (!%p1555_p13), %v2387_v7, 7  ;;  %v896_v61 = vsel (!%p1555_p13), %vm708_vm11, %v894_v50, %v893_v54 }
 0x1ed   : > { %v665_v41 = vmul.f32 %v2377_v5, %v659_v62  ;;  %v664_v63 = vmul.f32 %v2377_v5, %v658_v56  ;;  %v750_v62 = vrot.slane (!%p1555_p13), %v2387_v7, 1  ;;  %v769_v56 = vmul.f32 (!%p1555_p13), %v2384_v6, %v2384_v6 }
 0x1ee   : > { %v901_v60 = vsel (!%p1555_p13), %vm599_vm10, %v899_v29, %v900_v31 }
 0x1ef   : > { %v669_v0 = vadd.f32 %v667_v55, %v665_v41  ;;  %v668_v4 = vadd.f32 %v664_v63, %v660_v57  ;;  %v895_v55 = vsel (!%p1555_p13), %vm708_vm11, %v893_v54, %v894_v50  ;;  %v897_v57 = vadd.f32 (!%p1555_p13), %v896_v61, %v2390_v8 }
 0x1f0   : > { %v746_v41 = vsel (!%p1555_p13), %vm708_vm11, %v744_v51, %v743_v32  ;;  %v898_v34 = vadd.f32 (!%p1555_p13), %v895_v55, %v2398_v11  ;;  %v1051_v55 = vrot.slane (!%p1555_p13), %v2404_v13, 1 }
 0x1f1   : > { %v671_v39 = vmul.f32 0.16666667, %v669_v0  ;;  %v670_v24 = vmul.f32 0.16666667, %v668_v4  ;;  %v747_v63 = vadd.f32 (!%p1555_p13), %v746_v41, %v2384_v6  ;;  %v902_v0 = vsel (!%p1555_p13), %vm599_vm10, %v900_v31, %v899_v29 }
 0x1f2   : > { %v2665_v4 = vadd.f32 (!%p1555_p13), %v901_v60, %v897_v57 }
 0x1f3   : > { %v673_v25 = vadd.f32 %v671_v39, %v663_v35  ;;  %v672_v26 = vadd.f32 %v670_v24, %v662_v3  ;;  %v751_v35 = vsel (!%p1555_p13), %vm599_vm10, %v749_v53, %v750_v62  ;;  %v745_v3 = vsel (!%p1555_p13), %vm708_vm11, %v743_v32, %v744_v51 }
 0x1f4   : > { %v752_v39 = vsel (!%p1555_p13), %vm599_vm10, %v750_v62, %v749_v53  ;;  %v770_v24 = vmul.f32 (!%p1555_p13), %v2387_v7, %v2387_v7  ;;  %905 = vrot.lane.b32.xlu1 (!%p1555_p13), %v2665_v4, %s1999_s27  ;;  %v1050_v51 = vrot.slane (!%p1555_p13), %v2401_v12, 1 }
 0x1f5   : > { %v679_v52 = vadd.f32 %v677_v23, %v673_v25  ;;  %v678_v58 = vadd.f32 %v676_v40, %v672_v26  ;;  %v748_v23 = vadd.f32 (!%p1555_p13), %v745_v3, %v2387_v7  ;;  %v2670_v40 = vadd.f32 (!%p1555_p13), %v751_v35, %v747_v63 }
 0x1f6   : > { %v771_v25 = vrot.slane (!%p1555_p13), %v769_v56, 7  ;;  %v2676_v26 = vadd.f32 (!%p1555_p13), %v902_v0, %v898_v34  ;;  %v1053_v63 = vsel (!%p1555_p13), %vm599_vm10, %v1051_v55, %v1050_v51  ;;  %v1052_v0 = vsel (!%p1555_p13), %vm599_vm10, %v1050_v51, %v1051_v55 }
 0x1f7   : > { %v687_v33 = vmin.f32 %v681_v27, %v679_v52  ;;  %v689_v36 = vmax.f32 %v681_v27, %v679_v52  ;;  %v686_v37 = vmin.f32 %v680_v49, %v678_v58  ;;  %v688_v38 = vmax.f32 %v680_v49, %v678_v58  ;;  %705 = sbr.rel (%p1555_p13) target bundleno = 923 (0x39b), region = 60  ;;  %755 = vrot.lane.b32.xlu0 (!%p1555_p13), %v2670_v40, %s1999_s27 }
 0x1f8   : > { %v2678_v27 = vadd.f32 (!%p1555_p13), %v752_v39, %v748_v23  ;;  %v777_v49 = vrot.slane (!%p1555_p13), %v769_v56, 1  ;;  %v772_v52 = vrot.slane (!%p1555_p13), %v770_v24, 7  ;;  %v778_v58 = vrot.slane (!%p1555_p13), %v770_v24, 1  ;;  %907 = vrot.lane.b32.xlu1 (!%p1555_p13), %v2676_v26, %s1999_s27 }
 0x1f9   : > { %v691_v44 = vmin.f32 %v683_v59, %v689_v36  ;;  %v693_v46 = vmax.f32 %v683_v59, %v689_v36  ;;  %697 = vst [vmem:[#allocation2 + $0x8] sm:$0xff] %v687_v33  ;;  %v690_v28 = vmin.f32 %v682_v30, %v688_v38  ;;  %v692_v47 = vmax.f32 %v682_v30, %v688_v38 }
 0x1fa   : > { %696 = vst [vmem:[#allocation2] sm:$0xff] %v686_v37  ;;  %v919_v59 = vmul.f32 (!%p1555_p13), %v2390_v8, %v2390_v8  ;;  %v920_v30 = vmul.f32 (!%p1555_p13), %v2398_v11, %v2398_v11  ;;  %v773_v33 = vsel (!%p1555_p13), %vm708_vm11, %v771_v25, %v772_v52  ;;  %v774_v36 = vsel (!%p1555_p13), %vm708_vm11, %v772_v52, %v771_v25 }
 0x1fb   : > { %v695_v48 = vmin.f32 %v685_v42, %v693_v46  ;;  %699 = vst [vmem:[#allocation3 + $0x8] sm:$0xff] %v691_v44  ;;  %v694_v45 = vmin.f32 %v684_v43, %v692_v47  ;;  %698 = vst [vmem:[#allocation3] sm:$0xff] %v690_v28  ;;  %v776_v37 = vadd.f32 (!%p1555_p13), %v773_v33, %v770_v24  ;;  %757 = vrot.lane.b32.xlu0 (!%p1555_p13), %v2678_v27, %s1999_s27 }
 0x1fc   : > { %v780_v38 = vsel (!%p1555_p13), %vm599_vm10, %v778_v58, %v777_v49  ;;  %v775_v42 = vadd.f32 (!%p1555_p13), %v774_v36, %v769_v56  ;;  %v921_v43 = vrot.slane (!%p1555_p13), %v919_v59, 7  ;;  %v922_v44 = vrot.slane (!%p1555_p13), %v920_v30, 7  ;;  %763 = vrot.lane.b32.xlu1 (!%p1555_p13), %v2678_v27, %s2000_s2 }
 0x1fd   : > { %701 = vst [vmem:[#allocation4 + $0x8] sm:$0xff] %v695_v48  ;;  %700 = vst [vmem:[#allocation4] sm:$0xff] %v694_v45  ;;  %v779_v46 = vsel (!%p1555_p13), %vm599_vm10, %v777_v49, %v778_v58  ;;  %v2700_v28 = vadd.f32 (!%p1555_p13), %v780_v38, %v776_v37  ;;  %v1044_v47 = vrot.slane (!%p1555_p13), %v2401_v12, 7  ;;  %v1045_v48 = vrot.slane (!%p1555_p13), %v2404_v13, 7 }
 0x1fe   : > { %v2706_v45 = vadd.f32 %v779_v46, %v775_v42  ;;  %v923_v54 = vsel %vm708_vm11, %v921_v43, %v922_v44  ;;  %v927_v50 = vrot.slane %v919_v59, 1  ;;  %v928_v29 = vrot.slane %v920_v30, 1 }
 0x1ff   : > { %761 = vrot.lane.b32.xlu0 %v2670_v40, %s2000_s2  ;;  %v924_v31 = vsel %vm708_vm11, %v922_v44, %v921_v43  ;;  %v926_v32 = vadd.f32 %v923_v54, %v920_v30  ;;  %v1046_v62 = vsel %vm708_vm11, %v1044_v47, %v1045_v48  ;;  %v1047_v57 = vsel %vm708_vm11, %v1045_v48, %v1044_v47 }
 0x200   : > { %785 = vrot.lane.b32.xlu1 %v2700_v28, %s1999_s27  ;;  %v930_v53 = vsel %vm599_vm10, %v928_v29, %v927_v50  ;;  %v925_v61 = vadd.f32 %v924_v31, %v919_v59  ;;  %v929_v56 = vsel %vm599_vm10, %v927_v50, %v928_v29  ;;  %v1049_v41 = vadd.f32 %v1046_v62, %v2404_v13 }
 0x201   : > { %v2728_v60 = vadd.f32 %v930_v53, %v926_v32  ;;  %v1048_v35 = vadd.f32 %v1047_v57, %v2401_v12  ;;  %v1070_v39 = vmul.f32 %v2401_v12, %v2401_v12  ;;  %v1071_v24 = vmul.f32 %v2404_v13, %v2404_v13 }
 0x202   : > { %v2733_v34 = vadd.f32 %v929_v56, %v925_v61  ;;  %v2742_v3 = vadd.f32 %v1053_v63, %v1049_v41  ;;  %v797_v52 = vmul.f32 %v2413_v16, %v2384_v6  ;;  %v798_v33 = vmul.f32 %v2416_v17, %v2387_v7 }
 0x203   : > { %783 = vrot.lane.b32.xlu0 %v2706_v45, %s1999_s27  ;;  %v2746_v23 = vadd.f32 %v1052_v0, %v1048_v35  ;;  %v1072_v25 = vrot.slane %v1070_v39, 7  ;;  %v1073_v49 = vrot.slane %v1071_v24, 7  ;;  %v1078_v59 = vrot.slane %v1070_v39, 1 }
 0x204   : > { %913 = vrot.lane.b32.xlu1 %v2676_v26, %s2000_s2  ;;  %v1079_v30 = vrot.slane %v1071_v24, 1  ;;  %v799_v38 = vrot.slane %v797_v52, 7  ;;  %v947_v6 = vmul.f32 %v2419_v18, %v2390_v8  ;;  %v800_v44 = vrot.slane %v798_v33, 7 }
 0x205   : > { %v1074_v58 = vsel %vm708_vm11, %v1072_v25, %v1073_v49  ;;  %v1075_v36 = vsel %vm708_vm11, %v1073_v49, %v1072_v25  ;;  %v948_v7 = vmul.f32 %v2422_v19, %v2398_v11  ;;  %v805_v8 = vrot.slane %v797_v52, 1 }
 0x206   : > { %v1077_v37 = vadd.f32 %v1074_v58, %v1071_v24  ;;  %v1081_v42 = vsel %vm599_vm10, %v1079_v30, %v1078_v59  ;;  %v1076_v43 = vadd.f32 %v1075_v36, %v1070_v39  ;;  %v1080_v46 = vsel %vm599_vm10, %v1078_v59, %v1079_v30 }
 0x207   : > { %911 = vrot.lane.b32.xlu0 %v2665_v4, %s2000_s2  ;;  %v806_v48 = vrot.slane %v798_v33, 1  ;;  %v801_v50 = vsel %vm708_vm11, %v799_v38, %v800_v44  ;;  %v949_v29 = vrot.slane %v947_v6, 7  ;;  %v950_v11 = vrot.slane %v948_v7, 7 }
 0x208   : > { %935 = vrot.lane.b32.xlu1 %v2728_v60, %s1999_s27  ;;  %v2782_v47 = vadd.f32 %v1081_v42, %v1077_v37  ;;  %v2786_v54 = vadd.f32 %v1080_v46, %v1076_v43  ;;  %v802_v31 = vsel %vm708_vm11, %v800_v44, %v799_v38  ;;  %v804_v32 = vadd.f32 %v801_v50, %v798_v33 }
 0x209   : > { %v955_v51 = vrot.slane %v947_v6, 1  ;;  %v808_v53 = vsel %vm599_vm10, %v806_v48, %v805_v8  ;;  %v803_v61 = vadd.f32 %v802_v31, %v797_v52  ;;  %v951_v62 = vsel %vm708_vm11, %v949_v29, %v950_v11 }
 0x20a   : > { %v956_v55 = vrot.slane %v948_v7, 1  ;;  %v807_v56 = vsel %vm599_vm10, %v805_v8, %v806_v48  ;;  %v952_v57 = vsel %vm708_vm11, %v950_v11, %v949_v29  ;;  %v2806_v41 = vadd.f32 %v808_v53, %v804_v32 }
 0x20b   : > { %933 = vrot.lane.b32.xlu0 %v2733_v34, %s1999_s27  ;;  %v954_v63 = vadd.f32 %v951_v62, %v948_v7  ;;  %v1098_v35 = vmul.f32 %v2425_v20, %v2401_v12  ;;  %v2812_v0 = vadd.f32 %v807_v56, %v803_v61  ;;  %v953_v24 = vadd.f32 %v952_v57, %v947_v6 }
 0x20c   : > { %1058 = vrot.lane.b32.xlu1 %v2742_v3, %s1999_s27  ;;  %v958_v39 = vsel %vm599_vm10, %v956_v55, %v955_v51  ;;  %v1099_v25 = vmul.f32 %v2428_v21, %v2404_v13  ;;  %v957_v49 = vsel %vm599_vm10, %v955_v51, %v956_v55  ;;  %v706_v42 = vrot.slane %v2407_v14, 7 }
 0x20d   : > { %v2822_v52 = vadd.f32 %v958_v39, %v954_v63  ;;  %v2826_v12 = vadd.f32 %v957_v49, %v953_v24  ;;  %v1100_v58 = vrot.slane %v1098_v35, 7  ;;  %v1106_v30 = vrot.slane %v1098_v35, 1 }
 0x20e   : > { %v1101_v59 = vrot.slane %v1099_v25, 7  ;;  %v1107_v33 = vrot.slane %v1099_v25, 1  ;;  %v707_v43 = vrot.slane %v2410_v15, 7  ;;  %v713_v8 = vrot.slane %v2407_v14, 1 }
 0x20f   : > { %1056 = vrot.lane.b32.xlu0 %v2746_v23, %s1999_s27  ;;  %v714_v48 = vrot.slane %v2410_v15, 1 }
 0x210   : > { %791 = vrot.lane.b32.xlu1 %v2700_v28, %s2000_s2  ;;  %v1102_v13 = vsel %vm708_vm11, %v1100_v58, %v1101_v59  ;;  %v1103_v36 = vsel %vm708_vm11, %v1101_v59, %v1100_v58  ;;  %v1109_v38 = vsel %vm599_vm10, %v1107_v33, %v1106_v30  ;;  %v1108_v44 = vsel %vm599_vm10, %v1106_v30, %v1107_v33  ;;  %v735_v30 = vld [vmem:[#allocation5] sm:$0xff] }
 0x211   : > { %v1105_v37 = vadd.f32 %v1102_v13, %v1099_v25  ;;  %v1104_v6 = vadd.f32 %v1103_v36, %v1098_v35  ;;  %v709_v50 = vsel %vm708_vm11, %v706_v42, %v707_v43  ;;  %v710_v29 = vsel %vm708_vm11, %v707_v43, %v706_v42  ;;  %v736_v13 = vld [vmem:[#allocation5 + $0x8] sm:$0xff]  ;;  %v885_v43 = vld [vmem:[#allocation5 + $0x18] sm:$0xff] }
 0x212   : > { %v712_v11 = vadd.f32 %v709_v50, %v2410_v15  ;;  %v711_v31 = vadd.f32 %v710_v29, %v2407_v14  ;;  %v716_v32 = vsel %vm599_vm10, %v714_v48, %v713_v8  ;;  %v715_v51 = vsel %vm599_vm10, %v713_v8, %v714_v48  ;;  %v884_v48 = vld [vmem:[#allocation5 + $0x10] sm:$0xff]  ;;  %v740_v50 = vld [vmem:[#allocation6 + $0x8] sm:$0xff] }
 0x213   : > { %789 = vrot.lane.b32.xlu0 %v2706_v45, %s2000_s2  ;;  %v2848_v7 = vadd.f32 %v1109_v38, %v1105_v37  ;;  %v2852_v46 = vadd.f32 %v1108_v44, %v1104_v6  ;;  %v2891_v37 = vmul.f32 0.11111111, %v736_v13  ;;  %v2893_v38 = vmul.f32 0.11111111, %v735_v30  ;;  %v890_v13 = vld [vmem:[#allocation6 + $0x18] sm:$0xff] }
 0x214   : > { %941 = vrot.lane.b32.xlu1 %v2728_v60, %s2000_s2  ;;  %v2872_v53 = vadd.f32 %v716_v32, %v712_v11  ;;  %v2876_v15 = vadd.f32 %v715_v51, %v711_v31  ;;  %v739_v31 = vld [vmem:[#allocation6] sm:$0xff] }
 0x215   : > { %v2902_v51 = vmul.f32 2.0, %v2893_v38  ;;  %v826_v30 = vmul.f32 %v2891_v37, %v2891_v37 }
 0x217   : > { %939 = vrot.lane.b32.xlu0 %v2733_v34, %s2000_s2 }
 0x218   : > { %1064 = vrot.lane.b32.xlu1 %v2742_v3, %s2000_s2 }
 0x21b   : > { %1062 = vrot.lane.b32.xlu0 %v2746_v23, %s2000_s2 }
 0x21c   : > { %1086 = vrot.lane.b32.xlu1 %v2782_v47, %s1999_s27 }
 0x21f   : > { %1084 = vrot.lane.b32.xlu0 %v2786_v54, %s1999_s27 }
 0x220   : > { %1092 = vrot.lane.b32.xlu1 %v2782_v47, %s2000_s2 }
 0x223   : > { %1090 = vrot.lane.b32.xlu0 %v2786_v54, %s2000_s2 }
 0x224   : > { %813 = vrot.lane.b32.xlu1 %v2806_v41, %s1999_s27 }
 0x227   : > { %811 = vrot.lane.b32.xlu0 %v2812_v0, %s1999_s27 }
 0x228   : > { %963 = vrot.lane.b32.xlu1 %v2822_v52, %s1999_s27 }
 0x22b   : > { %961 = vrot.lane.b32.xlu0 %v2826_v12, %s1999_s27 }
 0x22c   : > { %819 = vrot.lane.b32.xlu1 %v2806_v41, %s2000_s2 }
 0x22f   : > { %817 = vrot.lane.b32.xlu0 %v2812_v0, %s2000_s2 }
 0x230   : > { %969 = vrot.lane.b32.xlu1 %v2822_v52, %s2000_s2 }
 0x233   : > { %967 = vrot.lane.b32.xlu0 %v2826_v12, %s2000_s2 }
 0x234   : > { %1114 = vrot.lane.b32.xlu1 %v2848_v7, %s1999_s27 }
 0x237   : > { %1112 = vrot.lane.b32.xlu0 %v2852_v46, %s1999_s27 }
 0x238   : > { %1120 = vrot.lane.b32.xlu1 %v2848_v7, %s2000_s2 }
 0x23b   : > { %1118 = vrot.lane.b32.xlu0 %v2852_v46, %s2000_s2 }
 0x23c   : > { %721 = vrot.lane.b32.xlu1 %v2872_v53, %s1999_s27 }
 0x23f   : > { %719 = vrot.lane.b32.xlu0 %v2876_v15, %s1999_s27 }
 0x240   : > { %727 = vrot.lane.b32.xlu1 %v2872_v53, %s2000_s2 }
 0x243   : > { %725 = vrot.lane.b32.xlu0 %v2876_v15, %s2000_s2 }
 0x266   : > { %v906_v14 = vpop.permute.xlu1 %905 }
 0x269   : > { %v756_v61 = vpop.permute.xlu0 %755 }
 0x26a   : > { %v908_v62 = vpop.permute.xlu1 %907  ;;  %v759_v42 = vadd.f32 %v756_v61, %v2670_v40 }
 0x26d   : > { %v758_v55 = vpop.permute.xlu0 %757 }
 0x26e   : > { %v764_v56 = vpop.permute.xlu1 %763  ;;  %v760_v36 = vadd.f32 %v758_v55, %v2678_v27  ;;  %v2899_v27 = vmul.f32 2.0, %v2891_v37  ;;  %v2904_v55 = vmul.f32 0.11111111, %v885_v43 }
 0x270   : > { %v766_v44 = vadd.f32 %v764_v56, %v760_v36  ;;  %v910_v56 = vadd.f32 %v908_v62, %v2676_v26  ;;  %v741_v36 = vmul.f32 0.11111111, %v739_v31  ;;  %v825_v26 = vmul.f32 %v2893_v38, %v2893_v38  ;;  %v889_v62 = vld [vmem:[#allocation6 + $0x10] sm:$0xff] }
 0x271   : > { %v762_v57 = vpop.permute.xlu0 %761  ;;  %v891_v31 = vmul.f32 0.11111111, %v889_v62  ;;  %v1041_v62 = vld [vmem:[#allocation6 + $0x28] sm:$0xff] }
 0x272   : > { %v786_v63 = vpop.permute.xlu1 %785  ;;  %v765_v29 = vadd.f32 %v762_v57, %v759_v42  ;;  %v2949_v18 = vmul.f32 0.11111111, %v1041_v62 }
 0x273   : > { %v788_v8 = vadd.f32 %v786_v63, %v2700_v28  ;;  %v2907_v28 = vmul.f32 0.11111111, %v884_v48  ;;  %v742_v63 = vmul.f32 0.11111111, %v740_v50  ;;  %v2921_v50 = vmul.f32 2.0, %v2904_v55 }
 0x274   : > { %v2914_v42 = vmul.f32 0.11111111, %v765_v29 }
 0x275   : > { %v784_v35 = vpop.permute.xlu0 %783  ;;  %v2924_v29 = vmul.f32 2.0, %v2907_v28 }
 0x276   : > { %v914_v39 = vpop.permute.xlu1 %913  ;;  %v787_v11 = vadd.f32 %v784_v35, %v2706_v45  ;;  %v909_v45 = vadd.f32 %v906_v14, %v2665_v4  ;;  %v2910_v35 = vmul.f32 0.11111111, %v766_v44  ;;  %v892_v14 = vmul.f32 0.11111111, %v890_v13 }
 0x277   : > { %v916_v43 = vadd.f32 %v914_v39, %v910_v56  ;;  %v827_v56 = vsub.f32 %v741_v36, %v825_v26  ;;  %v829_v13 = vmul.f32 %v2914_v42, %v2914_v42 }
 0x279   : > { %v912_v24 = vpop.permute.xlu0 %911 }
 0x27a   : > { %v936_v25 = vpop.permute.xlu1 %935 }
 0x27d   : > { %v934_v49 = vpop.permute.xlu0 %933 }
 0x27e   : > { %v2886_v58 = vpop.permute.xlu1 %1058  ;;  %v937_v48 = vadd.f32 %v934_v49, %v2733_v34  ;;  %v2930_v49 = vmul.f32 0.11111111, %v916_v43 }
 0x281   : > { %v2888_v59 = vpop.permute.xlu0 %1056 }
 0x282   : > { %v792_v33 = vpop.permute.xlu1 %791 }
 0x283   : > { %v794_v40 = vadd.f32 %v792_v33, %v788_v8  ;;  %v938_v33 = vadd.f32 %v936_v25, %v2728_v60  ;;  %v1036_v60 = vld [vmem:[#allocation5 + $0x28] sm:$0xff]  ;;  %v830_v25 = vmul.f32 %v2910_v35, %v2910_v35 }
 0x284   : > { %v2938_v5 = vmul.f32 0.11111111, %v1036_v60  ;;  %v980_v60 = vmul.f32 %v2930_v49, %v2930_v49 }
 0x285   : > { %v790_v6 = vpop.permute.xlu0 %789  ;;  %v796_v4 = vmul.f32 0.11111111, %v794_v40  ;;  %v828_v40 = vsub.f32 %v742_v63, %v826_v30  ;;  %v850_v17 = vadd.f32 %v830_v25, %v826_v30 }
 0x286   : > { %v942_v32 = vpop.permute.xlu1 %941  ;;  %v793_v57 = vadd.f32 %v790_v6, %v787_v11  ;;  %v915_v6 = vadd.f32 %v912_v24, %v909_v45  ;;  %v976_v24 = vmul.f32 %v2904_v55, %v2904_v55  ;;  %v1035_v45 = vld [vmem:[#allocation5 + $0x20] sm:$0xff] }
 0x287   : > { %v944_v11 = vadd.f32 %v942_v32, %v938_v33  ;;  %v832_v32 = vsub.f32 %v796_v4, %v830_v25  ;;  %v975_v33 = vmul.f32 %v2907_v28, %v2907_v28  ;;  %v2944_v1 = vmul.f32 0.11111111, %v1035_v45  ;;  %v1040_v4 = vld [vmem:[#allocation6 + $0x20] sm:$0xff] }
 0x288   : > { %v795_v39 = vmul.f32 0.11111111, %v793_v57  ;;  %v2934_v57 = vmul.f32 0.11111111, %v915_v6  ;;  %v978_v36 = vsub.f32 %v892_v14, %v976_v24  ;;  %v1042_v45 = vmul.f32 0.11111111, %v1040_v4 }
 0x289   : > { %v940_v61 = vpop.permute.xlu0 %939  ;;  %v946_v43 = vmul.f32 0.11111111, %v944_v11  ;;  %v977_v21 = vsub.f32 %v891_v31, %v975_v33 }
 0x28a   : > { %v1065_v8 = vpop.permute.xlu1 %1064  ;;  %v943_v34 = vadd.f32 %v940_v61, %v937_v48  ;;  %v1061_v61 = vadd.f32 %v2886_v58, %v2742_v3  ;;  %v831_v63 = vsub.f32 %v795_v39, %v829_v13  ;;  %v1060_v48 = vadd.f32 %v2888_v59, %v2746_v23 }
 0x28b   : > { %v854_v58 = vadd.f32 %v832_v32, %v828_v40  ;;  %v979_v14 = vmul.f32 %v2934_v57, %v2934_v57  ;;  %v982_v31 = vsub.f32 %v946_v43, %v980_v60  ;;  %v2957_v40 = vmul.f32 2.0, %v2938_v5 }
 0x28c   : > { %v945_v6 = vmul.f32 0.11111111, %v943_v34  ;;  %v1067_v20 = vadd.f32 %v1065_v8, %v1061_v61  ;;  %v853_v11 = vadd.f32 %v831_v63, %v827_v56  ;;  %v849_v8 = vadd.f32 %v829_v13, %v825_v26 }
 0x28d   : > { %v1063_v44 = vpop.permute.xlu0 %1062  ;;  %v1004_v26 = vadd.f32 %v982_v31, %v978_v36  ;;  %v852_v63 = vadd.f32 0.0001, %v850_v17  ;;  %v834_v17 = vmul.f32 %v2910_v35, %v2891_v37 }
 0x28e   : > { %v1087_v2 = vpop.permute.xlu1 %1086  ;;  %v1066_v39 = vadd.f32 %v1063_v44, %v1060_v48  ;;  %v981_v16 = vsub.f32 %v945_v6, %v979_v14  ;;  %v2959_v32 = vmul.f32 0.11111111, %v1067_v20  ;;  %v856_v44 = vadd.f32 0.0009, %v854_v58 }
 0x28f   : > { %v1089_v19 = vadd.f32 %v1087_v2, %v2782_v47  ;;  %v1127_v2 = vmul.f32 %v2938_v5, %v2938_v5  ;;  %v855_v62 = vadd.f32 0.0009, %v853_v11  ;;  %v840_v20 = vmul.f32 %v2899_v27, %v2910_v35 }
 0x290   : > { %v2966_v30 = vmul.f32 0.11111111, %v1066_v39  ;;  %v1003_v43 = vadd.f32 %v981_v16, %v977_v21  ;;  %v839_v6 = vmul.f32 %v2902_v51, %v2914_v42  ;;  %v851_v4 = vadd.f32 0.0001, %v849_v8 }
 0x291   : > { %v1085_v9 = vpop.permute.xlu0 %1084  ;;  %v1129_v25 = vsub.f32 %v2949_v18, %v1127_v2  ;;  %v1131_v58 = vmul.f32 %v2959_v32, %v2959_v32  ;;  %v858_v39 = vmul.f32 %v856_v44, %v852_v63  ;;  %v1006_v21 = vadd.f32 0.0009, %v1004_v26 }
 0x292   : > { %v1093_v3 = vpop.permute.xlu1 %1092  ;;  %v1088_v23 = vadd.f32 %v1085_v9, %v2786_v54  ;;  %v1126_v9 = vmul.f32 %v2944_v1, %v2944_v1  ;;  %v1130_v36 = vmul.f32 %v2966_v30, %v2966_v30  ;;  %v857_v16 = vmul.f32 %v855_v62, %v851_v4 }
 0x293   : > { %v1095_v34 = vadd.f32 %v1093_v3, %v1089_v19  ;;  %v2964_v19 = vmul.f32 2.0, %v2944_v1  ;;  %v1000_v3 = vadd.f32 %v980_v60, %v976_v24  ;;  %v833_v51 = vmul.f32 %v2914_v42, %v2893_v38 }
 0x294   : > { %v1128_v61 = vsub.f32 %v1042_v45, %v1126_v9  ;;  %v842_v24 = vadd.f32 0.0001, %v840_v20  ;;  %v1005_v60 = vadd.f32 0.0009, %v1003_v43  ;;  %1711 = vrcp.f32 %v858_v39 }
 0x295   : > { %v1091_v59 = vpop.permute.xlu0 %1090  ;;  %v1097_v13 = vmul.f32 0.11111111, %v1095_v34  ;;  %v841_v34 = vadd.f32 0.0001, %v839_v6  ;;  %v984_v38 = vmul.f32 %v2930_v49, %v2904_v55  ;;  %1713 = vrcp.f32 %v857_v16 }
 0x296   : > { %v1094_v47 = vadd.f32 %v1091_v59, %v1088_v23  ;;  %v814_v54 = vpop.permute.xlu1 %813  ;;  %v999_v23 = vadd.f32 %v979_v14, %v975_v33  ;;  %v990_v33 = vmul.f32 %v2921_v50, %v2930_v49  ;;  %v1002_v14 = vadd.f32 0.0001, %v1000_v3 }
 0x297   : > { %v1133_v27 = vsub.f32 %v1097_v13, %v1131_v58  ;;  %v816_v31 = vadd.f32 %v814_v54, %v2806_v41  ;;  %v1141_v16 = vmul.f32 %v2957_v40, %v2959_v32  ;;  %v1135_v40 = vmul.f32 %v2959_v32, %v2938_v5 }
 0x298   : > { %v1096_v48 = vmul.f32 0.11111111, %v1094_v47  ;;  %v1001_v37 = vadd.f32 0.0001, %v999_v23  ;;  %v1008_v42 = vmul.f32 %v1006_v21, %v1002_v14  ;;  %v992_v43 = vadd.f32 0.0001, %v990_v33 }
 0x299   : > { %v812_v56 = vpop.permute.xlu0 %811  ;;  %v1155_v44 = vadd.f32 %v1133_v27, %v1129_v25 }
 0x29a   : > { %v964_v18 = vpop.permute.xlu1 %963  ;;  %v1132_v11 = vsub.f32 %v1096_v48, %v1130_v36  ;;  %v815_v45 = vadd.f32 %v812_v56, %v2812_v0  ;;  %v1007_v41 = vmul.f32 %v1005_v60, %v1001_v37  ;;  %v989_v0 = vmul.f32 %v2924_v29, %v2934_v57 }
 0x29b   : > { %v966_v26 = vadd.f32 %v964_v18, %v2822_v52  ;;  %v1151_v56 = vadd.f32 %v1131_v58, %v1127_v2  ;;  %v1150_v48 = vadd.f32 %v1130_v36, %v1126_v9  ;;  %1715 = vrcp.f32 %v1008_v42 }
 0x29c   : > { %v1154_v54 = vadd.f32 %v1132_v11, %v1128_v61  ;;  %v1157_v25 = vadd.f32 0.0009, %v1155_v44  ;;  %1717 = vrcp.f32 %v1007_v41  ;;  %v991_v23 = vadd.f32 0.0001, %v989_v0 }
 0x29d   : > { %v962_v59 = vpop.permute.xlu0 %961  ;;  %v1153_v39 = vadd.f32 0.0001, %v1151_v56  ;;  %v1152_v9 = vadd.f32 0.0001, %v1150_v48 }
 0x29e   : > { %v820_v47 = vpop.permute.xlu1 %819  ;;  %v965_v13 = vadd.f32 %v962_v59, %v2826_v12  ;;  %v1156_v52 = vadd.f32 0.0009, %v1154_v54  ;;  %v983_v12 = vmul.f32 %v2934_v57, %v2907_v28  ;;  %v1712_v60 = vpop.eup %1711  ;;  %v1140_v57 = vmul.f32 %v2964_v19, %v2966_v30 }
 0x29f   : > { %v822_v35 = vadd.f32 %v820_v47, %v816_v31  ;;  %v1159_v21 = vmul.f32 %v1157_v25, %v1153_v39  ;;  %v1714_v28 = vpop.eup %1713 }
 0x2a0   : > { %v1158_v11 = vmul.f32 %v1156_v52, %v1152_v9  ;;  %v1142_v52 = vadd.f32 0.0001, %v1140_v57 }
 0x2a1   : > { %v818_v8 = vpop.permute.xlu0 %817  ;;  %v824_v50 = vmul.f32 0.11111111, %v822_v35  ;;  %1719 = vrcp.f32 %v1159_v21 }
 0x2a2   : > { %v821_v62 = vadd.f32 %v818_v8, %v815_v45  ;;  %v970_v63 = vpop.permute.xlu1 %969  ;;  %1721 = vrcp.f32 %v1158_v11 }
 0x2a3   : > { %v836_v55 = vsub.f32 %v824_v50, %v834_v17  ;;  %v972_v49 = vadd.f32 %v970_v63, %v966_v26 }
 0x2a4   : > { %v823_v20 = vmul.f32 0.11111111, %v821_v62 }
 0x2a5   : > { %v968_v6 = vpop.permute.xlu0 %967  ;;  %v844_v3 = vmul.f32 2.0, %v836_v55  ;;  %v974_v18 = vmul.f32 0.11111111, %v972_v49 }
 0x2a6   : > { %v835_v4 = vsub.f32 %v823_v20, %v833_v51  ;;  %v971_v61 = vadd.f32 %v968_v6, %v965_v13  ;;  %v1115_v58 = vpop.permute.xlu1 %1114 }
 0x2a7   : > { %v846_v36 = vadd.f32 0.0009, %v844_v3  ;;  %v986_v59 = vsub.f32 %v974_v18, %v984_v38  ;;  %v1117_v14 = vadd.f32 %v1115_v58, %v2848_v7 }
 0x2a8   : > { %v843_v29 = vmul.f32 2.0, %v835_v4  ;;  %v973_v2 = vmul.f32 0.11111111, %v971_v61  ;;  %v1143_v61 = vadd.f32 0.0001, %v1141_v16 }
 0x2a9   : > { %v1113_v17 = vpop.permute.xlu0 %1112  ;;  %v848_v31 = vmul.f32 %v846_v36, %v842_v24  ;;  %v994_v33 = vmul.f32 2.0, %v986_v59 }
 0x2aa   : > { %v845_v27 = vadd.f32 0.0009, %v843_v29  ;;  %v985_v51 = vsub.f32 %v973_v2, %v983_v12  ;;  %v1116_v37 = vadd.f32 %v1113_v17, %v2852_v46  ;;  %v1121_v35 = vpop.permute.xlu1 %1120  ;;  %v1134_v46 = vmul.f32 %v2966_v30, %v2944_v1 }
 0x2ab   : > { %v996_v8 = vadd.f32 0.0009, %v994_v33  ;;  %v1123_v38 = vadd.f32 %v1121_v35, %v1117_v14  ;;  %v862_v44 = vmul.f32 %v1712_v60, %v848_v31 }
 0x2ac   : > { %v847_v45 = vmul.f32 %v845_v27, %v841_v34  ;;  %v993_v47 = vmul.f32 2.0, %v985_v51  ;;  %v1716_v34 = vpop.eup %1715 }
 0x2ad   : > { %v1119_v42 = vpop.permute.xlu0 %1118  ;;  %v998_v41 = vmul.f32 %v996_v8, %v992_v43  ;;  %v1125_v54 = vmul.f32 0.11111111, %v1123_v38  ;;  %v864_v19 = vsub.f32 1.0, %v862_v44  ;;  %v1718_v5 = vpop.eup %1717 }
 0x2ae   : > { %v995_v24 = vadd.f32 0.0009, %v993_v47  ;;  %v1122_v62 = vadd.f32 %v1119_v42, %v1116_v37  ;;  %v860_v7 = vmul.f32 %v1714_v28, %v847_v45  ;;  %v722_v0 = vpop.permute.xlu1 %721  ;;  %v1720_v17 = vpop.eup %1719 }
 0x2af   : > { %v1137_v32 = vsub.f32 %v1125_v54, %v1135_v40  ;;  %v724_v20 = vadd.f32 %v722_v0, %v2872_v53  ;;  %v1012_v63 = vmul.f32 %v1716_v34, %v998_v41  ;;  %v866_v48 = vmul.f32 0.5, %v864_v19  ;;  %v1722_v51 = vpop.eup %1721 }
 0x2b0   : > { %v997_v26 = vmul.f32 %v995_v24, %v991_v23  ;;  %v1124_v50 = vmul.f32 0.11111111, %v1122_v62  ;;  %v863_v56 = vsub.f32 1.0, %v860_v7 }
 0x2b1   : > { %v720_v13 = vpop.permute.xlu0 %719  ;;  %v1145_v25 = vmul.f32 2.0, %v1137_v32  ;;  %v1014_v4 = vsub.f32 1.0, %v1012_v63  ;;  %v868_v2 = vmax.f32 %v866_v48, 0.0 }
 0x2b2   : > { %v1136_v55 = vsub.f32 %v1124_v50, %v1134_v46  ;;  %v723_v43 = vadd.f32 %v720_v13, %v2876_v15  ;;  %v1010_v49 = vmul.f32 %v1718_v5, %v997_v26  ;;  %v865_v6 = vmul.f32 0.5, %v863_v56  ;;  %v728_v30 = vpop.permute.xlu1 %727 }
 0x2b3   : > { %v1147_v18 = vadd.f32 0.0009, %v1145_v25  ;;  %v730_v29 = vadd.f32 %v728_v30, %v724_v20  ;;  %v1016_v12 = vmul.f32 0.5, %v1014_v4  ;;  %v870_v31 = vmin.f32 %v868_v2, 1.0 }
 0x2b4   : > { %v1144_v1 = vmul.f32 2.0, %v1136_v55  ;;  %v1013_v3 = vsub.f32 1.0, %v1010_v49  ;;  %v867_v9 = vmax.f32 %v865_v6, 0.0 }
 0x2b5   : > { %v726_v39 = vpop.permute.xlu0 %725  ;;  %v1149_v36 = vmul.f32 %v1147_v18, %v1143_v61  ;;  %v732_v15 = vmul.f32 0.11111111, %v730_v29  ;;  %v1018_v59 = vmax.f32 %v1016_v12, 0.0 }
 0x2b6   : > { %v1146_v53 = vadd.f32 0.0009, %v1144_v1  ;;  %v729_v58 = vadd.f32 %v726_v39, %v723_v43  ;;  %v1015_v23 = vmul.f32 0.5, %v1013_v3  ;;  %v869_v57 = vmin.f32 %v867_v9, 1.0 }
 0x2b7   : > { %v734_v60 = vmul.f32 %v2435_v22, %v732_v15  ;;  %v1020_v11 = vmin.f32 %v1018_v59, 1.0  ;;  %v1163_v33 = vmul.f32 %v1720_v17, %v1149_v36 }
 0x2b8   : > { %v1148_v21 = vmul.f32 %v1146_v53, %v1142_v52  ;;  %v731_v27 = vmul.f32 0.11111111, %v729_v58  ;;  %v1017_v16 = vmax.f32 %v1015_v23, 0.0 }
 0x2b9   : > { %v1022_v47 = vmul.f32 %v1020_v11, %v734_v60  ;;  %v872_v37 = vmul.f32 %v870_v31, %v734_v60  ;;  %v1165_v35 = vsub.f32 1.0, %v1163_v33 }
 0x2ba   : > { %v733_v14 = vmul.f32 %v2395_v10, %v731_v27  ;;  %v1019_v28 = vmin.f32 %v1017_v16, 1.0  ;;  %v1161_v45 = vmul.f32 %v1722_v51, %v1148_v21 }
 0x2bb   : > { %v1167_v42 = vmul.f32 0.5, %v1165_v35 }
 0x2bc   : > { %v1021_v8 = vmul.f32 %v1019_v28, %v733_v14  ;;  %v871_v40 = vmul.f32 %v869_v57, %v733_v14  ;;  %v1164_v38 = vsub.f32 1.0, %v1161_v45 }
 0x2bd   : > { %v1169_v7 = vmax.f32 %v1167_v42, 0.0 }
 0x2be   : > { %v1023_v44 = vadd.f32 %v1022_v47, %v1021_v8  ;;  %v873_v24 = vadd.f32 %v872_v37, %v871_v40  ;;  %v1166_v62 = vmul.f32 0.5, %v1164_v38 }
 0x2bf   : > { %v1171_v41 = vmin.f32 %v1169_v7, 1.0 }
 0x2c0   : > { %1024 = vadd.xlane.f32.xlu1 %v1023_v44  ;;  %874 = vadd.xlane.f32.xlu0 %v873_v24  ;;  %v1168_v22 = vmax.f32 %v1166_v62, 0.0 }
 0x2c1   : > { %v1173_v10 = vmul.f32 %v1171_v41, %v734_v60 }
 0x2c2   : > { %v1170_v54 = vmin.f32 %v1168_v22, 1.0 }
 0x2c4   : > { %v1172_v19 = vmul.f32 %v1170_v54, %v733_v14 }
 0x2c6   : > { %v1174_v34 = vadd.f32 %v1173_v10, %v1172_v19 }
 0x2c8   : > { %1175 = vadd.xlane.f32.xlu0 %v1174_v34 }
 0x34d   : > { %v1025_v26 = vpop.xlane.xlu1 %1024  ;;  %v875_v46 = vpop.xlane.xlu0 %874 }
 0x34e   : > { %v1026_v50 = vrot.slane %v1025_v26, 4  ;;  %v876_v0 = vrot.slane %v875_v46, 4 }
 0x350   : > { %v1027_v56 = vadd.f32 %v1026_v50, %v1025_v26  ;;  %v877_v5 = vadd.f32 %v876_v0, %v875_v46 }
 0x352   : > { %v1028_v32 = vrot.slane %v1027_v56, 2  ;;  %v878_v13 = vrot.slane %v877_v5, 2 }
 0x354   : > { %v1029_v20 = vadd.f32 %v1028_v32, %v1027_v56  ;;  %v879_v63 = vadd.f32 %v878_v13, %v877_v5 }
 0x355   : > { %v1176_v48 = vpop.xlane.xlu0 %1175 }
 0x356   : > { %v1177_v55 = vrot.slane %v1176_v48, 4  ;;  %v880_v43 = vrot.slane %v879_v63, 1  ;;  %v1030_v49 = vrot.slane %v1029_v20, 1 }
 0x358   : > { %v1178_v6 = vadd.f32 %v1177_v55, %v1176_v48  ;;  %v881_v25 = vadd.f32 %v880_v43, %v879_v63  ;;  %v1031_v4 = vadd.f32 %v1030_v49, %v1029_v20 }
 0x35a   : > { %v1179_v61 = vrot.slane %v1178_v6, 2  ;;  %1571 = vpush %v881_v25 }
 0x35b   : > { %1573 = vpush %v1031_v4 }
 0x35c   : > { %v1180_v52 = vadd.f32 %v1179_v61, %v1178_v6 }
 0x35e   : > { %v1181_v1 = vrot.slane %v1180_v52, 1 }
 0x360   : > { %v1182_v30 = vadd.f32 %v1181_v1, %v1180_v52 }
 0x362   : > { %1575 = vpush %v1182_v30 }
 0x38b   : > { %s1572_s5 = spop %1571 }
 0x38c   : > { %s1574_s18 = spop %1573 }
 0x38d   : > { %s1033_s28 = sadd.f32 %s1574_s18, %s1572_s5 }
 0x393   : > { %s1576_s9 = spop %1575 }
 0x394   : > { %s1184_s11 = sadd.f32 %s1576_s9, %s1033_s28 }
 0x396   : > { %s1186_s0 = smul.f32 9.448224e-05, %s1184_s11 }
 0x398   : > { %s1187_s13 = sadd.f32 %s1186_s0, %s1185_s12 }
 0x39a   : > { %1189 = sst [smem:[#allocation7]] %s1187_s13 }
 0x39b PF: > { %1192 = sbr.rel (%p1554_p12) target bundleno = 1289 (0x509), region = 64  ;;  %v3220_v3 = vld [vmem:[#allocation33_spill] sm:$0xff] (!%p1554_p12)  ;;  %v3221_v39 = vld [vmem:[#allocation34_spill] sm:$0xff] (!%p1554_p12)  ;;  %v3222_v12 = vld [vmem:[#allocation35_spill] sm:$0xff] (!%p1554_p12)  ;;  %s2001_s23 = smov (!%p1554_p12), 127  }
 0x39c   : > { %v1215_v18 = vrot.slane (!%p1554_p12), %v3220_v3, 1  ;;  %v1216_v29 = vrot.slane (!%p1554_p12), %v3221_v39, 1  ;;  %v1231_v2 = vrot.slane (!%p1554_p12), %v3222_v12, 1  ;;  %1223 = vrot.lane.b32.xlu1 (!%p1554_p12), %v3222_v12, %s2001_s23  ;;  %1207 = vrot.lane.b32.xlu0 (!%p1554_p12), %v3220_v3, %s2001_s23  ;;  %v3223_v53 = vld [vmem:[#allocation36_spill] sm:$0xff] (!%p1554_p12)  ;;  %v3224_v23 = vld [vmem:[#allocation37_spill] sm:$0xff] (!%p1554_p12)  ;;  %v3226_v17 = vld [vmem:[#allocation38_spill] sm:$0xff] (!%p1554_p12) }
 0x39d   : > { %v1232_v58 = vrot.slane (!%p1554_p12), %v3223_v53, 1  ;;  %v1251_v9 = vrot.slane (!%p1554_p12), %v3224_v23, 1  ;;  %v1252_v21 = vrot.slane (!%p1554_p12), %v3226_v17, 1  ;;  %v3046_v44 = vld [vmem:[%s2361_s6 + $0x8] sm:$0xff] (!%p1554_p12)  ;;  %v3049_v24 = vld [vmem:[%s2361_s6] sm:$0xff] (!%p1554_p12)  ;;  %s1557_s26 = sld [smem:[#allocation7 + $0x1]] (!%p1554_p12) }
 0x39e   : > { %v1217_v15 = vsel (!%p1554_p12), %vm599_vm10, %v1215_v18, %v1216_v29  ;;  %v1218_v59 = vsel (!%p1554_p12), %vm599_vm10, %v1216_v29, %v1215_v18  ;;  %v1202_v34 = vrot.slane (!%p1554_p12), %v3046_v44, 1  ;;  %v1201_v26 = vrot.slane (!%p1554_p12), %v3049_v24, 1  ;;  %v3227_v43 = vld [vmem:[#allocation32_spill] sm:$0xff] (!%p1554_p12) }
 0x39f   : > { %v1219_v27 = vsub.f32 (!%p1554_p12), %v3220_v3, %v1217_v15  ;;  %v1220_v16 = vsub.f32 (!%p1554_p12), %v3221_v39, %v1218_v59  ;;  %v1233_v51 = vsel (!%p1554_p12), %vm599_vm10, %v1231_v2, %v1232_v58  ;;  %v1234_v60 = vsel (!%p1554_p12), %vm599_vm10, %v1232_v58, %v1231_v2 }
 0x3a0   : > { %v1235_v11 = vsub.f32 (!%p1554_p12), %v3222_v12, %v1233_v51  ;;  %v1236_v31 = vsub.f32 (!%p1554_p12), %v3223_v53, %v1234_v60  ;;  %v1253_v33 = vsel (!%p1554_p12), %vm599_vm10, %v1251_v9, %v1252_v21  ;;  %v1254_v14 = vsel (!%p1554_p12), %vm599_vm10, %v1252_v21, %v1251_v9  ;;  %1225 = vrot.lane.b32.xlu1 (!%p1554_p12), %v3223_v53, %s2001_s23 }
 0x3a1   : > { %1209 = vrot.lane.b32.xlu0 (!%p1554_p12), %v3221_v39, %s2001_s23  ;;  %v1221_v28 = vand.u32 (!%p1554_p12), 2147483647, %v1219_v27  ;;  %v1222_v57 = vand.u32 (!%p1554_p12), 2147483647, %v1220_v16  ;;  %v1255_v45 = vsub.f32 (!%p1554_p12), %v3224_v23, %v1253_v33  ;;  %v1256_v47 = vsub.f32 (!%p1554_p12), %v3226_v17, %v1254_v14 }
 0x3a2   : > { %v1237_v37 = vand.u32 2147483647, %v1235_v11  ;;  %v1238_v35 = vand.u32 2147483647, %v1236_v31  ;;  %v1204_v50 = vsel %vm599_vm10, %v1202_v34, %v1201_v26  ;;  %v1203_v56 = vsel %vm599_vm10, %v1201_v26, %v1202_v34 }
 0x3a3   : > { %v1258_v8 = vand.u32 2147483647, %v1256_v47  ;;  %v1257_v42 = vand.u32 2147483647, %v1255_v45  ;;  %v1206_v0 = vsub.f32 %v3046_v44, %v1204_v50  ;;  %v1205_v5 = vsub.f32 %v3049_v24, %v1203_v56 }
 0x3a4   : > { %v1241_v40 = vadd.f32 %v1237_v37, %v1221_v28  ;;  %v1242_v38 = vadd.f32 %v1238_v35, %v1222_v57  ;;  %1245 = vrot.lane.b32.xlu1 %v3226_v17, %s2001_s23 }
 0x3a5   : > { %1243 = vrot.lane.b32.xlu0 %v3224_v23, %s2001_s23  ;;  %v1298_v32 = vand.u32 2147483647, %v1206_v0  ;;  %v1297_v20 = vand.u32 2147483647, %v1205_v5 }
 0x3a6   : > { %v1262_v62 = vadd.f32 %v1258_v8, %v1242_v38  ;;  %v1261_v7 = vadd.f32 %v1257_v42, %v1241_v40  ;;  %v3228_v42 = vld [vmem:[#allocation31_spill] sm:$0xff] }
 0x3a8   : > { %v1272_v22 = vmul.f32 0.33333334, %v1262_v62  ;;  %1197 = vrot.lane.b32.xlu1 %v3046_v44, %s2001_s23  ;;  %v1271_v41 = vmul.f32 0.33333334, %v1261_v7 }
 0x3a9   : > { %1195 = vrot.lane.b32.xlu0 %v3049_v24, %s2001_s23 }
 0x3aa   : > { %v1274_v54 = vsub.f32 0.0, %v1272_v22  ;;  %v1273_v10 = vsub.f32 0.0, %v1271_v41 }
 0x3ac   : > { %v1277_v19 = vmul.f32 1.442695, %v1274_v54  ;;  %v1275_v46 = vmul.f32 1.442695, %v1273_v10 }
 0x3ae   : > { %1723 = vpow2.f32 %v1277_v19 }
 0x3af   : > { %1725 = vpow2.f32 %v1275_v46 }
 0x3b8   : > { %v1724_v13 = vpop.eup %1723 }
 0x3b9   : > { %v1300_v63 = vmul.f32 %v1724_v13, %v1298_v32  ;;  %v1726_v48 = vpop.eup %1725 }
 0x3ba   : > { %v1299_v55 = vmul.f32 %v1726_v48, %v1297_v20 }
 0x3bb   : > { %v1302_v49 = vmul.f32 %v3227_v43, %v1300_v63 }
 0x3bd   : > { %v1303_v6 = vadd.f32 %v1302_v49, %v1299_v55 }
 0x3cc   : > { %1304 = vadd.xlane.f32.xlu1 %v1303_v6 }
 0x40e   : > { %v1224_v25 = vpop.permute.xlu1 %1223  ;;  %v1208_v4 = vpop.permute.xlu0 %1207 }
 0x40f   : > { %v1227_v61 = vsub.f32 %v3222_v12, %v1224_v25  ;;  %v1211_v52 = vsub.f32 %v3220_v3, %v1208_v4 }
 0x411   : > { %v1229_v2 = vand.u32 2147483647, %v1227_v61  ;;  %v1213_v58 = vand.u32 2147483647, %v1211_v52 }
 0x412   : > { %v1226_v1 = vpop.permute.xlu1 %1225 }
 0x413   : > { %v1210_v30 = vpop.permute.xlu0 %1209  ;;  %v1228_v18 = vsub.f32 %v3223_v53, %v1226_v1  ;;  %v1239_v16 = vadd.f32 %v1229_v2, %v1213_v58 }
 0x414   : > { %v1212_v29 = vsub.f32 %v3221_v39, %v1210_v30 }
 0x415   : > { %v1230_v9 = vand.u32 2147483647, %v1228_v18 }
 0x416   : > { %v1214_v36 = vand.u32 2147483647, %v1212_v29  ;;  %v1246_v15 = vpop.permute.xlu1 %1245 }
 0x417   : > { %v1244_v59 = vpop.permute.xlu0 %1243  ;;  %v1248_v21 = vsub.f32 %v3226_v17, %v1246_v15 }
 0x418   : > { %v1247_v27 = vsub.f32 %v3224_v23, %v1244_v59  ;;  %v1240_v12 = vadd.f32 %v1230_v9, %v1214_v36 }
 0x419   : > { %v1250_v51 = vand.u32 2147483647, %v1248_v21 }
 0x41a   : > { %v1249_v3 = vand.u32 2147483647, %v1247_v27  ;;  %v1198_v57 = vpop.permute.xlu1 %1197 }
 0x41b   : > { %v1260_v60 = vadd.f32 %v1250_v51, %v1240_v12  ;;  %v1196_v45 = vpop.permute.xlu0 %1195  ;;  %v1200_v17 = vsub.f32 %v3046_v44, %v1198_v57 }
 0x41c   : > { %v1259_v11 = vadd.f32 %v1249_v3, %v1239_v16  ;;  %v1199_v23 = vsub.f32 %v3049_v24, %v1196_v45 }
 0x41d   : > { %v1264_v31 = vmul.f32 0.33333334, %v1260_v60  ;;  %v1281_v47 = vand.u32 2147483647, %v1200_v17 }
 0x41e   : > { %v1263_v53 = vmul.f32 0.33333334, %v1259_v11  ;;  %v1280_v37 = vand.u32 2147483647, %v1199_v23 }
 0x41f   : > { %v1266_v33 = vsub.f32 0.0, %v1264_v31 }
 0x420   : > { %v1265_v39 = vsub.f32 0.0, %v1263_v53 }
 0x421   : > { %v1269_v14 = vmul.f32 1.442695, %v1266_v33 }
 0x422   : > { %v1267_v28 = vmul.f32 1.442695, %v1265_v39 }
 0x423   : > { %1727 = vpow2.f32 %v1269_v14 }
 0x424   : > { %1729 = vpow2.f32 %v1267_v28 }
 0x42d   : > { %v1728_v35 = vpop.eup %1727 }
 0x42e   : > { %v1730_v8 = vpop.eup %1729  ;;  %v1283_v40 = vmul.f32 %v1728_v35, %v1281_v47 }
 0x42f   : > { %v1282_v38 = vmul.f32 %v1730_v8, %v1280_v37 }
 0x430   : > { %v1285_v62 = vmul.f32 %v3228_v42, %v1283_v40 }
 0x431   : > { %v1284_v7 = vmul.f32 %v3228_v42, %v1282_v38 }
 0x433   : > { %v1286_v22 = vadd.f32 %v1285_v62, %v1284_v7 }
 0x435   : > { %1287 = vadd.xlane.f32.xlu0 %v1286_v22 }
 0x459   : > { %v1305_v41 = vpop.xlane.xlu1 %1304 }
 0x45a   : > { %v1306_v54 = vrot.slane %v1305_v41, 4 }
 0x45c   : > { %v1307_v10 = vadd.f32 %v1306_v54, %v1305_v41 }
 0x45e   : > { %v1308_v19 = vrot.slane %v1307_v10, 2 }
 0x460   : > { %v1309_v24 = vadd.f32 %v1308_v19, %v1307_v10 }
 0x462   : > { %v1310_v0 = vrot.slane %v1309_v24, 1 }
 0x464   : > { %v1311_v32 = vadd.f32 %v1310_v0, %v1309_v24 }
 0x4c2   : > { %v1288_v34 = vpop.xlane.xlu0 %1287 }
 0x4c3   : > { %v1289_v44 = vrot.slane %v1288_v34, 4 }
 0x4c5   : > { %v1290_v26 = vadd.f32 %v1289_v44, %v1288_v34 }
 0x4c7   : > { %v1291_v46 = vrot.slane %v1290_v26, 2 }
 0x4c9   : > { %v1292_v50 = vadd.f32 %v1291_v46, %v1290_v26 }
 0x4cb   : > { %v1293_v56 = vrot.slane %v1292_v50, 1 }
 0x4cd   : > { %v1294_v5 = vadd.f32 %v1293_v56, %v1292_v50 }
 0x4cf   : > { %1577 = vpush %v1294_v5 }
 0x4d0   : > { %1579 = vpush %v1311_v32 }
 0x500   : > { %s1578_s17 = spop %1577 }
 0x501   : > { %s1296_s6 = smul.f32 0.000246063, %s1578_s17  ;;  %s1580_s1 = spop %1579 }
 0x502   : > { %s1313_s7 = smul.f32 0.00026041668, %s1580_s1 }
 0x504   : > { %s1314_s29 = sadd.f32 %s1313_s7, %s1296_s6 }
 0x506   : > { %s1315_s14 = sadd.f32 %s1557_s26, %s1314_s29 }
 0x508   : > { %1317 = sst [smem:[#allocation7 + $0x1]] %s1315_s14 }
 0x509 PF: > { %p1558_p1 = scmp.ne.s32.totalorder %s1969_s21, 3 }
 0x50a   : > { %v1322_v13 = vld [vmem:[#allocation2] sm:$0xff] (!%p1558_p1)  ;;  %v1323_v20 = vld [vmem:[#allocation2 + $0x8] sm:$0xff] (!%p1558_p1)  ;;  %v1324_v63 = vld [vmem:[#allocation3] sm:$0xff] (!%p1558_p1)  ;;  %s1359_s21 = sld [smem:[#allocation7]] (!%p1558_p1)  ;;  %s1559_s27 = sld [smem:[#allocation7 + $0x1]] (!%p1558_p1) }
 0x50b   : > { %1321 = sbr.rel (%p1558_p1) target bundleno = 1513 (0x5e9), region = 68  ;;  %v1325_v48 = vld [vmem:[#allocation3 + $0x8] sm:$0xff] (!%p1558_p1)  ;;  %v1326_v55 = vld [vmem:[#allocation4] sm:$0xff] (!%p1558_p1)  ;;  %v1327_v43 = vld [vmem:[#allocation4 + $0x8] sm:$0xff] (!%p1558_p1)  ;;  %vm1328_vm12 = vcmp.lt.f32.partialorder (!%p1558_p1), %v1322_v13, 10000.0  ;;  %vm1329_vm13 = vcmp.lt.f32.partialorder (!%p1558_p1), %v1323_v20, 10000.0 }
 0x50c   : > { %vm1332_vm14 = vcmp.lt.f32.partialorder (!%p1558_p1), %v1324_v63, 10000.0  ;;  %v1330_v49 = vsel (!%p1558_p1), %vm1328_vm12, %v1322_v13, 0.0  ;;  %v1331_v6 = vsel (!%p1558_p1), %vm1329_vm13, %v1323_v20, 0.0  ;;  %vm1333_vm15 = vcmp.lt.f32.partialorder (!%p1558_p1), %v1325_v48, 10000.0  ;;  %v3229_v16 = vld [vmem:[#allocation30_spill] sm:$0xff] (!%p1558_p1) }
 0x50d   : > { %v1334_v25 = vsel (!%p1558_p1), %vm1332_vm14, %v1324_v63, 0.0  ;;  %v1335_v4 = vsel (!%p1558_p1), %vm1333_vm15, %v1325_v48, 0.0  ;;  %vm1338_vm0 = vcmp.lt.f32.partialorder (!%p1558_p1), %v1326_v55, 10000.0  ;;  %vm1339_vm1 = vcmp.lt.f32.partialorder (!%p1558_p1), %v1327_v43, 10000.0 }
 0x50e   : > { %v1336_v61 = vadd.f32 (!%p1558_p1), %v1334_v25, %v1330_v49  ;;  %v1337_v52 = vadd.f32 (!%p1558_p1), %v1335_v4, %v1331_v6  ;;  %v1340_v1 = vsel (!%p1558_p1), %vm1338_vm0, %v1326_v55, 0.0  ;;  %v1341_v30 = vsel (!%p1558_p1), %vm1339_vm1, %v1327_v43, 0.0 }
 0x50f   : > { %vm1358_vm2 = vcmp.eq.s32.totalorder (!%p1558_p1), %v3229_v16, 1  ;;  %vm1355_vm3 = vcmp.eq.s32.totalorder (!%p1558_p1), %v3229_v16, 0  ;;  %vm1363_vm4 = vcmp.eq.s32.totalorder (!%p1558_p1), %v3229_v16, 2 }
 0x510   : > { %v1342_v18 = vadd.f32 (!%p1558_p1), %v1340_v1, %v1336_v61  ;;  %v1343_v29 = vadd.f32 (!%p1558_p1), %v1341_v30, %v1337_v52  ;;  %v1360_v12 = vstv (!%p1558_p1), %s1359_s21  ;;  %v1365_v51 = vstv (!%p1558_p1), %s1559_s27 }
 0x511   : > { %v1361_v3 = vsel (!%p1558_p1), %vm1358_vm2, %v1360_v12, 0.0  ;;  %v1366_v31 = vsel (!%p1558_p1), %vm1363_vm4, %v1365_v51, 0.0 }
 0x512   : > { %v1344_v2 = vadd.f32 %v1343_v29, %v1342_v18 }
 0x514   : > { %1345 = vadd.xlane.f32.xlu0 %v1344_v2 }
 0x5a1   : > { %v1346_v58 = vpop.xlane.xlu0 %1345 }
 0x5a2   : > { %v1347_v9 = vrot.slane %v1346_v58, 4 }
 0x5a4   : > { %v1348_v36 = vadd.f32 %v1347_v9, %v1346_v58 }
 0x5a6   : > { %v1349_v15 = vrot.slane %v1348_v36, 2 }
 0x5a8   : > { %v1350_v59 = vadd.f32 %v1349_v15, %v1348_v36 }
 0x5aa   : > { %v1351_v21 = vrot.slane %v1350_v59, 1 }
 0x5ac   : > { %v1352_v27 = vadd.f32 %v1351_v21, %v1350_v59 }
 0x5ae   : > { %1581 = vpush %v1352_v27 }
 0x5df   : > { %s1582_s2 = spop %1581 }
 0x5e0   : > { %s1354_s5 = smul.f32 0.00024414063, %s1582_s2 }
 0x5e2   : > { %v1356_v60 = vstv %s1354_s5 }
 0x5e3   : > { %v1357_v11 = vsel %vm1355_vm3, %v1356_v60, 0.0 }
 0x5e4   : > { %v1362_v53 = vadd.f32 %v1361_v3, %v1357_v11 }
 0x5e6   : > { %v1367_v33 = vadd.f32 %v1366_v31, %v1362_v53 }
 0x5e8   : > { %1368 = vst [vmem:[%s355_s30] sm:$0x1] %v1367_v33 }
 0x5e9 PF: > { %s1560_s18 = sshll.u32 %s1973_s22, 4  ;;  %s1382_s11 = sshll.u32 %s355_s30, 4  ;;  %s1383_s11 = int_to_ptr.vmem [resolvable:$true] %s1382_s11 }
 0x5ea   : > { %s3084_s9 = scalar_lea.hbm %s3147_s4, %s1560_s18  ;;  %s1370_s0 = scalar_lea.sflag [#allocation10], %s2350_s8 }
 0x5eb   : > { %s1851_s13 = scalar_lea.vmem %s1383_s11, 16  ;;  %p3230_p9 = scmp.ne.s32.totalorder %s3202_s20, 0 }
 0x5ec   : > { %p1852_p0 = scmp.ne.s32.totalorder %s1383_s11, %s1851_s13  ;;  %s2002_s23 = smov [#allocation16]  }
 0x5ed   : > { %s1855_s26 = sshll.u32 %s2002_s23, 4  ;;  %s1856_s26 = int_to_ptr.vmem [resolvable:$false] %s1855_s26 }
 0x5ee   : > { %p1853_p6 = pnand %p1852_p0, %p3230_p9  ;;  %s1857_s17 = scalar_lea.vmem %s1856_s26, 32 }
 0x5ef   : > { %p1858_p11 = scmp.lt.s32.totalorder %s1383_s11, %s1856_s26  ;;  %p1859_p8 = scmp.lt.s32.totalorder %s1857_s17, %s1851_s13 }
 0x5f0   : > { %p1854_p10 = pneg %p1853_p6 }
 0x5f1   : > { %p1860_p3 = por %p1859_p8, %p1858_p11 }
 0x5f3   : > { %p1861_p5 = pnand %p1860_p3, %p1854_p10 }
 0x5f5   : > { %1864 = shalt.err (!%p1861_p5)
}
 0x5f6   : > { %s1865_s22 = scalar_lea.hbm %s3084_s9, 16  ;;  %s1869_s6 = scalar_lea.hbm %s3147_s4, 32 }
 0x5f7   : > { %p1866_p2 = scmp.ne.s32.totalorder %s3084_s9, %s1865_s22  ;;  %p1870_p12 = scmp.lt.u32.totalorder %s3084_s9, %s3147_s4 }
 0x5f8   : > { %p1871_p13 = scmp.lt.u32.totalorder %s1869_s6, %s1865_s22  ;;  %p1873_p0 = scmp.lt.u32.totalorder %s1865_s22, %s3084_s9 }
 0x5f9   : > { %p1867_p4 = pnand %p1866_p2, %p3230_p9 }
 0x5fa   : > { %p1872_p1 = por %p1871_p13, %p1870_p12 }
 0x5fb   : > { %p1868_p7 = pneg %p1867_p4 }
 0x5fc   : > { %p1874_p6 = por %p1873_p0, %p1872_p1 }
 0x5fe   : > { %p1875_p10 = pnand %p1874_p6, %p1868_p7 }
 0x600   : > { %1878 = shalt.err (!%p1875_p10)
}
 0x601   : > { %1591 = dma.vmem_to_hbm [thread:$0]  (%p3230_p9), %s1383_s11, 16, %s3084_s9, %s1370_s0  }
 0x602 PF: > { %p1611_p11 = scmp.ge.s32.totalorder %s1985_s25, 2  ;;  %s1394_s29 = sand.u32 1, %s1945_s15  }
 0x603   : > { %p3231_p8 = scmp.ne.s32.totalorder %s3203_s10, 0  ;;  %s1395_s14 = scalar_lea.sflag [#allocation10], %s1394_s29 }
 0x605   : > { %p1607_p3 = pnand %p1611_p11, %p3231_p8 }
 0x607   : > { %1940 = dma.done.wait (!%p1607_p3), %s1395_s14, 16  }
 0x608   : > { %1942 = vsyncadd (!%p1607_p3), %s1395_s14, 4294967280  ;;  %s26_s25 = sadd.s32 1, %s1985_s25   ;;  %s3232_s21 = sld [smem:[#allocation22_spill]] }
 0x609   : > { %p23_p5 = scmp.ge.s32.totalorder %s26_s25, 10   ;;  %s3233_s17 = sld [smem:[#allocation28_spill]] }
 0x60a   : > { %s3234_s20 = sld [smem:[#allocation23_spill]]  ;;  %s3235_s27 = sld [smem:[#allocation27_spill]] }
 0x60b   : > { %s3236_s2 = sld [smem:[#allocation24_spill]]  ;;  %s3237_s23 = sld [smem:[#allocation25_spill]] }
 0x60c   : > { %s3238_s5 = sld [smem:[#allocation26_spill]]  ;;  %s3239_s15 = smov %s1949_s16 }
 0x60d   : > { %s3241_s18 = smov %s1961_s19  ;;  %s3245_s22 = smov %s1981_s24 }
 0x60e   : > { %s3240_s16 = smov %s3232_s21  ;;  %25 = sbr.rel (!%p23_p5) target bundleno = 17 (0x11), region = 146 }
 0x610   : > { %s3242_s19 = smov %s3234_s20  ;;  %s3243_s20 = smov %s3235_s27 }
 0x611   : > { %s3244_s21 = smov %s3236_s2 }
 0x612   : > { %s3246_s24 = smov %s3238_s5 }
 0x615   :  { %1399 = vsyncpa [#allocation9], 1 }
 0x616   :  { %1401 = vsyncpa [#allocation9 + $0x1], 1 }
 0x617   :  { %1402 = vsyncpa [#allocation12], 1 }
 0x618   :  { %1404 = vsyncpa [#allocation12 + $0x1], 1 }
 0x619   :  { %1405 = vsyncpa [#allocation15], 1 }
 0x61a   :  { %1407 = vsyncpa [#allocation15 + $0x1], 1 }
 0x61b   :  { %1408 = vsyncpa [#allocation10], 1 }
 0x61c   :  { %1410 = vsyncpa [#allocation10 + $0x1], 1 }

</bundles_post_ra>
